<compile_context>
chip_gen: v5e
topology: v5e:2x2
jax: 0.10.0
libtpu: 0.0.40
codegen_flags: <defaults>
</compile_context>

<pallas_src>
import functools

import jax
import jax.numpy as jnp
from jax import lax
from jax.experimental import pallas as pl
from jax.experimental.pallas import tpu as pltpu

HIDDEN = 32          # H
INPUT = 1
NUM_LAYERS = 2       # hard-coded as two staggered cells in the kernel (matches the spec)
OUTPUT = 1
GP = 128             # per-gate lane padding (one vreg per gate)
HP = 128             # padded hidden / K dim carried through the recurrence


def _gru_kernel(T,
                x_ref,        # (B_pad, T_pad)  time on lanes
                wih0_ref,     # (1, 3*GP)   W_ih_l0 (input_size == 1), gate-padded
                bih0_ref,     # (1, 3*GP)   b_ih_l0 with b_hh_l0 folded in for r,z
                w01_ref,      # (HP, 6*GP)  [W_hh_l0 | W_ih_l1], gate-padded, K zero-padded
                bi1_ref,      # (1, 3*GP)   b_ih_l1 with b_hh_l1 folded in for r,z
                bhn0_ref,     # (1, GP)     b_hh_l0 n-gate
                whh1_ref,     # (HP, 3*GP)  W_hh_l1
                bhn1_ref,     # (1, GP)     b_hh_l1 n-gate
                wfc_ref,      # (HP, GP)    fc weight (col 0 valid)
                bfc_ref,      # (1, GP)
                out_ref):     # (B_pad, GP)
    B = x_ref.shape[0]
    G3 = 3 * GP

    # ---- loop-invariant loads / broadcasts (hoisted: JAX does not CSE broadcasts in loops) ----
    x_all = x_ref[...]                                           # (B, T_pad)
    t_iota = lax.broadcasted_iota(jnp.int32, x_all.shape, 1)
    w01 = w01_ref[...]
    whh1 = whh1_ref[...]
    wih0 = jnp.broadcast_to(wih0_ref[...], (B, G3))
    bih0 = jnp.broadcast_to(bih0_ref[...], (B, G3))
    bi1 = jnp.broadcast_to(bi1_ref[...], (B, G3))
    bhn0 = jnp.broadcast_to(bhn0_ref[...], (B, GP))
    bhn1 = jnp.broadcast_to(bhn1_ref[...], (B, GP))

    def gi0_of(t):
        # Layer-0 input gates for step t (input_size == 1 -> broadcast multiply).
        # Depends only on x and t, so it sits off the recurrent dependency chain.
        x_col = jnp.sum(jnp.where(t_iota == t, x_all, 0.0), axis=1, keepdims=True)  # (B, 1)
        return x_col * wih0 + bih0                                                   # (B, 3*GP)

    def cell(gi, gh, bhn, h_prev):
        # PyTorch GRU gate order (r, z, n); all slices are 128-lane (vreg) aligned.
        r = jax.nn.sigmoid(gi[:, 0:GP] + gh[:, 0:GP])
        z = jax.nn.sigmoid(gi[:, GP:2 * GP] + gh[:, GP:2 * GP])
        n = jnp.tanh(gi[:, 2 * GP:G3] + r * (gh[:, 2 * GP:G3] + bhn))
        return (1.0 - z) * n + z * h_prev

    zeros_h = jnp.zeros((B, HP), jnp.float32)
    zeros_g = jnp.zeros((B, G3), jnp.float32)

    # ---- prologue: layer-0 step 0 (h0[-1] == 0 -> its recurrent gate pre-activations are 0) ----
    h0 = cell(gi0_of(0), zeros_g, bhn0, zeros_h)                 # h0[0]
    h1 = zeros_h                                                 # h1[-1]

    # ---- staggered main loop: iteration t computes h0[t] (layer 0) and h1[t-1] (layer 1) ----
    def step(t, carry):
        h0_prev, h1_prev = carry                                 # h0[t-1], h1[t-2]
        # Two independent MXU pushes; both LHS operands are loop carries (no intra-step chain).
        g01 = jnp.dot(h0_prev, w01, preferred_element_type=jnp.float32)    # [gh0 | gi1]
        gh1 = jnp.dot(h1_prev, whh1, preferred_element_type=jnp.float32)
        h0_new = cell(gi0_of(t), g01[:, 0:G3], bhn0, h0_prev)              # h0[t]
        h1_new = cell(g01[:, G3:2 * G3] + bi1, gh1, bhn1, h1_prev)         # h1[t-1]
        return (h0_new, h1_new)

    h0, h1 = lax.fori_loop(1, T, step, (h0, h1), unroll=min(8, max(T - 1, 1)))
    # h0 == h0[T-1], h1 == h1[T-2]

    # ---- epilogue: layer-1 step T-1, then the fc head ----
    g01 = jnp.dot(h0, w01, preferred_element_type=jnp.float32)
    gh1 = jnp.dot(h1, whh1, preferred_element_type=jnp.float32)
    h1_last = cell(g01[:, G3:2 * G3] + bi1, gh1, bhn1, h1)                 # h1[T-1]

    out_ref[...] = (jnp.dot(h1_last, wfc_ref[...], preferred_element_type=jnp.float32)
                    + bfc_ref[...])


def _pack_gate_w(w, k_pad):
    """PyTorch (3H, K) gate-stacked weight -> kernel (k_pad, 3*GP), each gate lane-padded."""
    k = w.shape[1]
    out = jnp.zeros((k_pad, 3 * GP), jnp.float32)
    for g in range(3):
        out = out.at[:k, g * GP:g * GP + HIDDEN].set(w[g * HIDDEN:(g + 1) * HIDDEN, :].T)
    return out


def _pack_gate_b(b):
    """(3H,) bias -> (1, 3*GP), each gate lane-padded."""
    out = jnp.zeros((1, 3 * GP), jnp.float32)
    for g in range(3):
        out = out.at[0, g * GP:g * GP + HIDDEN].set(b[g * HIDDEN:(g + 1) * HIDDEN])
    return out


def gru_forward(x, p):
    """x: (B, T, 1) float32 (batch_first, PyTorch convention). Returns (B, OUTPUT) float32."""
    B, T, I = x.shape
    assert I == INPUT == 1
    H = HIDDEN

    B_pad = max(8, -(-B // 8) * 8)
    T_pad = max(128, -(-T // 128) * 128)

    # Compact x layout: (B_pad, T_pad), time on lanes (avoids the 128x lane tile-pad of (T,B,1)).
    x2 = jnp.pad(x[:, :, 0], ((0, B_pad - B), (0, T_pad - T)))

    # Fold b_hh_{r,z} into the input-side biases; b_hh_n stays separate (it is scaled by r).
    fold = lambda bi, bh: jnp.concatenate([bi[:2 * H] + bh[:2 * H], bi[2 * H:]])

    wih0_p = _pack_gate_w(p["wih0"], 1)                                     # (1, 3*GP)
    bih0_p = _pack_gate_b(fold(p["bih0"], p["bhh0"]))                       # (1, 3*GP)
    w01 = jnp.concatenate([_pack_gate_w(p["whh0"], HP),
                           _pack_gate_w(p["wih1"], HP)], axis=1)            # (HP, 6*GP)
    bi1_p = _pack_gate_b(fold(p["bih1"], p["bhh1"]))                        # (1, 3*GP)
    bhn0_p = jnp.zeros((1, GP), jnp.float32).at[0, :H].set(p["bhh0"][2 * H:])
    whh1_p = _pack_gate_w(p["whh1"], HP)                                    # (HP, 3*GP)
    bhn1_p = jnp.zeros((1, GP), jnp.float32).at[0, :H].set(p["bhh1"][2 * H:])
    wfc_p = jnp.zeros((HP, GP), jnp.float32).at[:H, :OUTPUT].set(p["wfc"].T)
    bfc_p = jnp.zeros((1, GP), jnp.float32).at[0, :OUTPUT].set(p["bfc"])

    kargs = (x2, wih0_p, bih0_p, w01, bi1_p, bhn0_p, whh1_p, bhn1_p, wfc_p, bfc_p)

    # Scoped-VMEM limit sized from the actual footprint (matters once T / B grow).
    est_bytes = sum(int(a.size) * 4 for a in kargs) + B_pad * GP * 4
    vmem_limit = int(min(96 * 2**20, max(32 * 2**20, 3 * est_bytes + (4 << 20))))

    vmem = lambda: pl.BlockSpec(memory_space=pltpu.MemorySpace.VMEM)
    out = pl.pallas_call(
        functools.partial(_gru_kernel, T),
        out_shape=jax.ShapeDtypeStruct((B_pad, GP), jnp.float32),
        in_specs=[vmem() for _ in kargs],
        out_specs=vmem(),
        compiler_params=pltpu.CompilerParams(vmem_limit_bytes=vmem_limit),
    )(*kargs)

    return out[:B, :OUTPUT]


def init_params(key):
    """Deterministic init matching PyTorch shapes; U(-1/sqrt(H), 1/sqrt(H))."""
    bound = 1.0 / float(jnp.sqrt(jnp.float32(HIDDEN)))
    keys = jax.random.split(key, 10)
    u = lambda k, s: jax.random.uniform(k, s, jnp.float32, -bound, bound)
    return {
        "wih0": u(keys[0], (3 * HIDDEN, INPUT)),
        "whh0": u(keys[1], (3 * HIDDEN, HIDDEN)),
        "bih0": u(keys[2], (3 * HIDDEN,)),
        "bhh0": u(keys[3], (3 * HIDDEN,)),
        "wih1": u(keys[4], (3 * HIDDEN, HIDDEN)),
        "whh1": u(keys[5], (3 * HIDDEN, HIDDEN)),
        "bih1": u(keys[6], (3 * HIDDEN,)),
        "bhh1": u(keys[7], (3 * HIDDEN,)),
        "wfc":  u(keys[8], (OUTPUT, HIDDEN)),
        "bfc":  u(keys[9], (OUTPUT,)),
    }


def gru_reference(x, p):
    """Pure-JAX reference matching torch.nn.GRU(batch_first=True, num_layers=2) + Linear."""
    B, T, I = x.shape
    H = HIDDEN

    def layer(inp, wih, whh, bih, bhh):
        def step(h, x_t):
            gi = x_t @ wih.T + bih
            gh = h @ whh.T + bhh
            r = jax.nn.sigmoid(gi[:, :H] + gh[:, :H])
            z = jax.nn.sigmoid(gi[:, H:2 * H] + gh[:, H:2 * H])
            n = jnp.tanh(gi[:, 2 * H:] + r * gh[:, 2 * H:])
            h_new = (1.0 - z) * n + z * h
            return h_new, h_new
        h0 = jnp.zeros((B, H), jnp.float32)
        _, outs = lax.scan(step, h0, jnp.transpose(inp, (1, 0, 2)))
        return jnp.transpose(outs, (1, 0, 2))

    out0 = layer(x, p["wih0"], p["whh0"], p["bih0"], p["bhh0"])
    out1 = layer(out0, p["wih1"], p["whh1"], p["bih1"], p["bhh1"])
    return out1[:, -1, :] @ p["wfc"].T + p["bfc"]


if __name__ == "__main__":
    B, T = 2, 8
    key = jax.random.PRNGKey(0)
    k_x, k_p = jax.random.split(key)
    x = jax.random.normal(k_x, (B, T, INPUT), jnp.float32)
    params = init_params(k_p)

    out = gru_forward(x, params)
    out = jax.block_until_ready(out)

    ref = jax.block_until_ready(gru_reference(x, params))
    assert out.shape == (B, OUTPUT)
    assert jnp.allclose(out, ref, atol=1e-4, rtol=1e-4), (out, ref)
    print("KERNEL_OK")
</pallas_src>

<mosaic_0001>
module attributes {stable_mosaic.version = 11 : i64} {
  func.func @_gru_kernel(%arg0: memref<8x128xf32, #tpu.memory_space<vmem>>, %arg1: memref<1x384xf32, #tpu.memory_space<vmem>>, %arg2: memref<1x384xf32, #tpu.memory_space<vmem>>, %arg3: memref<128x768xf32, #tpu.memory_space<vmem>>, %arg4: memref<1x384xf32, #tpu.memory_space<vmem>>, %arg5: memref<1x128xf32, #tpu.memory_space<vmem>>, %arg6: memref<128x384xf32, #tpu.memory_space<vmem>>, %arg7: memref<1x128xf32, #tpu.memory_space<vmem>>, %arg8: memref<128x128xf32, #tpu.memory_space<vmem>>, %arg9: memref<1x128xf32, #tpu.memory_space<vmem>>, %arg10: memref<8x128xf32, #tpu.memory_space<vmem>>) attributes {dimension_semantics = [], scalar_prefetch = 0 : i64, scratch_operands = 0 : i64, tpu.core_type = #tpu.core_type<tc>} {
    %c0 = arith.constant 0 : index
    %c0_0 = arith.constant 0 : index
    %0 = vector.load %arg0[%c0, %c0_0] : memref<8x128xf32, #tpu.memory_space<vmem>>, vector<8x128xf32>
    %1 = tpu.iota {dimensions = array<i32: 1>} : vector<8x128xi32>
    %c0_1 = arith.constant 0 : index
    %c0_2 = arith.constant 0 : index
    %2 = vector.load %arg3[%c0_1, %c0_2] : memref<128x768xf32, #tpu.memory_space<vmem>>, vector<128x768xf32>
    %c0_3 = arith.constant 0 : index
    %c0_4 = arith.constant 0 : index
    %3 = vector.load %arg6[%c0_3, %c0_4] : memref<128x384xf32, #tpu.memory_space<vmem>>, vector<128x384xf32>
    %c0_5 = arith.constant 0 : index
    %c0_6 = arith.constant 0 : index
    %4 = vector.load %arg1[%c0_5, %c0_6] : memref<1x384xf32, #tpu.memory_space<vmem>>, vector<1x384xf32>
    %5 = vector.shape_cast %4 : vector<1x384xf32> to vector<1x384xf32>
    %6 = vector.broadcast %5 : vector<1x384xf32> to vector<8x384xf32>
    %c0_7 = arith.constant 0 : index
    %c0_8 = arith.constant 0 : index
    %7 = vector.load %arg2[%c0_7, %c0_8] : memref<1x384xf32, #tpu.memory_space<vmem>>, vector<1x384xf32>
    %8 = vector.shape_cast %7 : vector<1x384xf32> to vector<1x384xf32>
    %9 = vector.broadcast %8 : vector<1x384xf32> to vector<8x384xf32>
    %c0_9 = arith.constant 0 : index
    %c0_10 = arith.constant 0 : index
    %10 = vector.load %arg4[%c0_9, %c0_10] : memref<1x384xf32, #tpu.memory_space<vmem>>, vector<1x384xf32>
    %11 = vector.shape_cast %10 : vector<1x384xf32> to vector<1x384xf32>
    %12 = vector.broadcast %11 : vector<1x384xf32> to vector<8x384xf32>
    %c0_11 = arith.constant 0 : index
    %c0_12 = arith.constant 0 : index
    %13 = vector.load %arg5[%c0_11, %c0_12] : memref<1x128xf32, #tpu.memory_space<vmem>>, vector<1x128xf32>
    %14 = vector.shape_cast %13 : vector<1x128xf32> to vector<1x128xf32>
    %15 = vector.broadcast %14 : vector<1x128xf32> to vector<8x128xf32>
    %c0_13 = arith.constant 0 : index
    %c0_14 = arith.constant 0 : index
    %16 = vector.load %arg7[%c0_13, %c0_14] : memref<1x128xf32, #tpu.memory_space<vmem>>, vector<1x128xf32>
    %17 = vector.shape_cast %16 : vector<1x128xf32> to vector<1x128xf32>
    %18 = vector.broadcast %17 : vector<1x128xf32> to vector<8x128xf32>
    %cst = arith.constant 0.000000e+00 : f32
    %19 = vector.broadcast %cst : f32 to vector<8x128xf32>
    %cst_15 = arith.constant 0.000000e+00 : f32
    %20 = vector.broadcast %cst_15 : f32 to vector<8x384xf32>
    %c0_i32 = arith.constant 0 : i32
    %21 = vector.broadcast %c0_i32 : i32 to vector<8x128xi32>
    %22 = arith.cmpi eq, %1, %21 : vector<8x128xi32>
    %cst_16 = arith.constant 0.000000e+00 : f32
    %23 = vector.broadcast %cst_16 : f32 to vector<8x128xf32>
    %24 = arith.select %22, %0, %23 : vector<8x128xi1>, vector<8x128xf32>
    %cst_17 = arith.constant dense<0.000000e+00> : vector<8xf32>
    %25 = vector.multi_reduction <add>, %24, %cst_17 [1] : vector<8x128xf32> to vector<8xf32>
    %26 = vector.shape_cast %25 : vector<8xf32> to vector<8x1xf32>
    %27 = vector.broadcast %26 : vector<8x1xf32> to vector<8x384xf32>
    %28 = arith.mulf %27, %6 : vector<8x384xf32>
    %29 = arith.addf %28, %9 : vector<8x384xf32>
    %30 = vector.extract_strided_slice %29 {offsets = [0, 0], sizes = [8, 128], strides = [1, 1]} : vector<8x384xf32> to vector<8x128xf32>
    %31 = vector.extract_strided_slice %20 {offsets = [0, 0], sizes = [8, 128], strides = [1, 1]} : vector<8x384xf32> to vector<8x128xf32>
    %32 = arith.addf %30, %31 : vector<8x128xf32>
    %33 = arith.negf %32 : vector<8x128xf32>
    %34 = math.exp %33 : vector<8x128xf32>
    %cst_18 = arith.constant 1.000000e+00 : f32
    %35 = vector.broadcast %cst_18 : f32 to vector<8x128xf32>
    %36 = arith.addf %35, %34 : vector<8x128xf32>
    %37 = arith.divf %35, %36 : vector<8x128xf32>
    %38 = vector.extract_strided_slice %29 {offsets = [0, 128], sizes = [8, 128], strides = [1, 1]} : vector<8x384xf32> to vector<8x128xf32>
    %39 = vector.extract_strided_slice %20 {offsets = [0, 128], sizes = [8, 128], strides = [1, 1]} : vector<8x384xf32> to vector<8x128xf32>
    %40 = arith.addf %38, %39 : vector<8x128xf32>
    %41 = arith.negf %40 : vector<8x128xf32>
    %42 = math.exp %41 : vector<8x128xf32>
    %cst_19 = arith.constant 1.000000e+00 : f32
    %43 = vector.broadcast %cst_19 : f32 to vector<8x128xf32>
    %44 = arith.addf %43, %42 : vector<8x128xf32>
    %45 = arith.divf %43, %44 : vector<8x128xf32>
    %46 = vector.extract_strided_slice %29 {offsets = [0, 256], sizes = [8, 128], strides = [1, 1]} : vector<8x384xf32> to vector<8x128xf32>
    %47 = vector.extract_strided_slice %20 {offsets = [0, 256], sizes = [8, 128], strides = [1, 1]} : vector<8x384xf32> to vector<8x128xf32>
    %48 = arith.addf %47, %15 : vector<8x128xf32>
    %49 = arith.mulf %37, %48 : vector<8x128xf32>
    %50 = arith.addf %46, %49 : vector<8x128xf32>
    %51 = math.tanh %50 : vector<8x128xf32>
    %cst_20 = arith.constant 1.000000e+00 : f32
    %52 = vector.broadcast %cst_20 : f32 to vector<8x128xf32>
    %53 = arith.subf %52, %45 : vector<8x128xf32>
    %54 = arith.mulf %53, %51 : vector<8x128xf32>
    %55 = arith.mulf %45, %19 : vector<8x128xf32>
    %56 = arith.addf %54, %55 : vector<8x128xf32>
    %c1_i32 = arith.constant 1 : i32
    %cst_21 = arith.constant dense<0.000000e+00> : vector<8x768xf32>
    %57 = tpu.matmul %56, %2, %cst_21 {dimension_numbers = #tpu.dot_dimension_numbers<[1], [0], [0], [1], [0, 0, 1, 1], [], []>} : vector<8x128xf32>, vector<128x768xf32>, vector<8x768xf32> -> vector<8x768xf32>
    %cst_22 = arith.constant dense<0.000000e+00> : vector<8x384xf32>
    %58 = tpu.matmul %19, %3, %cst_22 {dimension_numbers = #tpu.dot_dimension_numbers<[1], [0], [0], [1], [0, 0, 1, 1], [], []>} : vector<8x128xf32>, vector<128x384xf32>, vector<8x384xf32> -> vector<8x384xf32>
    %59 = vector.broadcast %c1_i32 : i32 to vector<8x128xi32>
    %60 = arith.cmpi eq, %1, %59 : vector<8x128xi32>
    %cst_23 = arith.constant 0.000000e+00 : f32
    %61 = vector.broadcast %cst_23 : f32 to vector<8x128xf32>
    %62 = arith.select %60, %0, %61 : vector<8x128xi1>, vector<8x128xf32>
    %cst_24 = arith.constant dense<0.000000e+00> : vector<8xf32>
    %63 = vector.multi_reduction <add>, %62, %cst_24 [1] : vector<8x128xf32> to vector<8xf32>
    %64 = vector.shape_cast %63 : vector<8xf32> to vector<8x1xf32>
    %65 = vector.broadcast %64 : vector<8x1xf32> to vector<8x384xf32>
    %66 = arith.mulf %65, %6 : vector<8x384xf32>
    %67 = arith.addf %66, %9 : vector<8x384xf32>
    %68 = vector.extract_strided_slice %57 {offsets = [0, 0], sizes = [8, 384], strides = [1, 1]} : vector<8x768xf32> to vector<8x384xf32>
    %69 = vector.extract_strided_slice %67 {offsets = [0, 0], sizes = [8, 128], strides = [1, 1]} : vector<8x384xf32> to vector<8x128xf32>
    %70 = vector.extract_strided_slice %68 {offsets = [0, 0], sizes = [8, 128], strides = [1, 1]} : vector<8x384xf32> to vector<8x128xf32>
    %71 = arith.addf %69, %70 : vector<8x128xf32>
    %72 = arith.negf %71 : vector<8x128xf32>
    %73 = math.exp %72 : vector<8x128xf32>
    %cst_25 = arith.constant 1.000000e+00 : f32
    %74 = vector.broadcast %cst_25 : f32 to vector<8x128xf32>
    %75 = arith.addf %74, %73 : vector<8x128xf32>
    %76 = arith.divf %74, %75 : vector<8x128xf32>
    %77 = vector.extract_strided_slice %67 {offsets = [0, 128], sizes = [8, 128], strides = [1, 1]} : vector<8x384xf32> to vector<8x128xf32>
    %78 = vector.extract_strided_slice %68 {offsets = [0, 128], sizes = [8, 128], strides = [1, 1]} : vector<8x384xf32> to vector<8x128xf32>
    %79 = arith.addf %77, %78 : vector<8x128xf32>
    %80 = arith.negf %79 : vector<8x128xf32>
    %81 = math.exp %80 : vector<8x128xf32>
    %cst_26 = arith.constant 1.000000e+00 : f32
    %82 = vector.broadcast %cst_26 : f32 to vector<8x128xf32>
    %83 = arith.addf %82, %81 : vector<8x128xf32>
    %84 = arith.divf %82, %83 : vector<8x128xf32>
    %85 = vector.extract_strided_slice %67 {offsets = [0, 256], sizes = [8, 128], strides = [1, 1]} : vector<8x384xf32> to vector<8x128xf32>
    %86 = vector.extract_strided_slice %68 {offsets = [0, 256], sizes = [8, 128], strides = [1, 1]} : vector<8x384xf32> to vector<8x128xf32>
    %87 = arith.addf %86, %15 : vector<8x128xf32>
    %88 = arith.mulf %76, %87 : vector<8x128xf32>
    %89 = arith.addf %85, %88 : vector<8x128xf32>
    %90 = math.tanh %89 : vector<8x128xf32>
    %cst_27 = arith.constant 1.000000e+00 : f32
    %91 = vector.broadcast %cst_27 : f32 to vector<8x128xf32>
    %92 = arith.subf %91, %84 : vector<8x128xf32>
    %93 = arith.mulf %92, %90 : vector<8x128xf32>
    %94 = arith.mulf %84, %56 : vector<8x128xf32>
    %95 = arith.addf %93, %94 : vector<8x128xf32>
    %96 = vector.extract_strided_slice %57 {offsets = [0, 384], sizes = [8, 384], strides = [1, 1]} : vector<8x768xf32> to vector<8x384xf32>
    %97 = arith.addf %96, %12 : vector<8x384xf32>
    %98 = vector.extract_strided_slice %97 {offsets = [0, 0], sizes = [8, 128], strides = [1, 1]} : vector<8x384xf32> to vector<8x128xf32>
    %99 = vector.extract_strided_slice %58 {offsets = [0, 0], sizes = [8, 128], strides = [1, 1]} : vector<8x384xf32> to vector<8x128xf32>
    %100 = arith.addf %98, %99 : vector<8x128xf32>
    %101 = arith.negf %100 : vector<8x128xf32>
    %102 = math.exp %101 : vector<8x128xf32>
    %cst_28 = arith.constant 1.000000e+00 : f32
    %103 = vector.broadcast %cst_28 : f32 to vector<8x128xf32>
    %104 = arith.addf %103, %102 : vector<8x128xf32>
    %105 = arith.divf %103, %104 : vector<8x128xf32>
    %106 = vector.extract_strided_slice %97 {offsets = [0, 128], sizes = [8, 128], strides = [1, 1]} : vector<8x384xf32> to vector<8x128xf32>
    %107 = vector.extract_strided_slice %58 {offsets = [0, 128], sizes = [8, 128], strides = [1, 1]} : vector<8x384xf32> to vector<8x128xf32>
    %108 = arith.addf %106, %107 : vector<8x128xf32>
    %109 = arith.negf %108 : vector<8x128xf32>
    %110 = math.exp %109 : vector<8x128xf32>
    %cst_29 = arith.constant 1.000000e+00 : f32
    %111 = vector.broadcast %cst_29 : f32 to vector<8x128xf32>
    %112 = arith.addf %111, %110 : vector<8x128xf32>
    %113 = arith.divf %111, %112 : vector<8x128xf32>
    %114 = vector.extract_strided_slice %97 {offsets = [0, 256], sizes = [8, 128], strides = [1, 1]} : vector<8x384xf32> to vector<8x128xf32>
    %115 = vector.extract_strided_slice %58 {offsets = [0, 256], sizes = [8, 128], strides = [1, 1]} : vector<8x384xf32> to vector<8x128xf32>
    %116 = arith.addf %115, %18 : vector<8x128xf32>
    %117 = arith.mulf %105, %116 : vector<8x128xf32>
    %118 = arith.addf %114, %117 : vector<8x128xf32>
    %119 = math.tanh %118 : vector<8x128xf32>
    %cst_30 = arith.constant 1.000000e+00 : f32
    %120 = vector.broadcast %cst_30 : f32 to vector<8x128xf32>
    %121 = arith.subf %120, %113 : vector<8x128xf32>
    %122 = arith.mulf %121, %119 : vector<8x128xf32>
    %123 = arith.mulf %113, %19 : vector<8x128xf32>
    %124 = arith.addf %122, %123 : vector<8x128xf32>
    %c2_i32 = arith.constant 2 : i32
    %cst_31 = arith.constant dense<0.000000e+00> : vector<8x768xf32>
    %125 = tpu.matmul %95, %2, %cst_31 {dimension_numbers = #tpu.dot_dimension_numbers<[1], [0], [0], [1], [0, 0, 1, 1], [], []>} : vector<8x128xf32>, vector<128x768xf32>, vector<8x768xf32> -> vector<8x768xf32>
    %cst_32 = arith.constant dense<0.000000e+00> : vector<8x384xf32>
    %126 = tpu.matmul %124, %3, %cst_32 {dimension_numbers = #tpu.dot_dimension_numbers<[1], [0], [0], [1], [0, 0, 1, 1], [], []>} : vector<8x128xf32>, vector<128x384xf32>, vector<8x384xf32> -> vector<8x384xf32>
    %127 = vector.broadcast %c2_i32 : i32 to vector<8x128xi32>
    %128 = arith.cmpi eq, %1, %127 : vector<8x128xi32>
    %cst_33 = arith.constant 0.000000e+00 : f32
    %129 = vector.broadcast %cst_33 : f32 to vector<8x128xf32>
    %130 = arith.select %128, %0, %129 : vector<8x128xi1>, vector<8x128xf32>
    %cst_34 = arith.constant dense<0.000000e+00> : vector<8xf32>
    %131 = vector.multi_reduction <add>, %130, %cst_34 [1] : vector<8x128xf32> to vector<8xf32>
    %132 = vector.shape_cast %131 : vector<8xf32> to vector<8x1xf32>
    %133 = vector.broadcast %132 : vector<8x1xf32> to vector<8x384xf32>
    %134 = arith.mulf %133, %6 : vector<8x384xf32>
    %135 = arith.addf %134, %9 : vector<8x384xf32>
    %136 = vector.extract_strided_slice %125 {offsets = [0, 0], sizes = [8, 384], strides = [1, 1]} : vector<8x768xf32> to vector<8x384xf32>
    %137 = vector.extract_strided_slice %135 {offsets = [0, 0], sizes = [8, 128], strides = [1, 1]} : vector<8x384xf32> to vector<8x128xf32>
    %138 = vector.extract_strided_slice %136 {offsets = [0, 0], sizes = [8, 128], strides = [1, 1]} : vector<8x384xf32> to vector<8x128xf32>
    %139 = arith.addf %137, %138 : vector<8x128xf32>
    %140 = arith.negf %139 : vector<8x128xf32>
    %141 = math.exp %140 : vector<8x128xf32>
    %cst_35 = arith.constant 1.000000e+00 : f32
    %142 = vector.broadcast %cst_35 : f32 to vector<8x128xf32>
    %143 = arith.addf %142, %141 : vector<8x128xf32>
    %144 = arith.divf %142, %143 : vector<8x128xf32>
    %145 = vector.extract_strided_slice %135 {offsets = [0, 128], sizes = [8, 128], strides = [1, 1]} : vector<8x384xf32> to vector<8x128xf32>
    %146 = vector.extract_strided_slice %136 {offsets = [0, 128], sizes = [8, 128], strides = [1, 1]} : vector<8x384xf32> to vector<8x128xf32>
    %147 = arith.addf %145, %146 : vector<8x128xf32>
    %148 = arith.negf %147 : vector<8x128xf32>
    %149 = math.exp %148 : vector<8x128xf32>
    %cst_36 = arith.constant 1.000000e+00 : f32
    %150 = vector.broadcast %cst_36 : f32 to vector<8x128xf32>
    %151 = arith.addf %150, %149 : vector<8x128xf32>
    %152 = arith.divf %150, %151 : vector<8x128xf32>
    %153 = vector.extract_strided_slice %135 {offsets = [0, 256], sizes = [8, 128], strides = [1, 1]} : vector<8x384xf32> to vector<8x128xf32>
    %154 = vector.extract_strided_slice %136 {offsets = [0, 256], sizes = [8, 128], strides = [1, 1]} : vector<8x384xf32> to vector<8x128xf32>
    %155 = arith.addf %154, %15 : vector<8x128xf32>
    %156 = arith.mulf %144, %155 : vector<8x128xf32>
    %157 = arith.addf %153, %156 : vector<8x128xf32>
    %158 = math.tanh %157 : vector<8x128xf32>
    %cst_37 = arith.constant 1.000000e+00 : f32
    %159 = vector.broadcast %cst_37 : f32 to vector<8x128xf32>
    %160 = arith.subf %159, %152 : vector<8x128xf32>
    %161 = arith.mulf %160, %158 : vector<8x128xf32>
    %162 = arith.mulf %152, %95 : vector<8x128xf32>
    %163 = arith.addf %161, %162 : vector<8x128xf32>
    %164 = vector.extract_strided_slice %125 {offsets = [0, 384], sizes = [8, 384], strides = [1, 1]} : vector<8x768xf32> to vector<8x384xf32>
    %165 = arith.addf %164, %12 : vector<8x384xf32>
    %166 = vector.extract_strided_slice %165 {offsets = [0, 0], sizes = [8, 128], strides = [1, 1]} : vector<8x384xf32> to vector<8x128xf32>
    %167 = vector.extract_strided_slice %126 {offsets = [0, 0], sizes = [8, 128], strides = [1, 1]} : vector<8x384xf32> to vector<8x128xf32>
    %168 = arith.addf %166, %167 : vector<8x128xf32>
    %169 = arith.negf %168 : vector<8x128xf32>
    %170 = math.exp %169 : vector<8x128xf32>
    %cst_38 = arith.constant 1.000000e+00 : f32
    %171 = vector.broadcast %cst_38 : f32 to vector<8x128xf32>
    %172 = arith.addf %171, %170 : vector<8x128xf32>
    %173 = arith.divf %171, %172 : vector<8x128xf32>
    %174 = vector.extract_strided_slice %165 {offsets = [0, 128], sizes = [8, 128], strides = [1, 1]} : vector<8x384xf32> to vector<8x128xf32>
    %175 = vector.extract_strided_slice %126 {offsets = [0, 128], sizes = [8, 128], strides = [1, 1]} : vector<8x384xf32> to vector<8x128xf32>
    %176 = arith.addf %174, %175 : vector<8x128xf32>
    %177 = arith.negf %176 : vector<8x128xf32>
    %178 = math.exp %177 : vector<8x128xf32>
    %cst_39 = arith.constant 1.000000e+00 : f32
    %179 = vector.broadcast %cst_39 : f32 to vector<8x128xf32>
    %180 = arith.addf %179, %178 : vector<8x128xf32>
    %181 = arith.divf %179, %180 : vector<8x128xf32>
    %182 = vector.extract_strided_slice %165 {offsets = [0, 256], sizes = [8, 128], strides = [1, 1]} : vector<8x384xf32> to vector<8x128xf32>
    %183 = vector.extract_strided_slice %126 {offsets = [0, 256], sizes = [8, 128], strides = [1, 1]} : vector<8x384xf32> to vector<8x128xf32>
    %184 = arith.addf %183, %18 : vector<8x128xf32>
    %185 = arith.mulf %173, %184 : vector<8x128xf32>
    %186 = arith.addf %182, %185 : vector<8x128xf32>
    %187 = math.tanh %186 : vector<8x128xf32>
    %cst_40 = arith.constant 1.000000e+00 : f32
    %188 = vector.broadcast %cst_40 : f32 to vector<8x128xf32>
    %189 = arith.subf %188, %181 : vector<8x128xf32>
    %190 = arith.mulf %189, %187 : vector<8x128xf32>
    %191 = arith.mulf %181, %124 : vector<8x128xf32>
    %192 = arith.addf %190, %191 : vector<8x128xf32>
    %c3_i32 = arith.constant 3 : i32
    %cst_41 = arith.constant dense<0.000000e+00> : vector<8x768xf32>
    %193 = tpu.matmul %163, %2, %cst_41 {dimension_numbers = #tpu.dot_dimension_numbers<[1], [0], [0], [1], [0, 0, 1, 1], [], []>} : vector<8x128xf32>, vector<128x768xf32>, vector<8x768xf32> -> vector<8x768xf32>
    %cst_42 = arith.constant dense<0.000000e+00> : vector<8x384xf32>
    %194 = tpu.matmul %192, %3, %cst_42 {dimension_numbers = #tpu.dot_dimension_numbers<[1], [0], [0], [1], [0, 0, 1, 1], [], []>} : vector<8x128xf32>, vector<128x384xf32>, vector<8x384xf32> -> vector<8x384xf32>
    %195 = vector.broadcast %c3_i32 : i32 to vector<8x128xi32>
    %196 = arith.cmpi eq, %1, %195 : vector<8x128xi32>
    %cst_43 = arith.constant 0.000000e+00 : f32
    %197 = vector.broadcast %cst_43 : f32 to vector<8x128xf32>
    %198 = arith.select %196, %0, %197 : vector<8x128xi1>, vector<8x128xf32>
    %cst_44 = arith.constant dense<0.000000e+00> : vector<8xf32>
    %199 = vector.multi_reduction <add>, %198, %cst_44 [1] : vector<8x128xf32> to vector<8xf32>
    %200 = vector.shape_cast %199 : vector<8xf32> to vector<8x1xf32>
    %201 = vector.broadcast %200 : vector<8x1xf32> to vector<8x384xf32>
    %202 = arith.mulf %201, %6 : vector<8x384xf32>
    %203 = arith.addf %202, %9 : vector<8x384xf32>
    %204 = vector.extract_strided_slice %193 {offsets = [0, 0], sizes = [8, 384], strides = [1, 1]} : vector<8x768xf32> to vector<8x384xf32>
    %205 = vector.extract_strided_slice %203 {offsets = [0, 0], sizes = [8, 128], strides = [1, 1]} : vector<8x384xf32> to vector<8x128xf32>
    %206 = vector.extract_strided_slice %204 {offsets = [0, 0], sizes = [8, 128], strides = [1, 1]} : vector<8x384xf32> to vector<8x128xf32>
    %207 = arith.addf %205, %206 : vector<8x128xf32>
    %208 = arith.negf %207 : vector<8x128xf32>
    %209 = math.exp %208 : vector<8x128xf32>
    %cst_45 = arith.constant 1.000000e+00 : f32
    %210 = vector.broadcast %cst_45 : f32 to vector<8x128xf32>
    %211 = arith.addf %210, %209 : vector<8x128xf32>
    %212 = arith.divf %210, %211 : vector<8x128xf32>
    %213 = vector.extract_strided_slice %203 {offsets = [0, 128], sizes = [8, 128], strides = [1, 1]} : vector<8x384xf32> to vector<8x128xf32>
    %214 = vector.extract_strided_slice %204 {offsets = [0, 128], sizes = [8, 128], strides = [1, 1]} : vector<8x384xf32> to vector<8x128xf32>
    %215 = arith.addf %213, %214 : vector<8x128xf32>
    %216 = arith.negf %215 : vector<8x128xf32>
    %217 = math.exp %216 : vector<8x128xf32>
    %cst_46 = arith.constant 1.000000e+00 : f32
    %218 = vector.broadcast %cst_46 : f32 to vector<8x128xf32>
    %219 = arith.addf %218, %217 : vector<8x128xf32>
    %220 = arith.divf %218, %219 : vector<8x128xf32>
    %221 = vector.extract_strided_slice %203 {offsets = [0, 256], sizes = [8, 128], strides = [1, 1]} : vector<8x384xf32> to vector<8x128xf32>
    %222 = vector.extract_strided_slice %204 {offsets = [0, 256], sizes = [8, 128], strides = [1, 1]} : vector<8x384xf32> to vector<8x128xf32>
    %223 = arith.addf %222, %15 : vector<8x128xf32>
    %224 = arith.mulf %212, %223 : vector<8x128xf32>
    %225 = arith.addf %221, %224 : vector<8x128xf32>
    %226 = math.tanh %225 : vector<8x128xf32>
    %cst_47 = arith.constant 1.000000e+00 : f32
    %227 = vector.broadcast %cst_47 : f32 to vector<8x128xf32>
    %228 = arith.subf %227, %220 : vector<8x128xf32>
    %229 = arith.mulf %228, %226 : vector<8x128xf32>
    %230 = arith.mulf %220, %163 : vector<8x128xf32>
    %231 = arith.addf %229, %230 : vector<8x128xf32>
    %232 = vector.extract_strided_slice %193 {offsets = [0, 384], sizes = [8, 384], strides = [1, 1]} : vector<8x768xf32> to vector<8x384xf32>
    %233 = arith.addf %232, %12 : vector<8x384xf32>
    %234 = vector.extract_strided_slice %233 {offsets = [0, 0], sizes = [8, 128], strides = [1, 1]} : vector<8x384xf32> to vector<8x128xf32>
    %235 = vector.extract_strided_slice %194 {offsets = [0, 0], sizes = [8, 128], strides = [1, 1]} : vector<8x384xf32> to vector<8x128xf32>
    %236 = arith.addf %234, %235 : vector<8x128xf32>
    %237 = arith.negf %236 : vector<8x128xf32>
    %238 = math.exp %237 : vector<8x128xf32>
    %cst_48 = arith.constant 1.000000e+00 : f32
    %239 = vector.broadcast %cst_48 : f32 to vector<8x128xf32>
    %240 = arith.addf %239, %238 : vector<8x128xf32>
    %241 = arith.divf %239, %240 : vector<8x128xf32>
    %242 = vector.extract_strided_slice %233 {offsets = [0, 128], sizes = [8, 128], strides = [1, 1]} : vector<8x384xf32> to vector<8x128xf32>
    %243 = vector.extract_strided_slice %194 {offsets = [0, 128], sizes = [8, 128], strides = [1, 1]} : vector<8x384xf32> to vector<8x128xf32>
    %244 = arith.addf %242, %243 : vector<8x128xf32>
    %245 = arith.negf %244 : vector<8x128xf32>
    %246 = math.exp %245 : vector<8x128xf32>
    %cst_49 = arith.constant 1.000000e+00 : f32
    %247 = vector.broadcast %cst_49 : f32 to vector<8x128xf32>
    %248 = arith.addf %247, %246 : vector<8x128xf32>
    %249 = arith.divf %247, %248 : vector<8x128xf32>
    %250 = vector.extract_strided_slice %233 {offsets = [0, 256], sizes = [8, 128], strides = [1, 1]} : vector<8x384xf32> to vector<8x128xf32>
    %251 = vector.extract_strided_slice %194 {offsets = [0, 256], sizes = [8, 128], strides = [1, 1]} : vector<8x384xf32> to vector<8x128xf32>
    %252 = arith.addf %251, %18 : vector<8x128xf32>
    %253 = arith.mulf %241, %252 : vector<8x128xf32>
    %254 = arith.addf %250, %253 : vector<8x128xf32>
    %255 = math.tanh %254 : vector<8x128xf32>
    %cst_50 = arith.constant 1.000000e+00 : f32
    %256 = vector.broadcast %cst_50 : f32 to vector<8x128xf32>
    %257 = arith.subf %256, %249 : vector<8x128xf32>
    %258 = arith.mulf %257, %255 : vector<8x128xf32>
    %259 = arith.mulf %249, %192 : vector<8x128xf32>
    %260 = arith.addf %258, %259 : vector<8x128xf32>
    %c4_i32 = arith.constant 4 : i32
    %cst_51 = arith.constant dense<0.000000e+00> : vector<8x768xf32>
    %261 = tpu.matmul %231, %2, %cst_51 {dimension_numbers = #tpu.dot_dimension_numbers<[1], [0], [0], [1], [0, 0, 1, 1], [], []>} : vector<8x128xf32>, vector<128x768xf32>, vector<8x768xf32> -> vector<8x768xf32>
    %cst_52 = arith.constant dense<0.000000e+00> : vector<8x384xf32>
    %262 = tpu.matmul %260, %3, %cst_52 {dimension_numbers = #tpu.dot_dimension_numbers<[1], [0], [0], [1], [0, 0, 1, 1], [], []>} : vector<8x128xf32>, vector<128x384xf32>, vector<8x384xf32> -> vector<8x384xf32>
    %263 = vector.broadcast %c4_i32 : i32 to vector<8x128xi32>
    %264 = arith.cmpi eq, %1, %263 : vector<8x128xi32>
    %cst_53 = arith.constant 0.000000e+00 : f32
    %265 = vector.broadcast %cst_53 : f32 to vector<8x128xf32>
    %266 = arith.select %264, %0, %265 : vector<8x128xi1>, vector<8x128xf32>
    %cst_54 = arith.constant dense<0.000000e+00> : vector<8xf32>
    %267 = vector.multi_reduction <add>, %266, %cst_54 [1] : vector<8x128xf32> to vector<8xf32>
    %268 = vector.shape_cast %267 : vector<8xf32> to vector<8x1xf32>
    %269 = vector.broadcast %268 : vector<8x1xf32> to vector<8x384xf32>
    %270 = arith.mulf %269, %6 : vector<8x384xf32>
    %271 = arith.addf %270, %9 : vector<8x384xf32>
    %272 = vector.extract_strided_slice %261 {offsets = [0, 0], sizes = [8, 384], strides = [1, 1]} : vector<8x768xf32> to vector<8x384xf32>
    %273 = vector.extract_strided_slice %271 {offsets = [0, 0], sizes = [8, 128], strides = [1, 1]} : vector<8x384xf32> to vector<8x128xf32>
    %274 = vector.extract_strided_slice %272 {offsets = [0, 0], sizes = [8, 128], strides = [1, 1]} : vector<8x384xf32> to vector<8x128xf32>
    %275 = arith.addf %273, %274 : vector<8x128xf32>
    %276 = arith.negf %275 : vector<8x128xf32>
    %277 = math.exp %276 : vector<8x128xf32>
    %cst_55 = arith.constant 1.000000e+00 : f32
    %278 = vector.broadcast %cst_55 : f32 to vector<8x128xf32>
    %279 = arith.addf %278, %277 : vector<8x128xf32>
    %280 = arith.divf %278, %279 : vector<8x128xf32>
    %281 = vector.extract_strided_slice %271 {offsets = [0, 128], sizes = [8, 128], strides = [1, 1]} : vector<8x384xf32> to vector<8x128xf32>
    %282 = vector.extract_strided_slice %272 {offsets = [0, 128], sizes = [8, 128], strides = [1, 1]} : vector<8x384xf32> to vector<8x128xf32>
    %283 = arith.addf %281, %282 : vector<8x128xf32>
    %284 = arith.negf %283 : vector<8x128xf32>
    %285 = math.exp %284 : vector<8x128xf32>
    %cst_56 = arith.constant 1.000000e+00 : f32
    %286 = vector.broadcast %cst_56 : f32 to vector<8x128xf32>
    %287 = arith.addf %286, %285 : vector<8x128xf32>
    %288 = arith.divf %286, %287 : vector<8x128xf32>
    %289 = vector.extract_strided_slice %271 {offsets = [0, 256], sizes = [8, 128], strides = [1, 1]} : vector<8x384xf32> to vector<8x128xf32>
    %290 = vector.extract_strided_slice %272 {offsets = [0, 256], sizes = [8, 128], strides = [1, 1]} : vector<8x384xf32> to vector<8x128xf32>
    %291 = arith.addf %290, %15 : vector<8x128xf32>
    %292 = arith.mulf %280, %291 : vector<8x128xf32>
    %293 = arith.addf %289, %292 : vector<8x128xf32>
    %294 = math.tanh %293 : vector<8x128xf32>
    %cst_57 = arith.constant 1.000000e+00 : f32
    %295 = vector.broadcast %cst_57 : f32 to vector<8x128xf32>
    %296 = arith.subf %295, %288 : vector<8x128xf32>
    %297 = arith.mulf %296, %294 : vector<8x128xf32>
    %298 = arith.mulf %288, %231 : vector<8x128xf32>
    %299 = arith.addf %297, %298 : vector<8x128xf32>
    %300 = vector.extract_strided_slice %261 {offsets = [0, 384], sizes = [8, 384], strides = [1, 1]} : vector<8x768xf32> to vector<8x384xf32>
    %301 = arith.addf %300, %12 : vector<8x384xf32>
    %302 = vector.extract_strided_slice %301 {offsets = [0, 0], sizes = [8, 128], strides = [1, 1]} : vector<8x384xf32> to vector<8x128xf32>
    %303 = vector.extract_strided_slice %262 {offsets = [0, 0], sizes = [8, 128], strides = [1, 1]} : vector<8x384xf32> to vector<8x128xf32>
    %304 = arith.addf %302, %303 : vector<8x128xf32>
    %305 = arith.negf %304 : vector<8x128xf32>
    %306 = math.exp %305 : vector<8x128xf32>
    %cst_58 = arith.constant 1.000000e+00 : f32
    %307 = vector.broadcast %cst_58 : f32 to vector<8x128xf32>
    %308 = arith.addf %307, %306 : vector<8x128xf32>
    %309 = arith.divf %307, %308 : vector<8x128xf32>
    %310 = vector.extract_strided_slice %301 {offsets = [0, 128], sizes = [8, 128], strides = [1, 1]} : vector<8x384xf32> to vector<8x128xf32>
    %311 = vector.extract_strided_slice %262 {offsets = [0, 128], sizes = [8, 128], strides = [1, 1]} : vector<8x384xf32> to vector<8x128xf32>
    %312 = arith.addf %310, %311 : vector<8x128xf32>
    %313 = arith.negf %312 : vector<8x128xf32>
    %314 = math.exp %313 : vector<8x128xf32>
    %cst_59 = arith.constant 1.000000e+00 : f32
    %315 = vector.broadcast %cst_59 : f32 to vector<8x128xf32>
    %316 = arith.addf %315, %314 : vector<8x128xf32>
    %317 = arith.divf %315, %316 : vector<8x128xf32>
    %318 = vector.extract_strided_slice %301 {offsets = [0, 256], sizes = [8, 128], strides = [1, 1]} : vector<8x384xf32> to vector<8x128xf32>
    %319 = vector.extract_strided_slice %262 {offsets = [0, 256], sizes = [8, 128], strides = [1, 1]} : vector<8x384xf32> to vector<8x128xf32>
    %320 = arith.addf %319, %18 : vector<8x128xf32>
    %321 = arith.mulf %309, %320 : vector<8x128xf32>
    %322 = arith.addf %318, %321 : vector<8x128xf32>
    %323 = math.tanh %322 : vector<8x128xf32>
    %cst_60 = arith.constant 1.000000e+00 : f32
    %324 = vector.broadcast %cst_60 : f32 to vector<8x128xf32>
    %325 = arith.subf %324, %317 : vector<8x128xf32>
    %326 = arith.mulf %325, %323 : vector<8x128xf32>
    %327 = arith.mulf %317, %260 : vector<8x128xf32>
    %328 = arith.addf %326, %327 : vector<8x128xf32>
    %c5_i32 = arith.constant 5 : i32
    %cst_61 = arith.constant dense<0.000000e+00> : vector<8x768xf32>
    %329 = tpu.matmul %299, %2, %cst_61 {dimension_numbers = #tpu.dot_dimension_numbers<[1], [0], [0], [1], [0, 0, 1, 1], [], []>} : vector<8x128xf32>, vector<128x768xf32>, vector<8x768xf32> -> vector<8x768xf32>
    %cst_62 = arith.constant dense<0.000000e+00> : vector<8x384xf32>
    %330 = tpu.matmul %328, %3, %cst_62 {dimension_numbers = #tpu.dot_dimension_numbers<[1], [0], [0], [1], [0, 0, 1, 1], [], []>} : vector<8x128xf32>, vector<128x384xf32>, vector<8x384xf32> -> vector<8x384xf32>
    %331 = vector.broadcast %c5_i32 : i32 to vector<8x128xi32>
    %332 = arith.cmpi eq, %1, %331 : vector<8x128xi32>
    %cst_63 = arith.constant 0.000000e+00 : f32
    %333 = vector.broadcast %cst_63 : f32 to vector<8x128xf32>
    %334 = arith.select %332, %0, %333 : vector<8x128xi1>, vector<8x128xf32>
    %cst_64 = arith.constant dense<0.000000e+00> : vector<8xf32>
    %335 = vector.multi_reduction <add>, %334, %cst_64 [1] : vector<8x128xf32> to vector<8xf32>
    %336 = vector.shape_cast %335 : vector<8xf32> to vector<8x1xf32>
    %337 = vector.broadcast %336 : vector<8x1xf32> to vector<8x384xf32>
    %338 = arith.mulf %337, %6 : vector<8x384xf32>
    %339 = arith.addf %338, %9 : vector<8x384xf32>
    %340 = vector.extract_strided_slice %329 {offsets = [0, 0], sizes = [8, 384], strides = [1, 1]} : vector<8x768xf32> to vector<8x384xf32>
    %341 = vector.extract_strided_slice %339 {offsets = [0, 0], sizes = [8, 128], strides = [1, 1]} : vector<8x384xf32> to vector<8x128xf32>
    %342 = vector.extract_strided_slice %340 {offsets = [0, 0], sizes = [8, 128], strides = [1, 1]} : vector<8x384xf32> to vector<8x128xf32>
    %343 = arith.addf %341, %342 : vector<8x128xf32>
    %344 = arith.negf %343 : vector<8x128xf32>
    %345 = math.exp %344 : vector<8x128xf32>
    %cst_65 = arith.constant 1.000000e+00 : f32
    %346 = vector.broadcast %cst_65 : f32 to vector<8x128xf32>
    %347 = arith.addf %346, %345 : vector<8x128xf32>
    %348 = arith.divf %346, %347 : vector<8x128xf32>
    %349 = vector.extract_strided_slice %339 {offsets = [0, 128], sizes = [8, 128], strides = [1, 1]} : vector<8x384xf32> to vector<8x128xf32>
    %350 = vector.extract_strided_slice %340 {offsets = [0, 128], sizes = [8, 128], strides = [1, 1]} : vector<8x384xf32> to vector<8x128xf32>
    %351 = arith.addf %349, %350 : vector<8x128xf32>
    %352 = arith.negf %351 : vector<8x128xf32>
    %353 = math.exp %352 : vector<8x128xf32>
    %cst_66 = arith.constant 1.000000e+00 : f32
    %354 = vector.broadcast %cst_66 : f32 to vector<8x128xf32>
    %355 = arith.addf %354, %353 : vector<8x128xf32>
    %356 = arith.divf %354, %355 : vector<8x128xf32>
    %357 = vector.extract_strided_slice %339 {offsets = [0, 256], sizes = [8, 128], strides = [1, 1]} : vector<8x384xf32> to vector<8x128xf32>
    %358 = vector.extract_strided_slice %340 {offsets = [0, 256], sizes = [8, 128], strides = [1, 1]} : vector<8x384xf32> to vector<8x128xf32>
    %359 = arith.addf %358, %15 : vector<8x128xf32>
    %360 = arith.mulf %348, %359 : vector<8x128xf32>
    %361 = arith.addf %357, %360 : vector<8x128xf32>
    %362 = math.tanh %361 : vector<8x128xf32>
    %cst_67 = arith.constant 1.000000e+00 : f32
    %363 = vector.broadcast %cst_67 : f32 to vector<8x128xf32>
    %364 = arith.subf %363, %356 : vector<8x128xf32>
    %365 = arith.mulf %364, %362 : vector<8x128xf32>
    %366 = arith.mulf %356, %299 : vector<8x128xf32>
    %367 = arith.addf %365, %366 : vector<8x128xf32>
    %368 = vector.extract_strided_slice %329 {offsets = [0, 384], sizes = [8, 384], strides = [1, 1]} : vector<8x768xf32> to vector<8x384xf32>
    %369 = arith.addf %368, %12 : vector<8x384xf32>
    %370 = vector.extract_strided_slice %369 {offsets = [0, 0], sizes = [8, 128], strides = [1, 1]} : vector<8x384xf32> to vector<8x128xf32>
    %371 = vector.extract_strided_slice %330 {offsets = [0, 0], sizes = [8, 128], strides = [1, 1]} : vector<8x384xf32> to vector<8x128xf32>
    %372 = arith.addf %370, %371 : vector<8x128xf32>
    %373 = arith.negf %372 : vector<8x128xf32>
    %374 = math.exp %373 : vector<8x128xf32>
    %cst_68 = arith.constant 1.000000e+00 : f32
    %375 = vector.broadcast %cst_68 : f32 to vector<8x128xf32>
    %376 = arith.addf %375, %374 : vector<8x128xf32>
    %377 = arith.divf %375, %376 : vector<8x128xf32>
    %378 = vector.extract_strided_slice %369 {offsets = [0, 128], sizes = [8, 128], strides = [1, 1]} : vector<8x384xf32> to vector<8x128xf32>
    %379 = vector.extract_strided_slice %330 {offsets = [0, 128], sizes = [8, 128], strides = [1, 1]} : vector<8x384xf32> to vector<8x128xf32>
    %380 = arith.addf %378, %379 : vector<8x128xf32>
    %381 = arith.negf %380 : vector<8x128xf32>
    %382 = math.exp %381 : vector<8x128xf32>
    %cst_69 = arith.constant 1.000000e+00 : f32
    %383 = vector.broadcast %cst_69 : f32 to vector<8x128xf32>
    %384 = arith.addf %383, %382 : vector<8x128xf32>
    %385 = arith.divf %383, %384 : vector<8x128xf32>
    %386 = vector.extract_strided_slice %369 {offsets = [0, 256], sizes = [8, 128], strides = [1, 1]} : vector<8x384xf32> to vector<8x128xf32>
    %387 = vector.extract_strided_slice %330 {offsets = [0, 256], sizes = [8, 128], strides = [1, 1]} : vector<8x384xf32> to vector<8x128xf32>
    %388 = arith.addf %387, %18 : vector<8x128xf32>
    %389 = arith.mulf %377, %388 : vector<8x128xf32>
    %390 = arith.addf %386, %389 : vector<8x128xf32>
    %391 = math.tanh %390 : vector<8x128xf32>
    %cst_70 = arith.constant 1.000000e+00 : f32
    %392 = vector.broadcast %cst_70 : f32 to vector<8x128xf32>
    %393 = arith.subf %392, %385 : vector<8x128xf32>
    %394 = arith.mulf %393, %391 : vector<8x128xf32>
    %395 = arith.mulf %385, %328 : vector<8x128xf32>
    %396 = arith.addf %394, %395 : vector<8x128xf32>
    %c6_i32 = arith.constant 6 : i32
    %cst_71 = arith.constant dense<0.000000e+00> : vector<8x768xf32>
    %397 = tpu.matmul %367, %2, %cst_71 {dimension_numbers = #tpu.dot_dimension_numbers<[1], [0], [0], [1], [0, 0, 1, 1], [], []>} : vector<8x128xf32>, vector<128x768xf32>, vector<8x768xf32> -> vector<8x768xf32>
    %cst_72 = arith.constant dense<0.000000e+00> : vector<8x384xf32>
    %398 = tpu.matmul %396, %3, %cst_72 {dimension_numbers = #tpu.dot_dimension_numbers<[1], [0], [0], [1], [0, 0, 1, 1], [], []>} : vector<8x128xf32>, vector<128x384xf32>, vector<8x384xf32> -> vector<8x384xf32>
    %399 = vector.broadcast %c6_i32 : i32 to vector<8x128xi32>
    %400 = arith.cmpi eq, %1, %399 : vector<8x128xi32>
    %cst_73 = arith.constant 0.000000e+00 : f32
    %401 = vector.broadcast %cst_73 : f32 to vector<8x128xf32>
    %402 = arith.select %400, %0, %401 : vector<8x128xi1>, vector<8x128xf32>
    %cst_74 = arith.constant dense<0.000000e+00> : vector<8xf32>
    %403 = vector.multi_reduction <add>, %402, %cst_74 [1] : vector<8x128xf32> to vector<8xf32>
    %404 = vector.shape_cast %403 : vector<8xf32> to vector<8x1xf32>
    %405 = vector.broadcast %404 : vector<8x1xf32> to vector<8x384xf32>
    %406 = arith.mulf %405, %6 : vector<8x384xf32>
    %407 = arith.addf %406, %9 : vector<8x384xf32>
    %408 = vector.extract_strided_slice %397 {offsets = [0, 0], sizes = [8, 384], strides = [1, 1]} : vector<8x768xf32> to vector<8x384xf32>
    %409 = vector.extract_strided_slice %407 {offsets = [0, 0], sizes = [8, 128], strides = [1, 1]} : vector<8x384xf32> to vector<8x128xf32>
    %410 = vector.extract_strided_slice %408 {offsets = [0, 0], sizes = [8, 128], strides = [1, 1]} : vector<8x384xf32> to vector<8x128xf32>
    %411 = arith.addf %409, %410 : vector<8x128xf32>
    %412 = arith.negf %411 : vector<8x128xf32>
    %413 = math.exp %412 : vector<8x128xf32>
    %cst_75 = arith.constant 1.000000e+00 : f32
    %414 = vector.broadcast %cst_75 : f32 to vector<8x128xf32>
    %415 = arith.addf %414, %413 : vector<8x128xf32>
    %416 = arith.divf %414, %415 : vector<8x128xf32>
    %417 = vector.extract_strided_slice %407 {offsets = [0, 128], sizes = [8, 128], strides = [1, 1]} : vector<8x384xf32> to vector<8x128xf32>
    %418 = vector.extract_strided_slice %408 {offsets = [0, 128], sizes = [8, 128], strides = [1, 1]} : vector<8x384xf32> to vector<8x128xf32>
    %419 = arith.addf %417, %418 : vector<8x128xf32>
    %420 = arith.negf %419 : vector<8x128xf32>
    %421 = math.exp %420 : vector<8x128xf32>
    %cst_76 = arith.constant 1.000000e+00 : f32
    %422 = vector.broadcast %cst_76 : f32 to vector<8x128xf32>
    %423 = arith.addf %422, %421 : vector<8x128xf32>
    %424 = arith.divf %422, %423 : vector<8x128xf32>
    %425 = vector.extract_strided_slice %407 {offsets = [0, 256], sizes = [8, 128], strides = [1, 1]} : vector<8x384xf32> to vector<8x128xf32>
    %426 = vector.extract_strided_slice %408 {offsets = [0, 256], sizes = [8, 128], strides = [1, 1]} : vector<8x384xf32> to vector<8x128xf32>
    %427 = arith.addf %426, %15 : vector<8x128xf32>
    %428 = arith.mulf %416, %427 : vector<8x128xf32>
    %429 = arith.addf %425, %428 : vector<8x128xf32>
    %430 = math.tanh %429 : vector<8x128xf32>
    %cst_77 = arith.constant 1.000000e+00 : f32
    %431 = vector.broadcast %cst_77 : f32 to vector<8x128xf32>
    %432 = arith.subf %431, %424 : vector<8x128xf32>
    %433 = arith.mulf %432, %430 : vector<8x128xf32>
    %434 = arith.mulf %424, %367 : vector<8x128xf32>
    %435 = arith.addf %433, %434 : vector<8x128xf32>
    %436 = vector.extract_strided_slice %397 {offsets = [0, 384], sizes = [8, 384], strides = [1, 1]} : vector<8x768xf32> to vector<8x384xf32>
    %437 = arith.addf %436, %12 : vector<8x384xf32>
    %438 = vector.extract_strided_slice %437 {offsets = [0, 0], sizes = [8, 128], strides = [1, 1]} : vector<8x384xf32> to vector<8x128xf32>
    %439 = vector.extract_strided_slice %398 {offsets = [0, 0], sizes = [8, 128], strides = [1, 1]} : vector<8x384xf32> to vector<8x128xf32>
    %440 = arith.addf %438, %439 : vector<8x128xf32>
    %441 = arith.negf %440 : vector<8x128xf32>
    %442 = math.exp %441 : vector<8x128xf32>
    %cst_78 = arith.constant 1.000000e+00 : f32
    %443 = vector.broadcast %cst_78 : f32 to vector<8x128xf32>
    %444 = arith.addf %443, %442 : vector<8x128xf32>
    %445 = arith.divf %443, %444 : vector<8x128xf32>
    %446 = vector.extract_strided_slice %437 {offsets = [0, 128], sizes = [8, 128], strides = [1, 1]} : vector<8x384xf32> to vector<8x128xf32>
    %447 = vector.extract_strided_slice %398 {offsets = [0, 128], sizes = [8, 128], strides = [1, 1]} : vector<8x384xf32> to vector<8x128xf32>
    %448 = arith.addf %446, %447 : vector<8x128xf32>
    %449 = arith.negf %448 : vector<8x128xf32>
    %450 = math.exp %449 : vector<8x128xf32>
    %cst_79 = arith.constant 1.000000e+00 : f32
    %451 = vector.broadcast %cst_79 : f32 to vector<8x128xf32>
    %452 = arith.addf %451, %450 : vector<8x128xf32>
    %453 = arith.divf %451, %452 : vector<8x128xf32>
    %454 = vector.extract_strided_slice %437 {offsets = [0, 256], sizes = [8, 128], strides = [1, 1]} : vector<8x384xf32> to vector<8x128xf32>
    %455 = vector.extract_strided_slice %398 {offsets = [0, 256], sizes = [8, 128], strides = [1, 1]} : vector<8x384xf32> to vector<8x128xf32>
    %456 = arith.addf %455, %18 : vector<8x128xf32>
    %457 = arith.mulf %445, %456 : vector<8x128xf32>
    %458 = arith.addf %454, %457 : vector<8x128xf32>
    %459 = math.tanh %458 : vector<8x128xf32>
    %cst_80 = arith.constant 1.000000e+00 : f32
    %460 = vector.broadcast %cst_80 : f32 to vector<8x128xf32>
    %461 = arith.subf %460, %453 : vector<8x128xf32>
    %462 = arith.mulf %461, %459 : vector<8x128xf32>
    %463 = arith.mulf %453, %396 : vector<8x128xf32>
    %464 = arith.addf %462, %463 : vector<8x128xf32>
    %c7_i32 = arith.constant 7 : i32
    %cst_81 = arith.constant dense<0.000000e+00> : vector<8x768xf32>
    %465 = tpu.matmul %435, %2, %cst_81 {dimension_numbers = #tpu.dot_dimension_numbers<[1], [0], [0], [1], [0, 0, 1, 1], [], []>} : vector<8x128xf32>, vector<128x768xf32>, vector<8x768xf32> -> vector<8x768xf32>
    %cst_82 = arith.constant dense<0.000000e+00> : vector<8x384xf32>
    %466 = tpu.matmul %464, %3, %cst_82 {dimension_numbers = #tpu.dot_dimension_numbers<[1], [0], [0], [1], [0, 0, 1, 1], [], []>} : vector<8x128xf32>, vector<128x384xf32>, vector<8x384xf32> -> vector<8x384xf32>
    %467 = vector.broadcast %c7_i32 : i32 to vector<8x128xi32>
    %468 = arith.cmpi eq, %1, %467 : vector<8x128xi32>
    %cst_83 = arith.constant 0.000000e+00 : f32
    %469 = vector.broadcast %cst_83 : f32 to vector<8x128xf32>
    %470 = arith.select %468, %0, %469 : vector<8x128xi1>, vector<8x128xf32>
    %cst_84 = arith.constant dense<0.000000e+00> : vector<8xf32>
    %471 = vector.multi_reduction <add>, %470, %cst_84 [1] : vector<8x128xf32> to vector<8xf32>
    %472 = vector.shape_cast %471 : vector<8xf32> to vector<8x1xf32>
    %473 = vector.broadcast %472 : vector<8x1xf32> to vector<8x384xf32>
    %474 = arith.mulf %473, %6 : vector<8x384xf32>
    %475 = arith.addf %474, %9 : vector<8x384xf32>
    %476 = vector.extract_strided_slice %465 {offsets = [0, 0], sizes = [8, 384], strides = [1, 1]} : vector<8x768xf32> to vector<8x384xf32>
    %477 = vector.extract_strided_slice %475 {offsets = [0, 0], sizes = [8, 128], strides = [1, 1]} : vector<8x384xf32> to vector<8x128xf32>
    %478 = vector.extract_strided_slice %476 {offsets = [0, 0], sizes = [8, 128], strides = [1, 1]} : vector<8x384xf32> to vector<8x128xf32>
    %479 = arith.addf %477, %478 : vector<8x128xf32>
    %480 = arith.negf %479 : vector<8x128xf32>
    %481 = math.exp %480 : vector<8x128xf32>
    %cst_85 = arith.constant 1.000000e+00 : f32
    %482 = vector.broadcast %cst_85 : f32 to vector<8x128xf32>
    %483 = arith.addf %482, %481 : vector<8x128xf32>
    %484 = arith.divf %482, %483 : vector<8x128xf32>
    %485 = vector.extract_strided_slice %475 {offsets = [0, 128], sizes = [8, 128], strides = [1, 1]} : vector<8x384xf32> to vector<8x128xf32>
    %486 = vector.extract_strided_slice %476 {offsets = [0, 128], sizes = [8, 128], strides = [1, 1]} : vector<8x384xf32> to vector<8x128xf32>
    %487 = arith.addf %485, %486 : vector<8x128xf32>
    %488 = arith.negf %487 : vector<8x128xf32>
    %489 = math.exp %488 : vector<8x128xf32>
    %cst_86 = arith.constant 1.000000e+00 : f32
    %490 = vector.broadcast %cst_86 : f32 to vector<8x128xf32>
    %491 = arith.addf %490, %489 : vector<8x128xf32>
    %492 = arith.divf %490, %491 : vector<8x128xf32>
    %493 = vector.extract_strided_slice %475 {offsets = [0, 256], sizes = [8, 128], strides = [1, 1]} : vector<8x384xf32> to vector<8x128xf32>
    %494 = vector.extract_strided_slice %476 {offsets = [0, 256], sizes = [8, 128], strides = [1, 1]} : vector<8x384xf32> to vector<8x128xf32>
    %495 = arith.addf %494, %15 : vector<8x128xf32>
    %496 = arith.mulf %484, %495 : vector<8x128xf32>
    %497 = arith.addf %493, %496 : vector<8x128xf32>
    %498 = math.tanh %497 : vector<8x128xf32>
    %cst_87 = arith.constant 1.000000e+00 : f32
    %499 = vector.broadcast %cst_87 : f32 to vector<8x128xf32>
    %500 = arith.subf %499, %492 : vector<8x128xf32>
    %501 = arith.mulf %500, %498 : vector<8x128xf32>
    %502 = arith.mulf %492, %435 : vector<8x128xf32>
    %503 = arith.addf %501, %502 : vector<8x128xf32>
    %504 = vector.extract_strided_slice %465 {offsets = [0, 384], sizes = [8, 384], strides = [1, 1]} : vector<8x768xf32> to vector<8x384xf32>
    %505 = arith.addf %504, %12 : vector<8x384xf32>
    %506 = vector.extract_strided_slice %505 {offsets = [0, 0], sizes = [8, 128], strides = [1, 1]} : vector<8x384xf32> to vector<8x128xf32>
    %507 = vector.extract_strided_slice %466 {offsets = [0, 0], sizes = [8, 128], strides = [1, 1]} : vector<8x384xf32> to vector<8x128xf32>
    %508 = arith.addf %506, %507 : vector<8x128xf32>
    %509 = arith.negf %508 : vector<8x128xf32>
    %510 = math.exp %509 : vector<8x128xf32>
    %cst_88 = arith.constant 1.000000e+00 : f32
    %511 = vector.broadcast %cst_88 : f32 to vector<8x128xf32>
    %512 = arith.addf %511, %510 : vector<8x128xf32>
    %513 = arith.divf %511, %512 : vector<8x128xf32>
    %514 = vector.extract_strided_slice %505 {offsets = [0, 128], sizes = [8, 128], strides = [1, 1]} : vector<8x384xf32> to vector<8x128xf32>
    %515 = vector.extract_strided_slice %466 {offsets = [0, 128], sizes = [8, 128], strides = [1, 1]} : vector<8x384xf32> to vector<8x128xf32>
    %516 = arith.addf %514, %515 : vector<8x128xf32>
    %517 = arith.negf %516 : vector<8x128xf32>
    %518 = math.exp %517 : vector<8x128xf32>
    %cst_89 = arith.constant 1.000000e+00 : f32
    %519 = vector.broadcast %cst_89 : f32 to vector<8x128xf32>
    %520 = arith.addf %519, %518 : vector<8x128xf32>
    %521 = arith.divf %519, %520 : vector<8x128xf32>
    %522 = vector.extract_strided_slice %505 {offsets = [0, 256], sizes = [8, 128], strides = [1, 1]} : vector<8x384xf32> to vector<8x128xf32>
    %523 = vector.extract_strided_slice %466 {offsets = [0, 256], sizes = [8, 128], strides = [1, 1]} : vector<8x384xf32> to vector<8x128xf32>
    %524 = arith.addf %523, %18 : vector<8x128xf32>
    %525 = arith.mulf %513, %524 : vector<8x128xf32>
    %526 = arith.addf %522, %525 : vector<8x128xf32>
    %527 = math.tanh %526 : vector<8x128xf32>
    %cst_90 = arith.constant 1.000000e+00 : f32
    %528 = vector.broadcast %cst_90 : f32 to vector<8x128xf32>
    %529 = arith.subf %528, %521 : vector<8x128xf32>
    %530 = arith.mulf %529, %527 : vector<8x128xf32>
    %531 = arith.mulf %521, %464 : vector<8x128xf32>
    %532 = arith.addf %530, %531 : vector<8x128xf32>
    %c7_i32_91 = arith.constant 7 : i32
    %cst_92 = arith.constant dense<0.000000e+00> : vector<8x768xf32>
    %533 = tpu.matmul %503, %2, %cst_92 {dimension_numbers = #tpu.dot_dimension_numbers<[1], [0], [0], [1], [0, 0, 1, 1], [], []>} : vector<8x128xf32>, vector<128x768xf32>, vector<8x768xf32> -> vector<8x768xf32>
    %cst_93 = arith.constant dense<0.000000e+00> : vector<8x384xf32>
    %534 = tpu.matmul %532, %3, %cst_93 {dimension_numbers = #tpu.dot_dimension_numbers<[1], [0], [0], [1], [0, 0, 1, 1], [], []>} : vector<8x128xf32>, vector<128x384xf32>, vector<8x384xf32> -> vector<8x384xf32>
    %535 = vector.extract_strided_slice %533 {offsets = [0, 384], sizes = [8, 384], strides = [1, 1]} : vector<8x768xf32> to vector<8x384xf32>
    %536 = arith.addf %535, %12 : vector<8x384xf32>
    %537 = vector.extract_strided_slice %536 {offsets = [0, 0], sizes = [8, 128], strides = [1, 1]} : vector<8x384xf32> to vector<8x128xf32>
    %538 = vector.extract_strided_slice %534 {offsets = [0, 0], sizes = [8, 128], strides = [1, 1]} : vector<8x384xf32> to vector<8x128xf32>
    %539 = arith.addf %537, %538 : vector<8x128xf32>
    %540 = arith.negf %539 : vector<8x128xf32>
    %541 = math.exp %540 : vector<8x128xf32>
    %cst_94 = arith.constant 1.000000e+00 : f32
    %542 = vector.broadcast %cst_94 : f32 to vector<8x128xf32>
    %543 = arith.addf %542, %541 : vector<8x128xf32>
    %544 = arith.divf %542, %543 : vector<8x128xf32>
    %545 = vector.extract_strided_slice %536 {offsets = [0, 128], sizes = [8, 128], strides = [1, 1]} : vector<8x384xf32> to vector<8x128xf32>
    %546 = vector.extract_strided_slice %534 {offsets = [0, 128], sizes = [8, 128], strides = [1, 1]} : vector<8x384xf32> to vector<8x128xf32>
    %547 = arith.addf %545, %546 : vector<8x128xf32>
    %548 = arith.negf %547 : vector<8x128xf32>
    %549 = math.exp %548 : vector<8x128xf32>
    %cst_95 = arith.constant 1.000000e+00 : f32
    %550 = vector.broadcast %cst_95 : f32 to vector<8x128xf32>
    %551 = arith.addf %550, %549 : vector<8x128xf32>
    %552 = arith.divf %550, %551 : vector<8x128xf32>
    %553 = vector.extract_strided_slice %536 {offsets = [0, 256], sizes = [8, 128], strides = [1, 1]} : vector<8x384xf32> to vector<8x128xf32>
    %554 = vector.extract_strided_slice %534 {offsets = [0, 256], sizes = [8, 128], strides = [1, 1]} : vector<8x384xf32> to vector<8x128xf32>
    %555 = arith.addf %554, %18 : vector<8x128xf32>
    %556 = arith.mulf %544, %555 : vector<8x128xf32>
    %557 = arith.addf %553, %556 : vector<8x128xf32>
    %558 = math.tanh %557 : vector<8x128xf32>
    %cst_96 = arith.constant 1.000000e+00 : f32
    %559 = vector.broadcast %cst_96 : f32 to vector<8x128xf32>
    %560 = arith.subf %559, %552 : vector<8x128xf32>
    %561 = arith.mulf %560, %558 : vector<8x128xf32>
    %562 = arith.mulf %552, %532 : vector<8x128xf32>
    %563 = arith.addf %561, %562 : vector<8x128xf32>
    %c0_97 = arith.constant 0 : index
    %c0_98 = arith.constant 0 : index
    %564 = vector.load %arg8[%c0_97, %c0_98] : memref<128x128xf32, #tpu.memory_space<vmem>>, vector<128x128xf32>
    %cst_99 = arith.constant dense<0.000000e+00> : vector<8x128xf32>
    %565 = tpu.matmul %563, %564, %cst_99 {dimension_numbers = #tpu.dot_dimension_numbers<[1], [0], [0], [1], [0, 0, 1, 1], [], []>} : vector<8x128xf32>, vector<128x128xf32>, vector<8x128xf32> -> vector<8x128xf32>
    %c0_100 = arith.constant 0 : index
    %c0_101 = arith.constant 0 : index
    %566 = vector.load %arg9[%c0_100, %c0_101] : memref<1x128xf32, #tpu.memory_space<vmem>>, vector<1x128xf32>
    %567 = vector.broadcast %566 : vector<1x128xf32> to vector<8x128xf32>
    %568 = arith.addf %565, %567 : vector<8x128xf32>
    %c0_102 = arith.constant 0 : index
    %c0_103 = arith.constant 0 : index
    %569 = vector.load %arg10[%c0_102, %c0_103] : memref<8x128xf32, #tpu.memory_space<vmem>>, vector<8x128xf32>
    tpu.vector_store %arg10[%c0_102, %c0_103], %568 {strides = array<i32>} : memref<8x128xf32, #tpu.memory_space<vmem>>, vector<8x128xf32>,
    return
  }
}

</mosaic_0001>

<bundles_post_ra>
// kernel: tpu_custom_call.1
= control target key start
LH: loop header
LB: loop body
LE: loop exit
PB: predicated region body
PF: predicated region fallthrough
CT: control target
= control target key end

     0   :  { %15 = vsyncpa [#allocation3], 0  ;;  %s5978_s0 = inlined_call_operand.hbm [shape: f32[8,128], index: 0, kind: input, shape index: {}]   ;;  %s5979_s1 = inlined_call_operand.hbm [shape: f32[1,384], index: 1, kind: input, shape index: {}]   ;;  %s5980_s2 = inlined_call_operand.hbm [shape: f32[1,384], index: 2, kind: input, shape index: {}]   ;;  %s5981_s3 = inlined_call_operand.hbm [shape: f32[128,768], index: 3, kind: input, shape index: {}]   ;;  %s5982_s4 = inlined_call_operand.vmem [shape: f32[1,384], index: 4, kind: input, shape index: {}]   ;;  %s5983_s5 = inlined_call_operand.vmem [shape: f32[1,128], index: 5, kind: input, shape index: {}]   ;;  %s5984_s6 = inlined_call_operand.hbm [shape: f32[128,384], index: 6, kind: input, shape index: {}]   ;;  %s5985_s7 = inlined_call_operand.vmem [shape: f32[1,128], index: 7, kind: input, shape index: {}]   ;;  %s5986_s8 = inlined_call_operand.hbm [shape: f32[128,128], index: 8, kind: input, shape index: {}]   ;;  %s5987_s9 = inlined_call_operand.vmem [shape: f32[1,128], index: 9, kind: input, shape index: {}]   ;;  %s5988_s10 = inlined_call_operand.hbm [shape: f32[8,128], index: 10, kind: output, shape index: {}]  }
   0x1   :  { %16 = vsyncpa [#allocation6], 0 }
   0x2   :  { %17 = vsyncpa [#allocation9], 0 }
   0x3   :  { %18 = vsyncpa [#allocation12], 0  ;;  %s36_s15 = sshll.u32 %s5979_s1, 4  ;;  %s37_s15 = int_to_ptr.hbm [resolvable:$true] %s36_s15 }
   0x4   :  { %19 = vsyncpa [#allocation4], 0  ;;  %s3429_s16 = smov [#allocation5]   ;;  %s57_s20 = sshll.u32 %s5981_s3, 4  ;;  %s58_s20 = int_to_ptr.hbm [resolvable:$true] %s57_s20 }
   0x5   :  { %s38_s17 = sshll.u32 %s3429_s16, 4  ;;  %s3430_s21 = smov [#allocation8]   ;;  %s39_s17 = int_to_ptr.vmem [resolvable:$true] %s38_s17 }
   0x6   :  { %41 = dma.hbm_to_vmem [thread:$0]  %s37_s15, 48, %s39_s17, [#allocation6]  }
   0x7   :  { %s59_s22 = sshll.u32 %s3430_s21, 4  ;;  %s3431_s23 = smov 768   ;;  %s60_s22 = int_to_ptr.vmem [resolvable:$true] %s59_s22 }
   0x8   :  { %s3432_s24 = smov 48   ;;  %s25_s1 = sshll.u32 %s5978_s0, 4  ;;  %s26_s1 = int_to_ptr.hbm [resolvable:$true] %s25_s1 }
   0x9   :  { %65 = dma.hbm_to_vmem [thread:$0]  %s58_s20, 12288, %s60_s22, [#allocation9], %s3431_s23, %s3431_s23, %s3432_s24  }
   0xa   :  { %s3433_s27 = smov [#allocation2]   ;;  %s47_s3 = sshll.u32 %s5980_s2, 4  ;;  %s48_s3 = int_to_ptr.hbm [resolvable:$true] %s47_s3 }
   0xb   :  { %s27_s28 = sshll.u32 %s3433_s27, 4  ;;  %s3434_s11 = smov [#allocation7]   ;;  %s28_s28 = int_to_ptr.vmem [resolvable:$true] %s27_s28 }
   0xc   :  { %30 = dma.hbm_to_vmem [thread:$0]  %s26_s1, 128, %s28_s28, [#allocation3]  }
   0xd   :  { %s49_s12 = sshll.u32 %s3434_s11, 4  ;;  %s74_s15 = sshll.u32 %s5984_s6, 4  ;;  %s50_s12 = int_to_ptr.vmem [resolvable:$true] %s49_s12  ;;  %s75_s15 = int_to_ptr.hbm [resolvable:$true] %s74_s15 }
   0xe   :  { %52 = dma.hbm_to_vmem [thread:$0]  %s48_s3, 48, %s50_s12, [#allocation6]  }
   0xf   :  { %s3435_s0 = smov [#allocation10]   ;;  %s89_s19 = sshll.u32 %s5986_s8, 4  ;;  %s90_s19 = int_to_ptr.hbm [resolvable:$true] %s89_s19 }
  0x10   :  { %s76_s16 = sshll.u32 %s3435_s0, 4  ;;  %s3436_s20 = smov 384   ;;  %s77_s16 = int_to_ptr.vmem [resolvable:$true] %s76_s16 }
  0x11   :  { %s3437_s2 = smov 24   ;;  %s3438_s21 = smov [#allocation11]  }
  0x12   :  { %82 = dma.hbm_to_vmem [thread:$0]  %s75_s15, 6144, %s77_s16, [#allocation9], %s3436_s20, %s3436_s20, %s3437_s2  }
  0x13   :  { %s91_s22 = sshll.u32 %s3438_s21, 4  ;;  %s3439_s23 = smov 128   ;;  %s92_s22 = int_to_ptr.vmem [resolvable:$true] %s91_s22 }
  0x14   :  { %s3440_s24 = smov 8  }
  0x15   :  { %97 = dma.hbm_to_vmem [thread:$0]  %s90_s19, 2048, %s92_s22, [#allocation12], %s3439_s23, %s3439_s23, %s3440_s24  }
  0x16   :  { %3419 = dma.done.wait [#allocation3], 128  }
  0x17   :  { %3420 = vsyncadd [#allocation3], 4294967168 }
  0x18   :  { %3421 = dma.done.wait [#allocation6], 96  }
  0x19   :  { %3422 = vsyncadd [#allocation6], 4294967200 }
  0x1a   :  { %3423 = dma.done.wait [#allocation9], 18432  }
  0x1b   :  { %3424 = vsyncadd [#allocation9], 4294948864 }
  0x1c   :  { %3425 = dma.done.wait [#allocation12], 2048  }
  0x1d   :  { %3426 = vsyncadd [#allocation12], 4294965248  ;;  %v125_v0 = vlaneseq  ;;  %v3519_v2 = vld [vmem:[#allocation2] sm:$0xff]  ;;  %v3523_v4 = vld [vmem:[#allocation8 + $0x2d8] sm:$0xff]  ;;  %s3442_s17 = smov [#allocation13]   ;;  %s2603_s2 = sshll.u32 %s5988_s10, 4  ;;  %s2604_s2 = int_to_ptr.hbm [resolvable:$true] %s2603_s2 }
  0x1e   :  { %v3521_v3 = vld [vmem:[#allocation8 + $0x2d0] sm:$0xff]  ;;  %381 = vmatpush.msra.mxu1 %v3523_v4  ;;  %v3528_v6 = vld [vmem:[#allocation8 + $0x2e0] sm:$0xff]  ;;  %v3530_v7 = vld [vmem:[#allocation8 + $0x2e8] sm:$0xff]  ;;  %s2601_s18 = sshll.u32 %s3442_s17, 4  ;;  %s2602_s18 = int_to_ptr.vmem [resolvable:$true] %s2601_s18 }
  0x1f   :  { %v3516_v1 = vand.u32 127, %v125_v0  ;;  %361 = vmatpush.msra.mxu0 %v3521_v3  ;;  %6310 = vst [vmem:[#allocation20_spill] sm:$0xff] %v3530_v7  ;;  %v3532_v8 = vld [vmem:[#allocation8 + $0x2a0] sm:$0xff]  ;;  %401 = vmatpush.msra.mxu2 %v3528_v6  ;;  %v3535_v9 = vld [vmem:[#allocation8 + $0x2a8] sm:$0xff]  ;;  %v3537_v10 = vld [vmem:[#allocation8 + $0x2b0] sm:$0xff] }
  0x20   :  { %v3539_v11 = vld [vmem:[#allocation8 + $0x2b8] sm:$0xff]  ;;  %421 = vmatpush.msra.mxu3 %v3530_v7  ;;  %v3543_v12 = vld [vmem:[#allocation8 + $0x270] sm:$0xff]  ;;  %v3547_v14 = vld [vmem:[#allocation8 + $0x280] sm:$0xff]  ;;  %382 = vmatpush.msra.mxu1 %v3535_v9 }
  0x21   :  { %6309 = vst [vmem:[#allocation19_spill] sm:$0xff] %v3516_v1  ;;  %vm303_vm0 = vcmp.eq.s32.totalorder %v3516_v1, 0  ;;  %362 = vmatpush.msra.mxu0 %v3532_v8  ;;  %v3545_v13 = vld [vmem:[#allocation8 + $0x278] sm:$0xff]  ;;  %402 = vmatpush.msra.mxu2 %v3537_v10  ;;  %v3551_v15 = vld [vmem:[#allocation8 + $0x288] sm:$0xff]  ;;  %v3553_v16 = vld [vmem:[#allocation8 + $0x240] sm:$0xff]  ;;  %vm541_vm1 = vcmp.eq.s32.totalorder %v3516_v1, 1 }
  0x22   :  { %v304_v5 = vsel %vm303_vm0, %v3519_v2, 0.0  ;;  %6311 = vst [vmem:[#allocation21_spill] sm:$0xff] %v3539_v11  ;;  %422 = vmatpush.msra.mxu3 %v3539_v11  ;;  %v3557_v17 = vld [vmem:[#allocation8 + $0x248] sm:$0xff]  ;;  %v3559_v18 = vld [vmem:[#allocation8 + $0x250] sm:$0xff]  ;;  %383 = vmatpush.msra.mxu1 %v3545_v13  ;;  %v3563_v19 = vld [vmem:[#allocation8 + $0x258] sm:$0xff]  ;;  %v542_v1 = vsel %vm541_vm1, %v3519_v2, 0.0 }
  0x23   :  { %305 = vadd.xlane.f32.xlu0 %v304_v5  ;;  %6312 = vst [vmem:[#allocation22_spill] sm:$0xff] %v3551_v15  ;;  %363 = vmatpush.msra.mxu0 %v3543_v12  ;;  %v3570_v20 = vld [vmem:[#allocation8 + $0x210] sm:$0xff]  ;;  %v3572_v21 = vld [vmem:[#allocation8 + $0x218] sm:$0xff]  ;;  %v3574_v22 = vld [vmem:[#allocation8 + $0x220] sm:$0xff] }
  0x24   :  { %403 = vmatpush.msra.mxu2 %v3547_v14  ;;  %6313 = vst [vmem:[#allocation23_spill] sm:$0xff] %v3563_v19  ;;  %423 = vmatpush.msra.mxu3 %v3551_v15  ;;  %v3578_v23 = vld [vmem:[#allocation8 + $0x228] sm:$0xff]  ;;  %v3582_v24 = vld [vmem:[#allocation8 + $0x1e0] sm:$0xff]  ;;  %v3586_v26 = vld [vmem:[#allocation8 + $0x1f0] sm:$0xff] }
  0x25   :  { %364 = vmatpush.msra.mxu0 %v3553_v16  ;;  %384 = vmatpush.msra.mxu1 %v3557_v17  ;;  %6314 = vst [vmem:[#allocation24_spill] sm:$0xff] %v3578_v23  ;;  %v3584_v25 = vld [vmem:[#allocation8 + $0x1e8] sm:$0xff]  ;;  %v3590_v27 = vld [vmem:[#allocation8 + $0x1f8] sm:$0xff]  ;;  %v3594_v28 = vld [vmem:[#allocation8 + $0x1b0] sm:$0xff] }
  0x26   :  { %404 = vmatpush.msra.mxu2 %v3559_v18  ;;  %424 = vmatpush.msra.mxu3 %v3563_v19  ;;  %6315 = vst [vmem:[#allocation25_spill] sm:$0xff] %v3590_v27  ;;  %v3596_v29 = vld [vmem:[#allocation8 + $0x1b8] sm:$0xff]  ;;  %v3598_v30 = vld [vmem:[#allocation8 + $0x1c0] sm:$0xff]  ;;  %v3602_v31 = vld [vmem:[#allocation8 + $0x1c8] sm:$0xff] }
  0x27   :  { %365 = vmatpush.msra.mxu0 %v3570_v20  ;;  %385 = vmatpush.msra.mxu1 %v3572_v21  ;;  %6316 = vst [vmem:[#allocation26_spill] sm:$0xff] %v3602_v31  ;;  %v3606_v32 = vld [vmem:[#allocation8 + $0x180] sm:$0xff]  ;;  %v3608_v33 = vld [vmem:[#allocation8 + $0x188] sm:$0xff]  ;;  %v3610_v34 = vld [vmem:[#allocation8 + $0x190] sm:$0xff] }
  0x28   :  { %405 = vmatpush.msra.mxu2 %v3574_v22  ;;  %425 = vmatpush.msra.mxu3 %v3578_v23  ;;  %v3614_v35 = vld [vmem:[#allocation8 + $0x198] sm:$0xff]  ;;  %v3618_v36 = vld [vmem:[#allocation8 + $0x150] sm:$0xff]  ;;  %v3622_v38 = vld [vmem:[#allocation8 + $0x160] sm:$0xff] }
  0x29   :  { %366 = vmatpush.msra.mxu0 %v3582_v24  ;;  %386 = vmatpush.msra.mxu1 %v3584_v25  ;;  %6317 = vst [vmem:[#allocation27_spill] sm:$0xff] %v3614_v35  ;;  %v3620_v37 = vld [vmem:[#allocation8 + $0x158] sm:$0xff]  ;;  %v3626_v39 = vld [vmem:[#allocation8 + $0x168] sm:$0xff]  ;;  %v3630_v40 = vld [vmem:[#allocation8 + $0x120] sm:$0xff] }
  0x2a   :  { %406 = vmatpush.msra.mxu2 %v3586_v26  ;;  %426 = vmatpush.msra.mxu3 %v3590_v27  ;;  %6318 = vst [vmem:[#allocation28_spill] sm:$0xff] %v3626_v39  ;;  %v3632_v41 = vld [vmem:[#allocation8 + $0x128] sm:$0xff]  ;;  %v3634_v42 = vld [vmem:[#allocation8 + $0x130] sm:$0xff]  ;;  %v3638_v43 = vld [vmem:[#allocation8 + $0x138] sm:$0xff] }
  0x2b   :  { %367 = vmatpush.msra.mxu0 %v3594_v28  ;;  %387 = vmatpush.msra.mxu1 %v3596_v29  ;;  %6319 = vst [vmem:[#allocation29_spill] sm:$0xff] %v3638_v43  ;;  %v3642_v44 = vld [vmem:[#allocation8 + $0xf0] sm:$0xff]  ;;  %v3644_v45 = vld [vmem:[#allocation8 + $0xf8] sm:$0xff]  ;;  %v3646_v46 = vld [vmem:[#allocation8 + $0x100] sm:$0xff] }
  0x2c   :  { %407 = vmatpush.msra.mxu2 %v3598_v30  ;;  %427 = vmatpush.msra.mxu3 %v3602_v31  ;;  %v3650_v47 = vld [vmem:[#allocation8 + $0x108] sm:$0xff]  ;;  %v3654_v48 = vld [vmem:[#allocation8 + $0xc0] sm:$0xff]  ;;  %v3658_v50 = vld [vmem:[#allocation8 + $0xd0] sm:$0xff] }
  0x2d   :  { %368 = vmatpush.msra.mxu0 %v3606_v32  ;;  %388 = vmatpush.msra.mxu1 %v3608_v33  ;;  %6320 = vst [vmem:[#allocation30_spill] sm:$0xff] %v3650_v47  ;;  %v3656_v49 = vld [vmem:[#allocation8 + $0xc8] sm:$0xff]  ;;  %v3662_v51 = vld [vmem:[#allocation8 + $0xd8] sm:$0xff]  ;;  %v3666_v52 = vld [vmem:[#allocation8 + $0x90] sm:$0xff] }
  0x2e   :  { %408 = vmatpush.msra.mxu2 %v3610_v34  ;;  %428 = vmatpush.msra.mxu3 %v3614_v35  ;;  %6321 = vst [vmem:[#allocation31_spill] sm:$0xff] %v3662_v51  ;;  %v3668_v53 = vld [vmem:[#allocation8 + $0x98] sm:$0xff]  ;;  %v3670_v54 = vld [vmem:[#allocation8 + $0xa0] sm:$0xff]  ;;  %v3674_v55 = vld [vmem:[#allocation8 + $0xa8] sm:$0xff] }
  0x2f   :  { %369 = vmatpush.msra.mxu0 %v3618_v36  ;;  %389 = vmatpush.msra.mxu1 %v3620_v37  ;;  %6322 = vst [vmem:[#allocation32_spill] sm:$0xff] %v3674_v55  ;;  %v3678_v56 = vld [vmem:[#allocation8 + $0x60] sm:$0xff]  ;;  %v3680_v57 = vld [vmem:[#allocation8 + $0x68] sm:$0xff]  ;;  %v3682_v58 = vld [vmem:[#allocation8 + $0x70] sm:$0xff] }
  0x30   :  { %409 = vmatpush.msra.mxu2 %v3622_v38  ;;  %429 = vmatpush.msra.mxu3 %v3626_v39  ;;  %v3686_v59 = vld [vmem:[#allocation8 + $0x78] sm:$0xff]  ;;  %v3690_v60 = vld [vmem:[#allocation8 + $0x30] sm:$0xff]  ;;  %v3694_v62 = vld [vmem:[#allocation8 + $0x40] sm:$0xff] }
  0x31   :  { %370 = vmatpush.msra.mxu0 %v3630_v40  ;;  %390 = vmatpush.msra.mxu1 %v3632_v41  ;;  %6323 = vst [vmem:[#allocation33_spill] sm:$0xff] %v3686_v59  ;;  %v3692_v61 = vld [vmem:[#allocation8 + $0x38] sm:$0xff]  ;;  %v3698_v63 = vld [vmem:[#allocation8 + $0x48] sm:$0xff]  ;;  %v3702_v0 = vld [vmem:[#allocation8] sm:$0xff] }
  0x32   :  { %410 = vmatpush.msra.mxu2 %v3634_v42  ;;  %430 = vmatpush.msra.mxu3 %v3638_v43  ;;  %6324 = vst [vmem:[#allocation34_spill] sm:$0xff] %v3692_v61  ;;  %v3704_v5 = vld [vmem:[#allocation8 + $0x8] sm:$0xff]  ;;  %v3716_v43 = vld [vmem:[#allocation5] sm:$0x7]  ;;  %v3722_v39 = vld [vmem:[#allocation10 + $0x170] sm:$0xff] }
  0x33   :  { %371 = vmatpush.msra.mxu0 %v3642_v44  ;;  %391 = vmatpush.msra.mxu1 %v3644_v45  ;;  %6325 = vst [vmem:[#allocation35_spill] sm:$0xff] %v3694_v62  ;;  %v3726_v35 = vld [vmem:[#allocation8 + $0x2c0] sm:$0xff]  ;;  %v3728_v31 = vld [vmem:[#allocation8 + $0x2c8] sm:$0xff]  ;;  %v3730_v27 = vld [vmem:[#allocation10 + $0x150] sm:$0xff]  ;;  %v3739_v19 = vperm.slane %v3716_v43, 0  ;;  %v3742_v15 = vperm.slane %v3716_v43, 1 }
  0x34   :  { %411 = vmatpush.msra.mxu2 %v3646_v46  ;;  %431 = vmatpush.msra.mxu3 %v3650_v47  ;;  %6326 = vst [vmem:[#allocation36_spill] sm:$0xff] %v3698_v63  ;;  %v3714_v47 = vld [vmem:[#allocation8 + $0x2f8] sm:$0xff]  ;;  %v3768_v7 = vld [vmem:[#allocation10 + $0x120] sm:$0xff]  ;;  %v3934_v2 = vld [vmem:[#allocation10 + $0x8] sm:$0xff] }
  0x35   :  { %372 = vmatpush.msra.mxu0 %v3654_v48  ;;  %392 = vmatpush.msra.mxu1 %v3656_v49  ;;  %6327 = vst [vmem:[#allocation37_spill] sm:$0xff] %v3702_v0  ;;  %v3732_v23 = vld [vmem:[#allocation7] sm:$0x7] }
  0x36   :  { %412 = vmatpush.msra.mxu2 %v3658_v50  ;;  %432 = vmatpush.msra.mxu3 %v3662_v51  ;;  %6328 = vst [vmem:[#allocation38_spill] sm:$0xff] %v3704_v5  ;;  %v3712_v51 = vld [vmem:[#allocation8 + $0x2f0] sm:$0xff]  ;;  %v3748_v11 = vld [vmem:[#allocation8 + $0x298] sm:$0xff] }
  0x37   :  { %373 = vmatpush.msra.mxu0 %v3666_v52  ;;  %393 = vmatpush.msra.mxu1 %v3668_v53  ;;  %6331 = vst [vmem:[#allocation41_spill] sm:$0xff] %v3712_v51 }
  0x38   :  { %413 = vmatpush.msra.mxu2 %v3670_v54  ;;  %433 = vmatpush.msra.mxu3 %v3674_v55  ;;  %v3710_v55 = vld [vmem:[#allocation8 + $0x18] sm:$0xff]  ;;  %6332 = vst [vmem:[#allocation42_spill] sm:$0xff] %v3714_v47 }
  0x39   :  { %374 = vmatpush.msra.mxu0 %v3678_v56  ;;  %394 = vmatpush.msra.mxu1 %v3680_v57  ;;  %6330 = vst [vmem:[#allocation40_spill] sm:$0xff] %v3710_v55 }
  0x3a   :  { %414 = vmatpush.msra.mxu2 %v3682_v58  ;;  %434 = vmatpush.msra.mxu3 %v3686_v59  ;;  %v3706_v59 = vld [vmem:[#allocation8 + $0x10] sm:$0xff]  ;;  %6334 = vst [vmem:[#allocation44_spill] sm:$0xff] %v3722_v39 }
  0x3b   :  { %375 = vmatpush.msra.mxu0 %v3690_v60  ;;  %395 = vmatpush.msra.mxu1 %v3692_v61  ;;  %6329 = vst [vmem:[#allocation39_spill] sm:$0xff] %v3706_v59 }
  0x3c   :  { %415 = vmatpush.msra.mxu2 %v3694_v62  ;;  %435 = vmatpush.msra.mxu3 %v3698_v63  ;;  %v3720_v63 = vld [vmem:[#allocation10 + $0x168] sm:$0xff]  ;;  %6335 = vst [vmem:[#allocation45_spill] sm:$0xff] %v3726_v35 }
  0x3d   :  { %376 = vmatpush.msra.mxu0 %v3702_v0  ;;  %396 = vmatpush.msra.mxu1 %v3704_v5  ;;  %6333 = vst [vmem:[#allocation43_spill] sm:$0xff] %v3720_v63  ;;  %v3760_v5 = vperm.slane %v3732_v23, 1  ;;  %v3784_v0 = vld [vmem:[#allocation8 + $0x238] sm:$0xff]  ;;  %v3786_v62 = vld [vmem:[#allocation10 + $0x108] sm:$0xff] }
  0x3e   :  { %416 = vmatpush.msra.mxu2 %v3706_v59  ;;  %436 = vmatpush.msra.mxu3 %v3710_v55  ;;  %6336 = vst [vmem:[#allocation46_spill] sm:$0xff] %v3728_v31  ;;  %v3736_v55 = vld [vmem:[#allocation10 + $0x158] sm:$0xff]  ;;  %v3746_v59 = vld [vmem:[#allocation8 + $0x290] sm:$0xff] }
  0x3f   :  { %441 = vmatpush.msrb.mxu0 %v3712_v51  ;;  %461 = vmatpush.msrb.mxu1 %v3714_v47  ;;  %6337 = vst [vmem:[#allocation47_spill] sm:$0xff] %v3730_v27  ;;  %v3750_v47 = vld [vmem:[#allocation10 + $0x138] sm:$0xff] }
  0x40   :  { %481 = vmatpush.msrb.mxu2 %v3720_v63  ;;  %501 = vmatpush.msrb.mxu3 %v3722_v39  ;;  %6338 = vst [vmem:[#allocation48_spill] sm:$0xff] %v3736_v55  ;;  %v3754_v39 = vld [vmem:[#allocation10 + $0x140] sm:$0xff]  ;;  %v3757_v63 = vperm.slane %v3732_v23, 0 }
  0x41   :  { %6339 = vst [vmem:[#allocation49_spill] sm:$0xff] %v3739_v19  ;;  %442 = vmatpush.msrb.mxu0 %v3726_v35  ;;  %462 = vmatpush.msrb.mxu1 %v3728_v31  ;;  %v3764_v31 = vld [vmem:[#allocation8 + $0x260] sm:$0xff]  ;;  %v3766_v35 = vld [vmem:[#allocation8 + $0x268] sm:$0xff] }
  0x42   :  { %6340 = vst [vmem:[#allocation50_spill] sm:$0xff] %v3742_v15  ;;  %482 = vmatpush.msrb.mxu2 %v3730_v27  ;;  %502 = vmatpush.msrb.mxu3 %v3736_v55  ;;  %v3774_v55 = vld [vmem:[#allocation10 + $0x128] sm:$0xff] }
  0x43   :  { %6341 = vst [vmem:[#allocation51_spill] sm:$0xff] %v3746_v59  ;;  %443 = vmatpush.msrb.mxu0 %v3746_v59  ;;  %463 = vmatpush.msrb.mxu1 %v3748_v11  ;;  %v3782_v59 = vld [vmem:[#allocation8 + $0x230] sm:$0xff] }
  0x44   :  { %6342 = vst [vmem:[#allocation52_spill] sm:$0xff] %v3748_v11  ;;  %483 = vmatpush.msrb.mxu2 %v3750_v47  ;;  %503 = vmatpush.msrb.mxu3 %v3754_v39 }
  0x45   :  { %6343 = vst [vmem:[#allocation53_spill] sm:$0xff] %v3750_v47  ;;  %444 = vmatpush.msrb.mxu0 %v3764_v31  ;;  %464 = vmatpush.msrb.mxu1 %v3766_v35  ;;  %v3796_v47 = vld [vmem:[#allocation8 + $0x200] sm:$0xff] }
  0x46   :  { %6344 = vst [vmem:[#allocation54_spill] sm:$0xff] %v3754_v39  ;;  %484 = vmatpush.msrb.mxu2 %v3768_v7  ;;  %504 = vmatpush.msrb.mxu3 %v3774_v55  ;;  %v3790_v39 = vld [vmem:[#allocation10 + $0x110] sm:$0xff] }
  0x47   :  { %6345 = vst [vmem:[#allocation55_spill] sm:$0xff] %v3757_v63  ;;  %445 = vmatpush.msrb.mxu0 %v3782_v59  ;;  %465 = vmatpush.msrb.mxu1 %v3784_v0 }
  0x48   :  { %6346 = vst [vmem:[#allocation56_spill] sm:$0xff] %v3760_v5  ;;  %485 = vmatpush.msrb.mxu2 %v3786_v62  ;;  %505 = vmatpush.msrb.mxu3 %v3790_v39 }
  0x49   :  { %6347 = vst [vmem:[#allocation57_spill] sm:$0xff] %v3764_v31  ;;  %v3800_v31 = vld [vmem:[#allocation10 + $0xf0] sm:$0xff]  ;;  %446 = vmatpush.msrb.mxu0 %v3796_v47  ;;  %543 = vadd.xlane.f32.xlu0 %v542_v1 }
  0x4a   :  { %6348 = vst [vmem:[#allocation58_spill] sm:$0xff] %v3766_v35  ;;  %v3798_v35 = vld [vmem:[#allocation8 + $0x208] sm:$0xff]  ;;  %486 = vmatpush.msrb.mxu2 %v3800_v31  ;;  %v3951_v1 = vld [vmem:[%s5983_s5] ss:$0 sm:$0xff] }
  0x4b   :  { %6349 = vst [vmem:[#allocation59_spill] sm:$0xff] %v3768_v7  ;;  %466 = vmatpush.msrb.mxu1 %v3798_v35 }
  0x4c   :  { %6350 = vst [vmem:[#allocation60_spill] sm:$0xff] %v3774_v55  ;;  %v3804_v55 = vld [vmem:[#allocation10 + $0xf8] sm:$0xff] }
  0x4d   :  { %6351 = vst [vmem:[#allocation61_spill] sm:$0xff] %v3782_v59  ;;  %506 = vmatpush.msrb.mxu3 %v3804_v55 }
  0x4e   :  { %6352 = vst [vmem:[#allocation62_spill] sm:$0xff] %v3784_v0  ;;  %v3876_v0 = vld [vmem:[#allocation10 + $0x60] sm:$0xff] }
  0x4f   :  { %6353 = vst [vmem:[#allocation63_spill] sm:$0xff] %v3786_v62  ;;  %v3816_v62 = vld [vmem:[#allocation10 + $0xe0] sm:$0xff] }
  0x50   :  { %6354 = vst [vmem:[#allocation64_spill] sm:$0xff] %v3790_v39  ;;  %v3824_v39 = vld [vmem:[#allocation10 + $0xc0] sm:$0xff]  ;;  %507 = vmatpush.msrb.mxu3 %v3816_v62 }
  0x51   :  { %6355 = vst [vmem:[#allocation65_spill] sm:$0xff] %v3796_v47 }
  0x52   :  { %6356 = vst [vmem:[#allocation66_spill] sm:$0xff] %v3798_v35 }
  0x53   :  { %6357 = vst [vmem:[#allocation67_spill] sm:$0xff] %v3800_v31  ;;  %v3834_v31 = vld [vmem:[#allocation8 + $0x178] sm:$0xff] }
  0x54   :  { %6358 = vst [vmem:[#allocation68_spill] sm:$0xff] %v3804_v55  ;;  %v3828_v55 = vld [vmem:[#allocation10 + $0xc8] sm:$0xff] }
  0x55   :  { %6362 = vst [vmem:[#allocation72_spill] sm:$0xff] %v3816_v62  ;;  %508 = vmatpush.msrb.mxu3 %v3828_v55  ;;  %v3844_v62 = vld [vmem:[#allocation8 + $0x140] sm:$0xff] }
  0x56   :  { %6365 = vst [vmem:[#allocation75_spill] sm:$0xff] %v3824_v39 }
  0x57   :  { %6366 = vst [vmem:[#allocation76_spill] sm:$0xff] %v3828_v55  ;;  %v3856_v55 = vld [vmem:[#allocation8 + $0x110] sm:$0xff] }
  0x58   :  { %6368 = vst [vmem:[#allocation78_spill] sm:$0xff] %v3834_v31 }
  0x59   :  { %6371 = vst [vmem:[#allocation81_spill] sm:$0xff] %v3844_v62 }
  0x5a   :  { %6375 = vst [vmem:[#allocation85_spill] sm:$0xff] %v3856_v55 }
  0x5b   :  { %6381 = vst [vmem:[#allocation91_spill] sm:$0xff] %v3876_v0 }
  0x5c   :  { %6398 = vst [vmem:[#allocation108_spill] sm:$0xff] %v3934_v2 }
  0x96   :  { %v3770_v27 = vpop.xlane.xlu0 %305 }
  0x97   :  { %v307_v51 = vmul.f32 %v3770_v27, %v3739_v19  ;;  %v308_v11 = vmul.f32 %v3770_v27, %v3742_v15 }
  0x99   :  { %v310_v19 = vadd.f32 %v307_v51, %v3757_v63  ;;  %v311_v15 = vadd.f32 %v308_v11, %v3760_v5  ;;  %v3808_v11 = vld [vmem:[#allocation8 + $0x1d0] sm:$0xff]  ;;  %v3810_v5 = vld [vmem:[#allocation8 + $0x1d8] sm:$0xff] }
  0x9a   :  { %6359 = vst [vmem:[#allocation69_spill] sm:$0xff] %v3808_v11  ;;  %v3814_v63 = vld [vmem:[#allocation10 + $0xd8] sm:$0xff]  ;;  %447 = vmatpush.msrb.mxu0 %v3808_v11  ;;  %467 = vmatpush.msrb.mxu1 %v3810_v5 }
  0x9b   :  { %v2616_v7 = vmul.f32 -1.442695, %v310_v19  ;;  %v2617_v51 = vmul.f32 -1.442695, %v311_v15  ;;  %6360 = vst [vmem:[#allocation70_spill] sm:$0xff] %v3810_v5  ;;  %v3820_v15 = vld [vmem:[#allocation8 + $0x1a0] sm:$0xff]  ;;  %487 = vmatpush.msrb.mxu2 %v3814_v63 }
  0x9c   :  { %6361 = vst [vmem:[#allocation71_spill] sm:$0xff] %v3814_v63  ;;  %v3822_v19 = vld [vmem:[#allocation8 + $0x1a8] sm:$0xff]  ;;  %448 = vmatpush.msrb.mxu0 %v3820_v15 }
  0x9d   :  { %2665 = vpow2.f32 %v2616_v7  ;;  %6363 = vst [vmem:[#allocation73_spill] sm:$0xff] %v3820_v15  ;;  %468 = vmatpush.msrb.mxu1 %v3822_v19  ;;  %v3832_v7 = vld [vmem:[#allocation8 + $0x170] sm:$0xff]  ;;  %v3836_v5 = vld [vmem:[#allocation10 + $0xa8] sm:$0xff]  ;;  %488 = vmatpush.msrb.mxu2 %v3824_v39  ;;  %v3852_v15 = vld [vmem:[#allocation10 + $0x98] sm:$0xff] }
  0x9e   :  { %6364 = vst [vmem:[#allocation74_spill] sm:$0xff] %v3822_v19  ;;  %2667 = vpow2.f32 %v2617_v51  ;;  %v3840_v51 = vld [vmem:[#allocation10 + $0xb0] sm:$0xff]  ;;  %449 = vmatpush.msrb.mxu0 %v3832_v7  ;;  %v3846_v63 = vld [vmem:[#allocation8 + $0x148] sm:$0xff] }
  0x9f   :  { %6367 = vst [vmem:[#allocation77_spill] sm:$0xff] %v3832_v7  ;;  %469 = vmatpush.msrb.mxu1 %v3834_v31  ;;  %v3848_v19 = vld [vmem:[#allocation10 + $0x90] sm:$0xff]  ;;  %489 = vmatpush.msrb.mxu2 %v3836_v5  ;;  %v3858_v31 = vld [vmem:[#allocation8 + $0x118] sm:$0xff] }
  0xa0   :  { %6369 = vst [vmem:[#allocation79_spill] sm:$0xff] %v3836_v5  ;;  %509 = vmatpush.msrb.mxu3 %v3840_v51  ;;  %450 = vmatpush.msrb.mxu0 %v3844_v62  ;;  %v3860_v7 = vld [vmem:[#allocation10 + $0x78] sm:$0xff]  ;;  %v3868_v5 = vld [vmem:[#allocation8 + $0xe0] sm:$0xff]  ;;  %v3870_v62 = vld [vmem:[#allocation8 + $0xe8] sm:$0xff] }
  0xa1   :  { %6370 = vst [vmem:[#allocation80_spill] sm:$0xff] %v3840_v51  ;;  %470 = vmatpush.msrb.mxu1 %v3846_v63  ;;  %490 = vmatpush.msrb.mxu2 %v3848_v19  ;;  %v3866_v51 = vld [vmem:[#allocation10 + $0x80] sm:$0xff] }
  0xa2   :  { %6372 = vst [vmem:[#allocation82_spill] sm:$0xff] %v3846_v63  ;;  %510 = vmatpush.msrb.mxu3 %v3852_v15  ;;  %451 = vmatpush.msrb.mxu0 %v3856_v55 }
  0xa3   :  { %6373 = vst [vmem:[#allocation83_spill] sm:$0xff] %v3848_v19  ;;  %v2666_v39 = vpop.eup %2665  ;;  %471 = vmatpush.msrb.mxu1 %v3858_v31  ;;  %491 = vmatpush.msrb.mxu2 %v3860_v7  ;;  %v3890_v19 = vld [vmem:[#allocation10 + $0x48] sm:$0xff] }
  0xa4   :  { %6374 = vst [vmem:[#allocation84_spill] sm:$0xff] %v3852_v15  ;;  %v2668_v35 = vpop.eup %2667  ;;  %v3862_v11 = vadd.f32 1.0, %v2666_v39  ;;  %v3878_v39 = vld [vmem:[#allocation10 + $0x68] sm:$0xff]  ;;  %511 = vmatpush.msrb.mxu3 %v3866_v51  ;;  %452 = vmatpush.msrb.mxu0 %v3868_v5  ;;  %v3888_v15 = vld [vmem:[#allocation8 + $0xb8] sm:$0xff] }
  0xa5   :  { %6376 = vst [vmem:[#allocation86_spill] sm:$0xff] %v3858_v31  ;;  %v3872_v63 = vadd.f32 1.0, %v2668_v35  ;;  %472 = vmatpush.msrb.mxu1 %v3870_v62  ;;  %v3886_v35 = vld [vmem:[#allocation8 + $0xb0] sm:$0xff]  ;;  %492 = vmatpush.msrb.mxu2 %v3876_v0  ;;  %v3911_v0 = vld [vmem:[#allocation8 + $0x58] sm:$0xff] }
  0xa6   :  { %6377 = vst [vmem:[#allocation87_spill] sm:$0xff] %v3860_v7  ;;  %2669 = vrcp.f32 %v3862_v11  ;;  %512 = vmatpush.msrb.mxu3 %v3878_v39  ;;  %v3894_v31 = vld [vmem:[#allocation10 + $0x50] sm:$0xff]  ;;  %v3896_v7 = vld [vmem:[#allocation8 + $0x80] sm:$0xff]  ;;  %453 = vmatpush.msrb.mxu0 %v3886_v35  ;;  %vm323_vm3 = vweird.f32 %v3862_v11 }
  0xa7   :  { %6378 = vst [vmem:[#allocation88_spill] sm:$0xff] %v3866_v51  ;;  %2671 = vrcp.f32 %v3872_v63  ;;  %v3898_v51 = vld [vmem:[#allocation8 + $0x88] sm:$0xff]  ;;  %473 = vmatpush.msrb.mxu1 %v3888_v15  ;;  %493 = vmatpush.msrb.mxu2 %v3890_v19  ;;  %vm343_vm7 = vweird.f32 %v3872_v63 }
  0xa8   :  { %6379 = vst [vmem:[#allocation89_spill] sm:$0xff] %v3868_v5  ;;  %v3904_v5 = vld [vmem:[#allocation10 + $0x38] sm:$0xff]  ;;  %513 = vmatpush.msrb.mxu3 %v3894_v31  ;;  %454 = vmatpush.msrb.mxu0 %v3896_v7 }
  0xa9   :  { %6380 = vst [vmem:[#allocation90_spill] sm:$0xff] %v3870_v62  ;;  %v3902_v62 = vld [vmem:[#allocation10 + $0x30] sm:$0xff]  ;;  %474 = vmatpush.msrb.mxu1 %v3898_v51 }
  0xaa   :  { %6382 = vst [vmem:[#allocation92_spill] sm:$0xff] %v3878_v39  ;;  %v3909_v39 = vld [vmem:[#allocation8 + $0x50] sm:$0xff]  ;;  %494 = vmatpush.msrb.mxu2 %v3902_v62  ;;  %514 = vmatpush.msrb.mxu3 %v3904_v5 }
  0xab   :  { %6383 = vst [vmem:[#allocation93_spill] sm:$0xff] %v3886_v35  ;;  %v3915_v35 = vld [vmem:[#allocation10 + $0x18] sm:$0xff]  ;;  %455 = vmatpush.msrb.mxu0 %v3909_v39  ;;  %475 = vmatpush.msrb.mxu1 %v3911_v0 }
  0xac   :  { %6384 = vst [vmem:[#allocation94_spill] sm:$0xff] %v3888_v15  ;;  %v3917_v15 = vld [vmem:[#allocation10 + $0x20] sm:$0xff]  ;;  %v2670_v55 = vpop.eup %2669  ;;  %495 = vmatpush.msrb.mxu2 %v3915_v35 }
  0xad   :  { %6385 = vst [vmem:[#allocation95_spill] sm:$0xff] %v3890_v19  ;;  %v2672_v19 = vpop.eup %2671  ;;  %v319_v47 = vmul.f32 %v2670_v55, %v3862_v11  ;;  %515 = vmatpush.msrb.mxu3 %v3917_v15  ;;  %vm324_vm2 = vweird.f32 %v2670_v55 }
  0xae   :  { %6386 = vst [vmem:[#allocation96_spill] sm:$0xff] %v3894_v31  ;;  %v3922_v31 = vld [vmem:[#allocation8 + $0x20] sm:$0xff]  ;;  %v339_v59 = vmul.f32 %v2672_v19, %v3872_v63  ;;  %vm325_vm4 = vmor %vm323_vm3, %vm324_vm2  ;;  %vm344_vm6 = vweird.f32 %v2672_v19 }
  0xaf   :  { %6387 = vst [vmem:[#allocation97_spill] sm:$0xff] %v3896_v7  ;;  %v3929_v7 = vld [vmem:[#allocation10] sm:$0xff]  ;;  %456 = vmatpush.msrb.mxu0 %v3922_v31  ;;  %516 = vmatpush.msrb.mxu3 %v3934_v2  ;;  %vm345_vm8 = vmor %vm343_vm7, %vm344_vm6 }
  0xb0   :  { %6388 = vst [vmem:[#allocation98_spill] sm:$0xff] %v3898_v51  ;;  %v3927_v51 = vld [vmem:[#allocation8 + $0x28] sm:$0xff]  ;;  %496 = vmatpush.msrb.mxu2 %v3929_v7 }
  0xb1   :  { %6389 = vst [vmem:[#allocation99_spill] sm:$0xff] %v3902_v62  ;;  %v320_v62 = vsub.f32 1.0, %v319_v47  ;;  %476 = vmatpush.msrb.mxu1 %v3927_v51 }
  0xb2   :  { %6390 = vst [vmem:[#allocation100_spill] sm:$0xff] %v3904_v5  ;;  %v3937_v5 = vperm.slane %v3716_v43, 2  ;;  %v3946_v43 = vperm.slane %v3732_v23, 2 }
  0xb3   :  { %6391 = vst [vmem:[#allocation101_spill] sm:$0xff] %v3909_v39  ;;  %v340_v39 = vsub.f32 1.0, %v339_v59  ;;  %v321_v61 = vmul.f32 %v2670_v55, %v320_v62 }
  0xb4   :  { %6392 = vst [vmem:[#allocation102_spill] sm:$0xff] %v3911_v0  ;;  %v329_v0 = vand.u32 2147483648, %v3862_v11  ;;  %v309_v47 = vmul.f32 %v3770_v27, %v3937_v5  ;;  %v347_v27 = vand.u32 2147483647, %v3872_v63 }
  0xb5   :  { %6393 = vst [vmem:[#allocation103_spill] sm:$0xff] %v3915_v35  ;;  %v341_v35 = vmul.f32 %v2672_v19, %v340_v39  ;;  %v322_v59 = vadd.f32 %v2670_v55, %v321_v61 }
  0xb6   :  { %6394 = vst [vmem:[#allocation104_spill] sm:$0xff] %v3917_v15  ;;  %v327_v15 = vand.u32 2147483647, %v3862_v11  ;;  %v330_v62 = vor.u32 1.1754944e-38, %v329_v0  ;;  %v312_v23 = vadd.f32 %v309_v47, %v3946_v43  ;;  %vm348_vm9 = vcmp.eq.f32.partialorder %v347_v27, 8.507059e+37  ;;  %v6437_v27 = vld [vmem:[#allocation28_spill] sm:$0xff] }
  0xb7   :  { %6395 = vst [vmem:[#allocation105_spill] sm:$0xff] %v3922_v31  ;;  %v342_v39 = vadd.f32 %v2672_v19, %v341_v35 }
  0xb8   :  { %6396 = vst [vmem:[#allocation106_spill] sm:$0xff] %v3927_v51  ;;  %vm328_vm5 = vcmp.eq.f32.partialorder %v327_v15, 8.507059e+37  ;;  %v349_v51 = vand.u32 2147483648, %v3872_v63  ;;  %v3973_v63 = vld [vmem:[#allocation10 + $0x148] sm:$0xff] }
  0xb9   :  { %6397 = vst [vmem:[#allocation107_spill] sm:$0xff] %v3929_v7  ;;  %v326_v7 = vsel %vm325_vm4, %v2670_v55, %v322_v59  ;;  %v346_v11 = vsel %vm345_vm8, %v2672_v19, %v342_v39  ;;  %v3963_v59 = vld [vmem:[#allocation10 + $0x178] sm:$0xff] }
  0xba   :  { %6399 = vst [vmem:[#allocation109_spill] sm:$0xff] %v3937_v5  ;;  %v331_v2 = vsel %vm328_vm5, %v330_v62, %v326_v7  ;;  %v350_v5 = vor.u32 1.1754944e-38, %v349_v51  ;;  %v6431_v19 = vld [vmem:[#allocation73_spill] sm:$0xff]  ;;  %v6432_v51 = vld [vmem:[#allocation70_spill] sm:$0xff]  ;;  %v6434_v62 = vld [vmem:[#allocation67_spill] sm:$0xff] }
  0xbb   :  { %6400 = vst [vmem:[#allocation110_spill] sm:$0xff] %v3946_v43  ;;  %v354_v31 = vmul.f32 %v3951_v1, %v331_v2  ;;  %v6433_v2 = vld [vmem:[#allocation27_spill] sm:$0xff]  ;;  %v6435_v39 = vld [vmem:[#allocation77_spill] sm:$0xff] }
  0xbc   :  { %v351_v55 = vsel %vm348_vm9, %v350_v5, %v346_v11  ;;  %v3983_v5 = vld [vmem:[#allocation10 + $0x130] sm:$0xff]  ;;  %v6439_v11 = vld [vmem:[#allocation81_spill] sm:$0xff] }
  0xbd   :  { %v355_v61 = vadd.f32 %v354_v31, %v312_v23  ;;  %v357_v0 = vsub.f32 1.0, %v351_v55  ;;  %v359_v35 = vmul.f32 0.0, %v351_v55  ;;  %v3969_v31 = vld [vmem:[#allocation10 + $0x160] sm:$0xff] }
  0xbe   :  { %v6436_v23 = vld [vmem:[#allocation74_spill] sm:$0xff] }
  0xbf   :  { %2673 = vtanh.f32 %v355_v61  ;;  %v6438_v61 = vld [vmem:[#allocation71_spill] sm:$0xff]  ;;  %v6440_v55 = vld [vmem:[#allocation78_spill] sm:$0xff] }
  0xc5   :  { %v2674_v15 = vpop.eup %2673 }
  0xc6   :  { %v358_v7 = vmul.f32 %v2674_v15, %v357_v0  ;;  %v6441_v0 = vld [vmem:[#allocation29_spill] sm:$0xff]  ;;  %v6442_v15 = vld [vmem:[#allocation75_spill] sm:$0xff] }
  0xc8   :  { %v3961_v47 = vadd.f32 %v359_v35, %v358_v7  ;;  %v6443_v7 = vld [vmem:[#allocation85_spill] sm:$0xff]  ;;  %v6444_v35 = vld [vmem:[#allocation82_spill] sm:$0xff] }
  0xca   :  { %377 = vmatmul.f32.vlgmr.msra.gmra.mxu0 %v3961_v47  ;;  %397 = vmatmul.f32.vlgmr.msra.gmra.mxu1 %v3961_v47 }
  0xcb   :  { %417 = vmatmul.f32.vlgmr.msra.gmra.mxu2 %v3961_v47  ;;  %437 = vmatmul.f32.vlgmr.msra.gmra.mxu3 %v3961_v47 }
  0xcc   :  { %521 = vmatpush.msra.mxu0 %v3963_v59  ;;  %650 = vmatpush.msra.mxu1 %v3521_v3  ;;  %v3441_v3 = vmov 0.0  }
  0xcd   :  { %670 = vmatpush.msra.mxu2 %v3523_v4  ;;  %690 = vmatpush.msra.mxu3 %v3528_v6  ;;  %v3991_v4 = vld [vmem:[#allocation10 + $0x118] sm:$0xff]  ;;  %v3995_v6 = vld [vmem:[#allocation10 + $0x100] sm:$0xff] }
  0xce   :  { %522 = vmatpush.msra.mxu0 %v3969_v31  ;;  %651 = vmatpush.msra.mxu1 %v3532_v8  ;;  %v4001_v8 = vld [vmem:[#allocation10 + $0xe8] sm:$0xff] }
  0xcf   :  { %671 = vmatpush.msra.mxu2 %v3535_v9  ;;  %691 = vmatpush.msra.mxu3 %v3537_v10  ;;  %v4007_v9 = vld [vmem:[#allocation10 + $0xd0] sm:$0xff]  ;;  %v4013_v10 = vld [vmem:[#allocation10 + $0xb8] sm:$0xff] }
  0xd0   :  { %523 = vmatpush.msra.mxu0 %v3973_v63  ;;  %652 = vmatpush.msra.mxu1 %v3543_v12  ;;  %v4019_v12 = vld [vmem:[#allocation10 + $0xa0] sm:$0xff] }
  0xd1   :  { %672 = vmatpush.msra.mxu2 %v3545_v13  ;;  %692 = vmatpush.msra.mxu3 %v3547_v14  ;;  %v4025_v13 = vld [vmem:[#allocation10 + $0x88] sm:$0xff]  ;;  %v4031_v14 = vld [vmem:[#allocation10 + $0x70] sm:$0xff] }
  0xd2   :  { %457 = vmatmul.f32.vlgmr.msrb.gmra.mxu0 %v3961_v47  ;;  %477 = vmatmul.f32.vlgmr.msrb.gmra.mxu1 %v3961_v47 }
  0xd3   :  { %497 = vmatmul.f32.vlgmr.msrb.gmra.mxu2 %v3441_v3  ;;  %517 = vmatmul.f32.vlgmr.msrb.gmra.mxu3 %v3441_v3 }
  0xd4   :  { %524 = vmatpush.msra.mxu0 %v3983_v5  ;;  %653 = vmatpush.msra.mxu1 %v3553_v16  ;;  %v4037_v16 = vld [vmem:[#allocation10 + $0x58] sm:$0xff] }
  0xd5   :  { %673 = vmatpush.msra.mxu2 %v3557_v17  ;;  %693 = vmatpush.msra.mxu3 %v3559_v18  ;;  %v4043_v17 = vld [vmem:[#allocation10 + $0x40] sm:$0xff]  ;;  %v4049_v18 = vld [vmem:[#allocation10 + $0x28] sm:$0xff] }
  0xd6   :  { %525 = vmatpush.msra.mxu0 %v3991_v4  ;;  %654 = vmatpush.msra.mxu1 %v3570_v20  ;;  %v4055_v20 = vld [vmem:[#allocation10 + $0x10] sm:$0xff] }
  0xd7   :  { %674 = vmatpush.msra.mxu2 %v3572_v21  ;;  %694 = vmatpush.msra.mxu3 %v3574_v22  ;;  %v6401_v21 = vld [vmem:[#allocation34_spill] sm:$0xff]  ;;  %v6402_v22 = vld [vmem:[#allocation35_spill] sm:$0xff] }
  0xd8   :  { %526 = vmatpush.msra.mxu0 %v3995_v6  ;;  %655 = vmatpush.msra.mxu1 %v3582_v24  ;;  %v6403_v24 = vld [vmem:[#allocation37_spill] sm:$0xff] }
  0xd9   :  { %675 = vmatpush.msra.mxu2 %v3584_v25  ;;  %695 = vmatpush.msra.mxu3 %v3586_v26  ;;  %v6404_v25 = vld [vmem:[#allocation41_spill] sm:$0xff]  ;;  %v6405_v26 = vld [vmem:[#allocation20_spill] sm:$0xff] }
  0xda   :  { %527 = vmatpush.msra.mxu0 %v4001_v8  ;;  %656 = vmatpush.msra.mxu1 %v3594_v28  ;;  %v6406_v28 = vld [vmem:[#allocation38_spill] sm:$0xff] }
  0xdb   :  { %676 = vmatpush.msra.mxu2 %v3596_v29  ;;  %696 = vmatpush.msra.mxu3 %v3598_v30  ;;  %v6407_v29 = vld [vmem:[#allocation45_spill] sm:$0xff]  ;;  %v6408_v30 = vld [vmem:[#allocation42_spill] sm:$0xff] }
  0xdc   :  { %528 = vmatpush.msra.mxu0 %v4007_v9  ;;  %657 = vmatpush.msra.mxu1 %v3606_v32  ;;  %v6409_v32 = vld [vmem:[#allocation21_spill] sm:$0xff] }
  0xdd   :  { %677 = vmatpush.msra.mxu2 %v3608_v33  ;;  %697 = vmatpush.msra.mxu3 %v3610_v34  ;;  %v6410_v33 = vld [vmem:[#allocation39_spill] sm:$0xff] }
  0xde   :  { %529 = vmatpush.msra.mxu0 %v4013_v10  ;;  %658 = vmatpush.msra.mxu1 %v3618_v36  ;;  %v6411_v34 = vld [vmem:[#allocation51_spill] sm:$0xff]  ;;  %v6412_v36 = vld [vmem:[#allocation46_spill] sm:$0xff] }
  0xdf   :  { %678 = vmatpush.msra.mxu2 %v3620_v37  ;;  %698 = vmatpush.msra.mxu3 %v3622_v38  ;;  %v6413_v37 = vld [vmem:[#allocation22_spill] sm:$0xff]  ;;  %v6414_v38 = vld [vmem:[#allocation43_spill] sm:$0xff] }
  0xe0   :  { %530 = vmatpush.msra.mxu0 %v4019_v12  ;;  %659 = vmatpush.msra.mxu1 %v3630_v40  ;;  %v6415_v40 = vld [vmem:[#allocation57_spill] sm:$0xff] }
  0xe1   :  { %679 = vmatpush.msra.mxu2 %v3632_v41  ;;  %699 = vmatpush.msra.mxu3 %v3634_v42  ;;  %v6416_v41 = vld [vmem:[#allocation52_spill] sm:$0xff]  ;;  %v6417_v42 = vld [vmem:[#allocation23_spill] sm:$0xff] }
  0xe2   :  { %531 = vmatpush.msra.mxu0 %v4025_v13  ;;  %660 = vmatpush.msra.mxu1 %v3642_v44  ;;  %v6418_v44 = vld [vmem:[#allocation47_spill] sm:$0xff] }
  0xe3   :  { %680 = vmatpush.msra.mxu2 %v3644_v45  ;;  %700 = vmatpush.msra.mxu3 %v3646_v46  ;;  %v6419_v45 = vld [vmem:[#allocation61_spill] sm:$0xff]  ;;  %v6420_v46 = vld [vmem:[#allocation58_spill] sm:$0xff] }
  0xe4   :  { %532 = vmatpush.msra.mxu0 %v4031_v14  ;;  %661 = vmatpush.msra.mxu1 %v3654_v48  ;;  %v6421_v48 = vld [vmem:[#allocation24_spill] sm:$0xff] }
  0xe5   :  { %681 = vmatpush.msra.mxu2 %v3656_v49  ;;  %701 = vmatpush.msra.mxu3 %v3658_v50  ;;  %v6422_v49 = vld [vmem:[#allocation53_spill] sm:$0xff] }
  0xe6   :  { %533 = vmatpush.msra.mxu0 %v4037_v16  ;;  %662 = vmatpush.msra.mxu1 %v3666_v52  ;;  %v6423_v50 = vld [vmem:[#allocation65_spill] sm:$0xff]  ;;  %v6424_v52 = vld [vmem:[#allocation62_spill] sm:$0xff] }
  0xe7   :  { %682 = vmatpush.msra.mxu2 %v3668_v53  ;;  %702 = vmatpush.msra.mxu3 %v3670_v54  ;;  %v6425_v53 = vld [vmem:[#allocation25_spill] sm:$0xff]  ;;  %v6426_v54 = vld [vmem:[#allocation59_spill] sm:$0xff] }
  0xe8   :  { %534 = vmatpush.msra.mxu0 %v4043_v17  ;;  %663 = vmatpush.msra.mxu1 %v3678_v56  ;;  %v6427_v56 = vld [vmem:[#allocation69_spill] sm:$0xff] }
  0xe9   :  { %683 = vmatpush.msra.mxu2 %v3680_v57  ;;  %703 = vmatpush.msra.mxu3 %v3682_v58  ;;  %v6428_v57 = vld [vmem:[#allocation66_spill] sm:$0xff] }
  0xea   :  { %535 = vmatpush.msra.mxu0 %v4049_v18  ;;  %664 = vmatpush.msra.mxu1 %v3690_v60  ;;  %v6429_v58 = vld [vmem:[#allocation26_spill] sm:$0xff]  ;;  %v6430_v60 = vld [vmem:[#allocation63_spill] sm:$0xff] }
  0xeb   :  { %684 = vmatpush.msra.mxu2 %v6401_v21  ;;  %704 = vmatpush.msra.mxu3 %v6402_v22  ;;  %v6446_v21 = vld [vmem:[#allocation79_spill] sm:$0xff]  ;;  %v6447_v22 = vld [vmem:[#allocation89_spill] sm:$0xff] }
  0xec   :  { %536 = vmatpush.msra.mxu0 %v4055_v20  ;;  %665 = vmatpush.msra.mxu1 %v6403_v24  ;;  %v6448_v24 = vld [vmem:[#allocation86_spill] sm:$0xff] }
  0xed   :  { %537 = vmatmul.f32.vlgmr.msra.gmra.mxu0 %v3441_v3  ;;  %685 = vmatpush.msra.mxu2 %v6406_v28  ;;  %v6445_v3 = vld [vmem:[#allocation30_spill] sm:$0xff]  ;;  %v6451_v28 = vld [vmem:[#allocation93_spill] sm:$0xff] }
  0xee   :  { %730 = vmatpush.msrb.mxu1 %v6404_v25  ;;  %710 = vmatpush.msrb.mxu0 %v6405_v26  ;;  %v6449_v25 = vld [vmem:[#allocation31_spill] sm:$0xff] }
  0xef   :  { %750 = vmatpush.msrb.mxu2 %v6408_v30  ;;  %705 = vmatpush.msra.mxu3 %v6410_v33  ;;  %v6450_v26 = vld [vmem:[#allocation83_spill] sm:$0xff]  ;;  %v6453_v30 = vld [vmem:[#allocation32_spill] sm:$0xff]  ;;  %v6455_v33 = vld [vmem:[#allocation97_spill] sm:$0xff] }
  0xf0   :  { %731 = vmatpush.msrb.mxu1 %v6407_v29  ;;  %711 = vmatpush.msrb.mxu0 %v6409_v32  ;;  %v6452_v29 = vld [vmem:[#allocation90_spill] sm:$0xff]  ;;  %v6454_v32 = vld [vmem:[#allocation87_spill] sm:$0xff] }
  0xf1   :  { %751 = vmatpush.msrb.mxu2 %v6412_v36  ;;  %770 = vmatpush.msrb.mxu3 %v6414_v38  ;;  %v6457_v36 = vld [vmem:[#allocation33_spill] sm:$0xff] }
  0xf2   :  { %732 = vmatpush.msrb.mxu1 %v6411_v34  ;;  %712 = vmatpush.msrb.mxu0 %v6413_v37  ;;  %v6456_v34 = vld [vmem:[#allocation94_spill] sm:$0xff]  ;;  %v6458_v37 = vld [vmem:[#allocation91_spill] sm:$0xff]  ;;  %v6459_v38 = vld [vmem:[#allocation101_spill] sm:$0xff] }
  0xf3   :  { %752 = vmatpush.msrb.mxu2 %v6416_v41  ;;  %771 = vmatpush.msrb.mxu3 %v6418_v44  ;;  %v6461_v41 = vld [vmem:[#allocation36_spill] sm:$0xff]  ;;  %v6463_v44 = vld [vmem:[#allocation105_spill] sm:$0xff] }
  0xf4   :  { %733 = vmatpush.msrb.mxu1 %v6415_v40  ;;  %713 = vmatpush.msrb.mxu0 %v6417_v42  ;;  %v6460_v40 = vld [vmem:[#allocation98_spill] sm:$0xff]  ;;  %v6462_v42 = vld [vmem:[#allocation95_spill] sm:$0xff] }
  0xf5   :  { %753 = vmatpush.msrb.mxu2 %v6420_v46  ;;  %772 = vmatpush.msrb.mxu3 %v6422_v49  ;;  %v6465_v46 = vld [vmem:[#allocation40_spill] sm:$0xff] }
  0xf6   :  { %734 = vmatpush.msrb.mxu1 %v6419_v45  ;;  %714 = vmatpush.msrb.mxu0 %v6421_v48  ;;  %v6464_v45 = vld [vmem:[#allocation102_spill] sm:$0xff]  ;;  %v6466_v48 = vld [vmem:[#allocation99_spill] sm:$0xff]  ;;  %v6467_v49 = vld [vmem:[#allocation44_spill] sm:$0xff] }
  0xf7   :  { %754 = vmatpush.msrb.mxu2 %v6424_v52  ;;  %773 = vmatpush.msrb.mxu3 %v6426_v54  ;;  %v6469_v52 = vld [vmem:[#allocation103_spill] sm:$0xff] }
  0xf8   :  { %735 = vmatpush.msrb.mxu1 %v6423_v50  ;;  %715 = vmatpush.msrb.mxu0 %v6425_v53  ;;  %v6468_v50 = vld [vmem:[#allocation106_spill] sm:$0xff]  ;;  %v6470_v53 = vld [vmem:[#allocation48_spill] sm:$0xff]  ;;  %v6471_v54 = vld [vmem:[#allocation107_spill] sm:$0xff] }
  0xf9   :  { %755 = vmatpush.msrb.mxu2 %v6428_v57  ;;  %774 = vmatpush.msrb.mxu3 %v6430_v60  ;;  %v6473_v57 = vld [vmem:[#allocation60_spill] sm:$0xff] }
  0xfa   :  { %736 = vmatpush.msrb.mxu1 %v6427_v56  ;;  %716 = vmatpush.msrb.mxu0 %v6429_v58  ;;  %v6472_v56 = vld [vmem:[#allocation54_spill] sm:$0xff]  ;;  %v6474_v58 = vld [vmem:[#allocation64_spill] sm:$0xff] }
  0xfb   :  { %756 = vmatpush.msrb.mxu2 %v6432_v51  ;;  %775 = vmatpush.msrb.mxu3 %v6434_v62  ;;  %v6475_v60 = vld [vmem:[#allocation68_spill] sm:$0xff] }
  0xfc   :  { %737 = vmatpush.msrb.mxu1 %v6431_v19  ;;  %717 = vmatpush.msrb.mxu0 %v6433_v2  ;;  %v6476_v19 = vld [vmem:[#allocation72_spill] sm:$0xff] }
  0xfd   :  { %757 = vmatpush.msrb.mxu2 %v6436_v23  ;;  %776 = vmatpush.msrb.mxu3 %v6438_v61  ;;  %v6477_v51 = vld [vmem:[#allocation76_spill] sm:$0xff] }
  0xfe   :  { %738 = vmatpush.msrb.mxu1 %v6435_v39  ;;  %718 = vmatpush.msrb.mxu0 %v6437_v27  ;;  %v6478_v2 = vld [vmem:[#allocation80_spill] sm:$0xff] }
  0xff   :  { %758 = vmatpush.msrb.mxu2 %v6440_v55  ;;  %777 = vmatpush.msrb.mxu3 %v6442_v15  ;;  %v6479_v62 = vld [vmem:[#allocation84_spill] sm:$0xff]  ;;  %v544_v15 = vpop.xlane.xlu0 %543 }
 0x100   :  { %739 = vmatpush.msrb.mxu1 %v6439_v11  ;;  %719 = vmatpush.msrb.mxu0 %v6441_v0  ;;  %v6480_v39 = vld [vmem:[#allocation88_spill] sm:$0xff] }
 0x101   :  { %759 = vmatpush.msrb.mxu2 %v6444_v35  ;;  %778 = vmatpush.msrb.mxu3 %v6446_v21  ;;  %v6481_v23 = vld [vmem:[#allocation92_spill] sm:$0xff] }
 0x102   :  { %740 = vmatpush.msrb.mxu1 %v6443_v7  ;;  %720 = vmatpush.msrb.mxu0 %v6445_v3  ;;  %v6482_v27 = vld [vmem:[#allocation96_spill] sm:$0xff]  ;;  %v6486_v3 = vld [vmem:[#allocation49_spill] sm:$0xff] }
 0x103   :  { %760 = vmatpush.msrb.mxu2 %v6448_v24  ;;  %779 = vmatpush.msrb.mxu3 %v6450_v26  ;;  %v6483_v61 = vld [vmem:[#allocation100_spill] sm:$0xff]  ;;  %v545_v21 = vmul.f32 %v544_v15, %v6486_v3 }
 0x104   :  { %741 = vmatpush.msrb.mxu1 %v6447_v22  ;;  %721 = vmatpush.msrb.mxu0 %v6449_v25  ;;  %v6484_v55 = vld [vmem:[#allocation104_spill] sm:$0xff]  ;;  %v6487_v25 = vld [vmem:[#allocation50_spill] sm:$0xff] }
 0x105   :  { %761 = vmatpush.msrb.mxu2 %v6452_v29  ;;  %780 = vmatpush.msrb.mxu3 %v6454_v32  ;;  %v6485_v0 = vld [vmem:[#allocation108_spill] sm:$0xff]  ;;  %v546_v26 = vmul.f32 %v544_v15, %v6487_v25 }
 0x106   :  { %742 = vmatpush.msrb.mxu1 %v6451_v28  ;;  %722 = vmatpush.msrb.mxu0 %v6453_v30  ;;  %v6488_v30 = vld [vmem:[#allocation55_spill] sm:$0xff] }
 0x107   :  { %762 = vmatpush.msrb.mxu2 %v6456_v34  ;;  %781 = vmatpush.msrb.mxu3 %v6458_v37  ;;  %v548_v32 = vadd.f32 %v545_v21, %v6488_v30 }
 0x108   :  { %743 = vmatpush.msrb.mxu1 %v6455_v33  ;;  %723 = vmatpush.msrb.mxu0 %v6457_v36  ;;  %v6489_v36 = vld [vmem:[#allocation56_spill] sm:$0xff] }
 0x109   :  { %763 = vmatpush.msrb.mxu2 %v6460_v40  ;;  %782 = vmatpush.msrb.mxu3 %v6462_v42  ;;  %v549_v37 = vadd.f32 %v546_v26, %v6489_v36 }
 0x10a   :  { %744 = vmatpush.msrb.mxu1 %v6459_v38  ;;  %724 = vmatpush.msrb.mxu0 %v6461_v41 }
 0x10b   :  { %764 = vmatpush.msrb.mxu2 %v6464_v45  ;;  %783 = vmatpush.msrb.mxu3 %v6466_v48 }
 0x10c   :  { %745 = vmatpush.msrb.mxu1 %v6463_v44  ;;  %725 = vmatpush.msrb.mxu0 %v6465_v46 }
 0x10d   :  { %765 = vmatpush.msrb.mxu2 %v6468_v50  ;;  %784 = vmatpush.msrb.mxu3 %v6469_v52 }
 0x10e   :  { %790 = vmatpush.msra.mxu0 %v6467_v49 }
 0x10f   :  { %785 = vmatpush.msrb.mxu3 %v6471_v54 }
 0x110   :  { %791 = vmatpush.msra.mxu0 %v6470_v53 }
 0x112   :  { %792 = vmatpush.msra.mxu0 %v6472_v56 }
 0x114   :  { %793 = vmatpush.msra.mxu0 %v6473_v57 }
 0x116   :  { %794 = vmatpush.msra.mxu0 %v6474_v58 }
 0x118   :  { %795 = vmatpush.msra.mxu0 %v6475_v60  ;;  %v4155_v60 = vld [vmem:[%s5982_s4] sm:$0x7] }
 0x11a   :  { %796 = vmatpush.msra.mxu0 %v6476_v19 }
 0x11c   :  { %797 = vmatpush.msra.mxu0 %v6477_v51  ;;  %v4158_v51 = vperm.slane %v4155_v60, 0 }
 0x11e   :  { %798 = vmatpush.msra.mxu0 %v6478_v2  ;;  %6490 = vst [vmem:[#allocation34_spill] sm:$0xff] %v4158_v51  ;;  %v4161_v2 = vperm.slane %v4155_v60, 1 }
 0x120   :  { %799 = vmatpush.msra.mxu0 %v6479_v62  ;;  %6491 = vst [vmem:[#allocation35_spill] sm:$0xff] %v4161_v2 }
 0x122   :  { %800 = vmatpush.msra.mxu0 %v6480_v39 }
 0x124   :  { %801 = vmatpush.msra.mxu0 %v6481_v23 }
 0x126   :  { %802 = vmatpush.msra.mxu0 %v6482_v27 }
 0x128   :  { %803 = vmatpush.msra.mxu0 %v6483_v61 }
 0x12a   :  { %804 = vmatpush.msra.mxu0 %v6484_v55 }
 0x12c   :  { %805 = vmatpush.msra.mxu0 %v6485_v0 }
 0x147   :  { %v378_v41 = vpop.f32.mrf.mxu0  ;;  %v398_v46 = vpop.f32.mrf.mxu1 }
 0x148   :  { %v551_v49 = vadd.f32 %v548_v32, %v378_v41  ;;  %v571_v53 = vadd.f32 %v549_v37, %v398_v46 }
 0x14a   :  { %v2618_v56 = vmul.f32 -1.442695, %v551_v49  ;;  %v2619_v57 = vmul.f32 -1.442695, %v571_v53 }
 0x14c   :  { %2675 = vpow2.f32 %v2618_v56 }
 0x14d   :  { %2677 = vpow2.f32 %v2619_v57  ;;  %v6492_v57 = vld [vmem:[#allocation19_spill] sm:$0xff] }
 0x14e   :  { %v418_v58 = vpop.f32.mrf.mxu2  ;;  %v438_v19 = vpop.f32.mrf.mxu3  ;;  %vm830_vm10 = vcmp.eq.s32.totalorder %v6492_v57, 2 }
 0x14f   :  { %v458_v39 = vpop.f32.mrf.mxu0  ;;  %v599_v21 = vadd.f32 %v438_v19, %v4158_v51 }
 0x150   :  { %v600_v26 = vadd.f32 %v458_v39, %v4161_v2 }
 0x152   :  { %v2676_v62 = vpop.eup %2675 }
 0x153   :  { %v2678_v23 = vpop.eup %2677  ;;  %v555_v27 = vadd.f32 1.0, %v2676_v62  ;;  %v4166_v62 = vld [vmem:[#allocation2] sm:$0xff] }
 0x154   :  { %v575_v61 = vadd.f32 1.0, %v2678_v23  ;;  %6493 = vst [vmem:[#allocation37_spill] sm:$0xff] %v4166_v62  ;;  %v831_v19 = vsel %vm830_vm10, %v4166_v62, 0.0 }
 0x155   :  { %2679 = vrcp.f32 %v555_v27  ;;  %832 = vadd.xlane.f32.xlu1 %v831_v19  ;;  %v567_v2 = vand.u32 2147483648, %v555_v27  ;;  %vm561_vm12 = vweird.f32 %v555_v27 }
 0x156   :  { %2681 = vrcp.f32 %v575_v61  ;;  %v498_v32 = vpop.f32.mrf.mxu2  ;;  %v518_v37 = vpop.f32.mrf.mxu3  ;;  %vm581_vm0 = vweird.f32 %v575_v61 }
 0x157   :  { %v602_v41 = vadd.f32 %v599_v21, %v498_v32  ;;  %v622_v46 = vadd.f32 %v600_v26, %v518_v37  ;;  %v565_v26 = vand.u32 2147483647, %v555_v27  ;;  %v568_v30 = vor.u32 1.1754944e-38, %v567_v2 }
 0x159   :  { %v2620_v49 = vmul.f32 -1.442695, %v602_v41  ;;  %v2621_v53 = vmul.f32 -1.442695, %v622_v46  ;;  %v6494_v46 = vld [vmem:[#allocation109_spill] sm:$0xff]  ;;  %vm566_vm14 = vcmp.eq.f32.partialorder %v565_v26, 8.507059e+37 }
 0x15b   :  { %v2680_v56 = vpop.eup %2679  ;;  %2683 = vpow2.f32 %v2620_v49  ;;  %v547_v49 = vmul.f32 %v544_v15, %v6494_v46  ;;  %v587_v15 = vand.u32 2147483648, %v575_v61 }
 0x15c   :  { %v2682_v36 = vpop.eup %2681  ;;  %v557_v25 = vmul.f32 %v2680_v56, %v555_v27  ;;  %2685 = vpow2.f32 %v2621_v53  ;;  %vm562_vm11 = vweird.f32 %v2680_v56  ;;  %v585_v27 = vand.u32 2147483647, %v575_v61 }
 0x15d   :  { %v577_v23 = vmul.f32 %v2682_v36, %v575_v61  ;;  %vm563_vm13 = vmor %vm561_vm12, %vm562_vm11  ;;  %vm582_vm15 = vweird.f32 %v2682_v36 }
 0x15e   :  { %v558_v39 = vsub.f32 1.0, %v557_v25  ;;  %v591_v25 = vadd.f32 %v3951_v1, %v418_v58  ;;  %vm583_vm1 = vmor %vm581_vm0, %vm582_vm15  ;;  %vm586_vm2 = vcmp.eq.f32.partialorder %v585_v27, 8.507059e+37 }
 0x15f   :  { %v578_v51 = vsub.f32 1.0, %v577_v23 }
 0x160   :  { %v559_v21 = vmul.f32 %v2680_v56, %v558_v39 }
 0x161   :  { %v2684_v32 = vpop.eup %2683  ;;  %v579_v37 = vmul.f32 %v2682_v36, %v578_v51  ;;  %v550_v51 = vadd.f32 %v547_v49, %v3946_v43 }
 0x162   :  { %v2686_v41 = vpop.eup %2685  ;;  %v560_v57 = vadd.f32 %v2680_v56, %v559_v21  ;;  %v606_v53 = vadd.f32 1.0, %v2684_v32 }
 0x163   :  { %v4170_v3 = vadd.f32 1.0, %v2686_v41  ;;  %v580_v19 = vadd.f32 %v2682_v36, %v579_v37 }
 0x164   :  { %v564_v62 = vsel %vm563_vm13, %v2680_v56, %v560_v57  ;;  %2687 = vrcp.f32 %v606_v53  ;;  %v588_v56 = vor.u32 1.1754944e-38, %v587_v15  ;;  %vm612_vm4 = vweird.f32 %v606_v53 }
 0x165   :  { %v569_v23 = vsel %vm566_vm14, %v568_v30, %v564_v62  ;;  %2689 = vrcp.f32 %v4170_v3  ;;  %v584_v21 = vsel %vm583_vm1, %v2682_v36, %v580_v19  ;;  %v4182_v62 = vld [vmem:[%s5985_s7] ss:$0 sm:$0xff]  ;;  %v618_v36 = vand.u32 2147483648, %v606_v53 }
 0x166   :  { %v592_v39 = vmul.f32 %v591_v25, %v569_v23  ;;  %v589_v58 = vsel %vm586_vm2, %v588_v56, %v584_v21  ;;  %v616_v25 = vand.u32 2147483647, %v606_v53  ;;  %v4185_v23 = vperm.slane %v4155_v60, 2  ;;  %v478_v21 = vpop.f32.mrf.mxu1 }
 0x167   :  { %v595_v41 = vsub.f32 1.0, %v589_v58  ;;  %v619_v56 = vor.u32 1.1754944e-38, %v618_v36  ;;  %vm632_vm8 = vweird.f32 %v4170_v3  ;;  %v4207_v36 = vld [vmem:[#allocation8 + $0x2d0] sm:$0xff] }
 0x168   :  { %v593_v2 = vadd.f32 %v592_v39, %v550_v51  ;;  %v597_v39 = vmul.f32 %v589_v58, %v3961_v47  ;;  %vm617_vm6 = vcmp.eq.f32.partialorder %v616_v25, 8.507059e+37  ;;  %v638_v47 = vand.u32 2147483648, %v4170_v3  ;;  %v4220_v25 = vld [vmem:[#allocation8 + $0x2a0] sm:$0xff] }
 0x16a   :  { %v2688_v32 = vpop.eup %2687  ;;  %2691 = vtanh.f32 %v593_v2  ;;  %v538_v37 = vpop.f32.mrf.mxu0 }
 0x16b   :  { %v4175_v57 = vpop.eup %2689  ;;  %v608_v1 = vmul.f32 %v2688_v32, %v606_v53  ;;  %vm613_vm3 = vweird.f32 %v2688_v32  ;;  %v642_v2 = vadd.f32 %v4182_v62, %v538_v37  ;;  %v601_v53 = vadd.f32 %v478_v21, %v4185_v23  ;;  %v4246_v21 = vld [vmem:[#allocation8 + $0x248] sm:$0xff] }
 0x16c   :  { %v628_v30 = vmul.f32 %v4175_v57, %v4170_v3  ;;  %vm614_vm5 = vmor %vm612_vm4, %vm613_vm3  ;;  %vm633_vm7 = vweird.f32 %v4175_v57  ;;  %v4287_v37 = vld [vmem:[#allocation8 + $0x188] sm:$0xff] }
 0x16d   :  { %v609_v61 = vsub.f32 1.0, %v608_v1  ;;  %vm4203_vm9 = vmor %vm632_vm8, %vm633_vm7 }
 0x16e   :  { %v629_v26 = vsub.f32 1.0, %v628_v30 }
 0x16f   :  { %v610_v49 = vmul.f32 %v2688_v32, %v609_v61 }
 0x170   :  { %v2692_v19 = vpop.eup %2691  ;;  %v630_v51 = vmul.f32 %v4175_v57, %v629_v26 }
 0x171   :  { %v596_v15 = vmul.f32 %v2692_v19, %v595_v41  ;;  %v611_v27 = vadd.f32 %v2688_v32, %v610_v49  ;;  %v4213_v49 = vld [vmem:[#allocation8 + $0x2d8] sm:$0xff]  ;;  %v4223_v19 = vld [vmem:[#allocation8 + $0x2a8] sm:$0xff] }
 0x172   :  { %v631_v60 = vadd.f32 %v4175_v57, %v630_v51 }
 0x173   :  { %v4190_v1 = vadd.f32 %v597_v39, %v596_v15  ;;  %v615_v30 = vsel %vm614_vm5, %v2688_v32, %v611_v27  ;;  %v636_v32 = vand.u32 2147483647, %v4170_v3  ;;  %v4216_v3 = vld [vmem:[#allocation8 + $0x2e0] sm:$0xff]  ;;  %v4230_v15 = vld [vmem:[#allocation8 + $0x270] sm:$0xff] }
 0x174   :  { %v620_v61 = vsel %vm617_vm6, %v619_v56, %v615_v30  ;;  %v635_v41 = vsel %vm4203_vm9, %v4175_v57, %v631_v60  ;;  %v4226_v57 = vld [vmem:[#allocation8 + $0x2b0] sm:$0xff]  ;;  %v4236_v39 = vld [vmem:[#allocation8 + $0x280] sm:$0xff]  ;;  %v4256_v60 = vld [vmem:[#allocation8 + $0x218] sm:$0xff] }
 0x175   :  { %v643_v26 = vmul.f32 %v642_v2, %v620_v61  ;;  %666 = vmatmul.f32.vlgmr.msra.gmra.mxu1 %v4190_v1  ;;  %686 = vmatmul.f32.vlgmr.msra.gmra.mxu2 %v4190_v1  ;;  %vm637_vm10 = vcmp.eq.f32.partialorder %v636_v32, 8.507059e+37  ;;  %v4242_v27 = vld [vmem:[#allocation8 + $0x240] sm:$0xff]  ;;  %v4249_v61 = vld [vmem:[#allocation8 + $0x210] sm:$0xff]  ;;  %v4277_v32 = vld [vmem:[#allocation8 + $0x1b8] sm:$0xff] }
 0x176   :  { %706 = vmatmul.f32.vlgmr.msra.gmra.mxu3 %v4190_v1  ;;  %726 = vmatmul.f32.vlgmr.msrb.gmra.mxu0 %v4190_v1 }
 0x177   :  { %v644_v58 = vadd.f32 %v643_v26, %v601_v53  ;;  %810 = vmatpush.msra.mxu1 %v3963_v59  ;;  %939 = vmatpush.msra.mxu2 %v4207_v36  ;;  %v639_v59 = vor.u32 1.1754944e-38, %v638_v47  ;;  %v4261_v53 = vld [vmem:[#allocation8 + $0x1e0] sm:$0xff]  ;;  %v4268_v47 = vld [vmem:[#allocation8 + $0x1e8] sm:$0xff] }
 0x178   :  { %959 = vmatpush.msra.mxu3 %v4213_v49  ;;  %979 = vmatpush.msrb.mxu0 %v4216_v3  ;;  %v4264_v26 = vld [vmem:[#allocation8 + $0x220] sm:$0xff] }
 0x179   :  { %2693 = vtanh.f32 %v644_v58  ;;  %811 = vmatpush.msra.mxu1 %v3969_v31  ;;  %940 = vmatpush.msra.mxu2 %v4220_v25  ;;  %v640_v51 = vsel %vm637_vm10, %v639_v59, %v635_v41  ;;  %v4233_v31 = vld [vmem:[#allocation8 + $0x278] sm:$0xff]  ;;  %v4280_v58 = vld [vmem:[#allocation8 + $0x1f0] sm:$0xff] }
 0x17a   :  { %960 = vmatpush.msra.mxu3 %v4223_v19  ;;  %980 = vmatpush.msrb.mxu0 %v4226_v57  ;;  %v648_v30 = vmul.f32 0.0, %v640_v51  ;;  %v4294_v41 = vld [vmem:[#allocation8 + $0x150] sm:$0xff]  ;;  %v4297_v59 = vld [vmem:[#allocation8 + $0x158] sm:$0xff] }
 0x17b   :  { %812 = vmatpush.msra.mxu1 %v3973_v63  ;;  %941 = vmatpush.msra.mxu2 %v4230_v15  ;;  %v646_v63 = vsub.f32 1.0, %v640_v51  ;;  %v4304_v51 = vld [vmem:[#allocation8 + $0x120] sm:$0xff] }
 0x17c   :  { %961 = vmatpush.msra.mxu3 %v4233_v31  ;;  %981 = vmatpush.msrb.mxu0 %v4236_v39 }
 0x17d   :  { %813 = vmatpush.msra.mxu1 %v3983_v5  ;;  %766 = vmatmul.f32.vlgmr.msrb.gmra.mxu2 %v4190_v1  ;;  %v4252_v5 = vld [vmem:[#allocation8 + $0x250] sm:$0xff] }
 0x17e   :  { %746 = vmatmul.f32.vlgmr.msrb.gmra.mxu1 %v4190_v1  ;;  %942 = vmatpush.msra.mxu2 %v4242_v27 }
 0x17f   :  { %v2694_v2 = vpop.eup %2693  ;;  %814 = vmatpush.msra.mxu1 %v3991_v4  ;;  %962 = vmatpush.msra.mxu3 %v4246_v21 }
 0x180   :  { %v647_v56 = vmul.f32 %v2694_v2, %v646_v63  ;;  %943 = vmatpush.msra.mxu2 %v4249_v61  ;;  %982 = vmatpush.msrb.mxu0 %v4252_v5  ;;  %v4307_v63 = vld [vmem:[#allocation8 + $0x128] sm:$0xff]  ;;  %v4314_v2 = vld [vmem:[#allocation8 + $0xf0] sm:$0xff] }
 0x181   :  { %815 = vmatpush.msra.mxu1 %v3995_v6  ;;  %963 = vmatpush.msra.mxu3 %v4256_v60  ;;  %v4274_v6 = vld [vmem:[#allocation8 + $0x1b0] sm:$0xff]  ;;  %6497 = vst [vmem:[#allocation41_spill] sm:$0xff] %v4307_v63 }
 0x182   :  { %v4259_v4 = vadd.f32 %v648_v30, %v647_v56  ;;  %944 = vmatpush.msra.mxu2 %v4261_v53  ;;  %983 = vmatpush.msrb.mxu0 %v4264_v26  ;;  %v4317_v56 = vld [vmem:[#allocation8 + $0xf8] sm:$0xff]  ;;  %v4324_v30 = vld [vmem:[#allocation8 + $0xc0] sm:$0xff] }
 0x183   :  { %816 = vmatpush.msra.mxu1 %v4001_v8  ;;  %964 = vmatpush.msra.mxu3 %v4268_v47  ;;  %v4284_v8 = vld [vmem:[#allocation8 + $0x180] sm:$0xff]  ;;  %6498 = vst [vmem:[#allocation20_spill] sm:$0xff] %v4317_v56 }
 0x184   :  { %786 = vmatmul.f32.vlgmr.msrb.gmra.mxu3 %v4259_v4  ;;  %806 = vmatmul.f32.vlgmr.msra.gmra.mxu0 %v4259_v4 }
 0x185   :  { %817 = vmatpush.msra.mxu1 %v4007_v9  ;;  %945 = vmatpush.msra.mxu2 %v4274_v6  ;;  %v4290_v9 = vld [vmem:[#allocation8 + $0x1c0] sm:$0xff] }
 0x186   :  { %965 = vmatpush.msra.mxu3 %v4277_v32  ;;  %984 = vmatpush.msrb.mxu0 %v4280_v58 }
 0x187   :  { %818 = vmatpush.msra.mxu1 %v4013_v10  ;;  %946 = vmatpush.msra.mxu2 %v4284_v8  ;;  %v4300_v10 = vld [vmem:[#allocation8 + $0x190] sm:$0xff] }
 0x188   :  { %966 = vmatpush.msra.mxu3 %v4287_v37  ;;  %985 = vmatpush.msrb.mxu0 %v4290_v9 }
 0x189   :  { %819 = vmatpush.msra.mxu1 %v4019_v12  ;;  %947 = vmatpush.msra.mxu2 %v4294_v41  ;;  %v4310_v12 = vld [vmem:[#allocation8 + $0x160] sm:$0xff] }
 0x18a   :  { %967 = vmatpush.msra.mxu3 %v4297_v59  ;;  %986 = vmatpush.msrb.mxu0 %v4300_v10 }
 0x18b   :  { %820 = vmatpush.msra.mxu1 %v4025_v13  ;;  %948 = vmatpush.msra.mxu2 %v4304_v51  ;;  %v4320_v13 = vld [vmem:[#allocation8 + $0x130] sm:$0xff] }
 0x18c   :  { %968 = vmatpush.msra.mxu3 %v4307_v63  ;;  %987 = vmatpush.msrb.mxu0 %v4310_v12  ;;  %6499 = vst [vmem:[#allocation38_spill] sm:$0xff] %v4320_v13  ;;  %v4327_v63 = vld [vmem:[#allocation8 + $0xc8] sm:$0xff] }
 0x18d   :  { %821 = vmatpush.msra.mxu1 %v4031_v14  ;;  %949 = vmatpush.msra.mxu2 %v4314_v2  ;;  %6500 = vst [vmem:[#allocation45_spill] sm:$0xff] %v4327_v63  ;;  %v4330_v14 = vld [vmem:[#allocation8 + $0x100] sm:$0xff] }
 0x18e   :  { %969 = vmatpush.msra.mxu3 %v4317_v56  ;;  %988 = vmatpush.msrb.mxu0 %v4320_v13  ;;  %6501 = vst [vmem:[#allocation42_spill] sm:$0xff] %v4330_v14  ;;  %v4334_v56 = vld [vmem:[#allocation8 + $0x90] sm:$0xff]  ;;  %v4337_v13 = vld [vmem:[#allocation8 + $0x98] sm:$0xff] }
 0x18f   :  { %822 = vmatpush.msra.mxu1 %v4037_v16  ;;  %950 = vmatpush.msra.mxu2 %v4324_v30  ;;  %6502 = vst [vmem:[#allocation21_spill] sm:$0xff] %v4337_v13  ;;  %v4340_v16 = vld [vmem:[#allocation8 + $0xd0] sm:$0xff] }
 0x190   :  { %970 = vmatpush.msra.mxu3 %v4327_v63  ;;  %989 = vmatpush.msrb.mxu0 %v4330_v14  ;;  %v4344_v63 = vld [vmem:[#allocation8 + $0x60] sm:$0xff]  ;;  %v4347_v14 = vld [vmem:[#allocation8 + $0x68] sm:$0xff] }
 0x191   :  { %823 = vmatpush.msra.mxu1 %v4043_v17  ;;  %951 = vmatpush.msra.mxu2 %v4334_v56  ;;  %6503 = vst [vmem:[#allocation39_spill] sm:$0xff] %v4344_v63  ;;  %v4350_v17 = vld [vmem:[#allocation8 + $0xa0] sm:$0xff] }
 0x192   :  { %971 = vmatpush.msra.mxu3 %v4337_v13  ;;  %990 = vmatpush.msrb.mxu0 %v4340_v16  ;;  %6504 = vst [vmem:[#allocation51_spill] sm:$0xff] %v4347_v14  ;;  %v4354_v13 = vld [vmem:[#allocation8 + $0x30] sm:$0xff] }
 0x193   :  { %824 = vmatpush.msra.mxu1 %v4049_v18  ;;  %952 = vmatpush.msra.mxu2 %v4344_v63  ;;  %6505 = vst [vmem:[#allocation46_spill] sm:$0xff] %v4350_v17  ;;  %v4358_v18 = vld [vmem:[#allocation8 + $0x38] sm:$0xff]  ;;  %v4361_v63 = vld [vmem:[#allocation8 + $0x2e8] sm:$0xff] }
 0x194   :  { %972 = vmatpush.msra.mxu3 %v4347_v14  ;;  %991 = vmatpush.msrb.mxu0 %v4350_v17  ;;  %6506 = vst [vmem:[#allocation22_spill] sm:$0xff] %v4354_v13  ;;  %v4364_v14 = vld [vmem:[#allocation8] sm:$0xff]  ;;  %v4367_v17 = vld [vmem:[#allocation8 + $0x2f0] sm:$0xff] }
 0x195   :  { %825 = vmatpush.msra.mxu1 %v4055_v20  ;;  %953 = vmatpush.msra.mxu2 %v4354_v13  ;;  %6507 = vst [vmem:[#allocation43_spill] sm:$0xff] %v4358_v18  ;;  %v4370_v20 = vld [vmem:[#allocation8 + $0x8] sm:$0xff]  ;;  %v4373_v13 = vld [vmem:[#allocation8 + $0x2b8] sm:$0xff] }
 0x196   :  { %826 = vmatmul.f32.vlgmr.msra.gmra.mxu1 %v4259_v4  ;;  %973 = vmatpush.msra.mxu3 %v4358_v18  ;;  %6508 = vst [vmem:[#allocation57_spill] sm:$0xff] %v4361_v63  ;;  %v4376_v18 = vld [vmem:[#allocation8 + $0x2f8] sm:$0xff] }
 0x197   :  { %999 = vmatpush.msrb.mxu1 %v4361_v63  ;;  %6509 = vst [vmem:[#allocation52_spill] sm:$0xff] %v4364_v14  ;;  %954 = vmatpush.msra.mxu2 %v4364_v14  ;;  %v4379_v63 = vld [vmem:[#allocation8 + $0x2c0] sm:$0xff]  ;;  %v4382_v14 = vld [vmem:[#allocation8 + $0x70] sm:$0xff] }
 0x198   :  { %6510 = vst [vmem:[#allocation23_spill] sm:$0xff] %v4367_v17  ;;  %974 = vmatpush.msra.mxu3 %v4370_v20  ;;  %992 = vmatpush.msrb.mxu0 %v4382_v14 }
 0x199   :  { %1019 = vmatpush.msrb.mxu2 %v4367_v17  ;;  %6511 = vst [vmem:[#allocation47_spill] sm:$0xff] %v4370_v20  ;;  %1000 = vmatpush.msrb.mxu1 %v4373_v13  ;;  %v4385_v17 = vld [vmem:[#allocation8 + $0x288] sm:$0xff] }
 0x19a   :  { %6512 = vst [vmem:[#allocation61_spill] sm:$0xff] %v4373_v13  ;;  %1039 = vmatpush.msrb.mxu3 %v4376_v18  ;;  %v4388_v20 = vld [vmem:[#allocation8 + $0x2c8] sm:$0xff]  ;;  %v4391_v13 = vld [vmem:[#allocation8 + $0x290] sm:$0xff] }
 0x19b   :  { %6513 = vst [vmem:[#allocation58_spill] sm:$0xff] %v4376_v18  ;;  %1020 = vmatpush.msrb.mxu2 %v4379_v63  ;;  %1001 = vmatpush.msrb.mxu1 %v4385_v17  ;;  %v4394_v18 = vld [vmem:[#allocation8 + $0x40] sm:$0xff] }
 0x19c   :  { %6514 = vst [vmem:[#allocation24_spill] sm:$0xff] %v4379_v63  ;;  %1040 = vmatpush.msrb.mxu3 %v4388_v20  ;;  %993 = vmatpush.msrb.mxu0 %v4394_v18  ;;  %v4397_v63 = vld [vmem:[#allocation8 + $0x258] sm:$0xff] }
 0x19d   :  { %6515 = vst [vmem:[#allocation53_spill] sm:$0xff] %v4382_v14  ;;  %1021 = vmatpush.msrb.mxu2 %v4391_v13  ;;  %1002 = vmatpush.msrb.mxu1 %v4397_v63  ;;  %v4400_v14 = vld [vmem:[#allocation8 + $0x298] sm:$0xff] }
 0x19e   :  { %6516 = vst [vmem:[#allocation65_spill] sm:$0xff] %v4385_v17  ;;  %1041 = vmatpush.msrb.mxu3 %v4400_v14  ;;  %v4403_v17 = vld [vmem:[#allocation8 + $0x260] sm:$0xff] }
 0x19f   :  { %6517 = vst [vmem:[#allocation62_spill] sm:$0xff] %v4388_v20  ;;  %1022 = vmatpush.msrb.mxu2 %v4403_v17  ;;  %v4406_v20 = vld [vmem:[#allocation8 + $0x10] sm:$0xff] }
 0x1a0   :  { %6518 = vst [vmem:[#allocation25_spill] sm:$0xff] %v4391_v13  ;;  %994 = vmatpush.msrb.mxu0 %v4406_v20  ;;  %v4409_v13 = vld [vmem:[#allocation8 + $0x228] sm:$0xff] }
 0x1a1   :  { %6519 = vst [vmem:[#allocation59_spill] sm:$0xff] %v4394_v18  ;;  %1003 = vmatpush.msrb.mxu1 %v4409_v13  ;;  %v4412_v18 = vld [vmem:[#allocation8 + $0x268] sm:$0xff] }
 0x1a2   :  { %6520 = vst [vmem:[#allocation69_spill] sm:$0xff] %v4397_v63  ;;  %1042 = vmatpush.msrb.mxu3 %v4412_v18  ;;  %v4415_v63 = vld [vmem:[#allocation8 + $0x230] sm:$0xff] }
 0x1a3   :  { %6521 = vst [vmem:[#allocation66_spill] sm:$0xff] %v4400_v14  ;;  %1023 = vmatpush.msrb.mxu2 %v4415_v63  ;;  %v4418_v14 = vld [vmem:[#allocation10 + $0x168] sm:$0xff] }
 0x1a4   :  { %6522 = vst [vmem:[#allocation26_spill] sm:$0xff] %v4403_v17  ;;  %1059 = vmatpush.msra.mxu0 %v4418_v14  ;;  %v4421_v17 = vld [vmem:[#allocation8 + $0x1f8] sm:$0xff] }
 0x1a5   :  { %6523 = vst [vmem:[#allocation63_spill] sm:$0xff] %v4406_v20  ;;  %1004 = vmatpush.msrb.mxu1 %v4421_v17  ;;  %v4424_v20 = vld [vmem:[#allocation8 + $0x238] sm:$0xff] }
 0x1a6   :  { %6524 = vst [vmem:[#allocation73_spill] sm:$0xff] %v4409_v13  ;;  %1043 = vmatpush.msrb.mxu3 %v4424_v20  ;;  %v4427_v13 = vld [vmem:[#allocation8 + $0x200] sm:$0xff] }
 0x1a7   :  { %6525 = vst [vmem:[#allocation70_spill] sm:$0xff] %v4412_v18  ;;  %1024 = vmatpush.msrb.mxu2 %v4427_v13  ;;  %v4430_v18 = vld [vmem:[#allocation10 + $0x150] sm:$0xff] }
 0x1a8   :  { %6526 = vst [vmem:[#allocation27_spill] sm:$0xff] %v4415_v63  ;;  %1060 = vmatpush.msra.mxu0 %v4430_v18  ;;  %v4433_v63 = vld [vmem:[#allocation8 + $0x1c8] sm:$0xff] }
 0x1a9   :  { %6527 = vst [vmem:[#allocation67_spill] sm:$0xff] %v4418_v14  ;;  %1005 = vmatpush.msrb.mxu1 %v4433_v63  ;;  %v4436_v14 = vld [vmem:[#allocation8 + $0x208] sm:$0xff] }
 0x1aa   :  { %6528 = vst [vmem:[#allocation77_spill] sm:$0xff] %v4421_v17  ;;  %1044 = vmatpush.msrb.mxu3 %v4436_v14  ;;  %v4439_v17 = vld [vmem:[#allocation8 + $0x1d0] sm:$0xff] }
 0x1ab   :  { %6529 = vst [vmem:[#allocation74_spill] sm:$0xff] %v4424_v20  ;;  %1025 = vmatpush.msrb.mxu2 %v4439_v17  ;;  %v4442_v20 = vld [vmem:[#allocation10 + $0x138] sm:$0xff] }
 0x1ac   :  { %6530 = vst [vmem:[#allocation28_spill] sm:$0xff] %v4427_v13  ;;  %1061 = vmatpush.msra.mxu0 %v4442_v20  ;;  %v4445_v13 = vld [vmem:[#allocation8 + $0x198] sm:$0xff] }
 0x1ad   :  { %6531 = vst [vmem:[#allocation71_spill] sm:$0xff] %v4430_v18  ;;  %1006 = vmatpush.msrb.mxu1 %v4445_v13  ;;  %v4448_v18 = vld [vmem:[#allocation8 + $0x1d8] sm:$0xff] }
 0x1ae   :  { %6532 = vst [vmem:[#allocation81_spill] sm:$0xff] %v4433_v63  ;;  %1045 = vmatpush.msrb.mxu3 %v4448_v18  ;;  %v4451_v63 = vld [vmem:[#allocation8 + $0x1a0] sm:$0xff] }
 0x1af   :  { %6533 = vst [vmem:[#allocation78_spill] sm:$0xff] %v4436_v14  ;;  %1026 = vmatpush.msrb.mxu2 %v4451_v63  ;;  %v4454_v14 = vld [vmem:[#allocation10 + $0x120] sm:$0xff] }
 0x1b0   :  { %6534 = vst [vmem:[#allocation29_spill] sm:$0xff] %v4439_v17  ;;  %1062 = vmatpush.msra.mxu0 %v4454_v14  ;;  %v4457_v17 = vld [vmem:[#allocation8 + $0x168] sm:$0xff] }
 0x1b1   :  { %6535 = vst [vmem:[#allocation75_spill] sm:$0xff] %v4442_v20  ;;  %1007 = vmatpush.msrb.mxu1 %v4457_v17  ;;  %v4460_v20 = vld [vmem:[#allocation8 + $0x1a8] sm:$0xff] }
 0x1b2   :  { %6536 = vst [vmem:[#allocation85_spill] sm:$0xff] %v4445_v13  ;;  %1046 = vmatpush.msrb.mxu3 %v4460_v20  ;;  %v4463_v13 = vld [vmem:[#allocation8 + $0x170] sm:$0xff] }
 0x1b3   :  { %6537 = vst [vmem:[#allocation82_spill] sm:$0xff] %v4448_v18  ;;  %1027 = vmatpush.msrb.mxu2 %v4463_v13  ;;  %v4466_v18 = vld [vmem:[#allocation10 + $0x108] sm:$0xff] }
 0x1b4   :  { %6538 = vst [vmem:[#allocation30_spill] sm:$0xff] %v4451_v63  ;;  %1063 = vmatpush.msra.mxu0 %v4466_v18  ;;  %v4469_v63 = vld [vmem:[#allocation8 + $0x138] sm:$0xff] }
 0x1b5   :  { %6539 = vst [vmem:[#allocation79_spill] sm:$0xff] %v4454_v14  ;;  %1008 = vmatpush.msrb.mxu1 %v4469_v63  ;;  %v4472_v14 = vld [vmem:[#allocation8 + $0x178] sm:$0xff]  ;;  %1028 = vmatpush.msrb.mxu2 %v6439_v11  ;;  %v4492_v11 = vld [vmem:[#allocation10 + $0xc0] sm:$0xff] }
 0x1b6   :  { %6540 = vst [vmem:[#allocation89_spill] sm:$0xff] %v4457_v17  ;;  %1047 = vmatpush.msrb.mxu3 %v4472_v14  ;;  %v4476_v17 = vld [vmem:[#allocation10 + $0xf0] sm:$0xff] }
 0x1b7   :  { %6541 = vst [vmem:[#allocation86_spill] sm:$0xff] %v4460_v20  ;;  %1064 = vmatpush.msra.mxu0 %v4476_v17  ;;  %v4479_v20 = vld [vmem:[#allocation8 + $0x108] sm:$0xff]  ;;  %1029 = vmatpush.msrb.mxu2 %v6443_v7 }
 0x1b8   :  { %6542 = vst [vmem:[#allocation31_spill] sm:$0xff] %v4463_v13  ;;  %1009 = vmatpush.msrb.mxu1 %v4479_v20  ;;  %1048 = vmatpush.msrb.mxu3 %v6444_v35  ;;  %v4484_v13 = vld [vmem:[#allocation10 + $0xd8] sm:$0xff]  ;;  %v4500_v7 = vld [vmem:[#allocation10 + $0xa8] sm:$0xff] }
 0x1b9   :  { %6543 = vst [vmem:[#allocation83_spill] sm:$0xff] %v4469_v63  ;;  %1065 = vmatpush.msra.mxu0 %v4484_v13  ;;  %v4487_v63 = vld [vmem:[#allocation8 + $0xd8] sm:$0xff]  ;;  %1030 = vmatpush.msrb.mxu2 %v6447_v22  ;;  %v4508_v22 = vld [vmem:[#allocation10 + $0x90] sm:$0xff] }
 0x1ba   :  { %6544 = vst [vmem:[#allocation93_spill] sm:$0xff] %v4472_v14  ;;  %1010 = vmatpush.msrb.mxu1 %v4487_v63  ;;  %1049 = vmatpush.msrb.mxu3 %v6448_v24  ;;  %v4503_v35 = vld [vmem:[#allocation8 + $0x78] sm:$0xff]  ;;  %v4511_v24 = vld [vmem:[#allocation8 + $0x48] sm:$0xff] }
 0x1bb   :  { %6545 = vst [vmem:[#allocation90_spill] sm:$0xff] %v4479_v20  ;;  %1066 = vmatpush.msra.mxu0 %v4492_v11  ;;  %v4495_v20 = vld [vmem:[#allocation8 + $0xa8] sm:$0xff]  ;;  %1031 = vmatpush.msrb.mxu2 %v6451_v28  ;;  %v4516_v28 = vld [vmem:[#allocation10 + $0x78] sm:$0xff] }
 0x1bc   :  { %6546 = vst [vmem:[#allocation32_spill] sm:$0xff] %v4487_v63  ;;  %1011 = vmatpush.msrb.mxu1 %v4495_v20  ;;  %1050 = vmatpush.msrb.mxu3 %v6452_v29  ;;  %v4519_v29 = vld [vmem:[#allocation8 + $0x18] sm:$0xff] }
 0x1bd   :  { %6547 = vst [vmem:[#allocation87_spill] sm:$0xff] %v4492_v11  ;;  %1067 = vmatpush.msra.mxu0 %v4500_v7  ;;  %1032 = vmatpush.msrb.mxu2 %v6455_v33  ;;  %v4523_v33 = vld [vmem:[#allocation10 + $0x170] sm:$0xff] }
 0x1be   :  { %6548 = vst [vmem:[#allocation97_spill] sm:$0xff] %v4495_v20  ;;  %1012 = vmatpush.msrb.mxu1 %v4503_v35  ;;  %1051 = vmatpush.msrb.mxu3 %v6456_v34  ;;  %v4528_v34 = vld [vmem:[#allocation10 + $0x60] sm:$0xff] }
 0x1bf   :  { %6549 = vst [vmem:[#allocation94_spill] sm:$0xff] %v4500_v7  ;;  %1068 = vmatpush.msra.mxu0 %v4508_v22  ;;  %1033 = vmatpush.msrb.mxu2 %v6459_v38  ;;  %v4531_v38 = vld [vmem:[#allocation10 + $0x158] sm:$0xff] }
 0x1c0   :  { %6550 = vst [vmem:[#allocation33_spill] sm:$0xff] %v4503_v35  ;;  %1013 = vmatpush.msrb.mxu1 %v4511_v24  ;;  %1052 = vmatpush.msrb.mxu3 %v6460_v40  ;;  %v4535_v40 = vld [vmem:[#allocation10 + $0x140] sm:$0xff] }
 0x1c1   :  { %6551 = vst [vmem:[#allocation91_spill] sm:$0xff] %v4508_v22  ;;  %1069 = vmatpush.msra.mxu0 %v4516_v28  ;;  %1034 = vmatpush.msrb.mxu2 %v6463_v44  ;;  %v4543_v44 = vld [vmem:[#allocation10 + $0x110] sm:$0xff] }
 0x1c2   :  { %6552 = vst [vmem:[#allocation101_spill] sm:$0xff] %v4511_v24  ;;  %1014 = vmatpush.msrb.mxu1 %v4519_v29  ;;  %1053 = vmatpush.msrb.mxu3 %v6464_v45  ;;  %v4539_v45 = vld [vmem:[#allocation10 + $0x128] sm:$0xff] }
 0x1c3   :  { %6553 = vst [vmem:[#allocation98_spill] sm:$0xff] %v4516_v28  ;;  %1070 = vmatpush.msra.mxu0 %v4528_v34 }
 0x1c4   :  { %6554 = vst [vmem:[#allocation36_spill] sm:$0xff] %v4519_v29  ;;  %1079 = vmatpush.msra.mxu1 %v4523_v33  ;;  %1054 = vmatpush.msrb.mxu3 %v6468_v50  ;;  %v4547_v50 = vld [vmem:[#allocation10 + $0xf8] sm:$0xff] }
 0x1c5   :  { %6555 = vst [vmem:[#allocation95_spill] sm:$0xff] %v4523_v33  ;;  %1071 = vmatpush.msra.mxu0 %v6462_v42  ;;  %v4550_v42 = vld [vmem:[#allocation10 + $0xe0] sm:$0xff] }
 0x1c6   :  { %6556 = vst [vmem:[#allocation105_spill] sm:$0xff] %v4528_v34  ;;  %1080 = vmatpush.msra.mxu1 %v4531_v38  ;;  %v6572_v33 = vld [vmem:[#allocation50_spill] sm:$0xff] }
 0x1c7   :  { %6557 = vst [vmem:[#allocation102_spill] sm:$0xff] %v4531_v38  ;;  %1072 = vmatpush.msra.mxu0 %v6466_v48  ;;  %v4553_v48 = vld [vmem:[#allocation10 + $0xc8] sm:$0xff] }
 0x1c8   :  { %6558 = vst [vmem:[#allocation40_spill] sm:$0xff] %v4535_v40  ;;  %1081 = vmatpush.msra.mxu1 %v4535_v40 }
 0x1c9   :  { %6559 = vst [vmem:[#allocation99_spill] sm:$0xff] %v4539_v45  ;;  %1073 = vmatpush.msra.mxu0 %v6469_v52  ;;  %v4559_v52 = vld [vmem:[#allocation10 + $0x98] sm:$0xff] }
 0x1ca   :  { %1082 = vmatpush.msra.mxu1 %v4539_v45  ;;  %6560 = vst [vmem:[#allocation44_spill] sm:$0xff] %v4543_v44  ;;  %v4556_v45 = vld [vmem:[#allocation10 + $0xb0] sm:$0xff] }
 0x1cb   :  { %1074 = vmatpush.msra.mxu0 %v6471_v54  ;;  %6561 = vst [vmem:[#allocation106_spill] sm:$0xff] %v4547_v50  ;;  %v4562_v54 = vld [vmem:[#allocation10 + $0x80] sm:$0xff] }
 0x1cc   :  { %1083 = vmatpush.msra.mxu1 %v4543_v44  ;;  %6562 = vst [vmem:[#allocation103_spill] sm:$0xff] %v4550_v42 }
 0x1cd   :  { %6563 = vst [vmem:[#allocation48_spill] sm:$0xff] %v4553_v48 }
 0x1ce   :  { %1084 = vmatpush.msra.mxu1 %v4547_v50  ;;  %6564 = vst [vmem:[#allocation107_spill] sm:$0xff] %v4556_v45  ;;  %v4565_v50 = vld [vmem:[#allocation10 + $0x68] sm:$0xff] }
 0x1cf   :  { %6565 = vst [vmem:[#allocation54_spill] sm:$0xff] %v4559_v52 }
 0x1d0   :  { %1085 = vmatpush.msra.mxu1 %v4550_v42  ;;  %6566 = vst [vmem:[#allocation60_spill] sm:$0xff] %v4562_v54  ;;  %v4568_v42 = vld [vmem:[#allocation10 + $0x50] sm:$0xff] }
 0x1d1   :  { %6567 = vst [vmem:[#allocation64_spill] sm:$0xff] %v4565_v50 }
 0x1d2   :  { %1086 = vmatpush.msra.mxu1 %v4553_v48  ;;  %6568 = vst [vmem:[#allocation68_spill] sm:$0xff] %v4568_v42  ;;  %v4571_v48 = vld [vmem:[#allocation10 + $0x38] sm:$0xff] }
 0x1d3   :  { %6569 = vst [vmem:[#allocation72_spill] sm:$0xff] %v4571_v48 }
 0x1d4   :  { %1087 = vmatpush.msra.mxu1 %v4556_v45  ;;  %v6570_v45 = vld [vmem:[#allocation49_spill] sm:$0xff] }
 0x1d6   :  { %1088 = vmatpush.msra.mxu1 %v4559_v52  ;;  %v833_v52 = vpop.xlane.xlu1 %832 }
 0x1d7   :  { %v834_v44 = vmul.f32 %v833_v52, %v6570_v45  ;;  %v6574_v45 = vld [vmem:[#allocation35_spill] sm:$0xff] }
 0x1d8   :  { %1089 = vmatpush.msra.mxu1 %v4562_v54  ;;  %v6571_v54 = vld [vmem:[#allocation55_spill] sm:$0xff] }
 0x1d9   :  { %v837_v40 = vadd.f32 %v834_v44, %v6571_v54 }
 0x1da   :  { %1090 = vmatpush.msra.mxu1 %v4565_v50  ;;  %v835_v50 = vmul.f32 %v833_v52, %v6572_v33 }
 0x1dc   :  { %1091 = vmatpush.msra.mxu1 %v4568_v42  ;;  %v6573_v42 = vld [vmem:[#allocation56_spill] sm:$0xff] }
 0x1dd   :  { %v838_v24 = vadd.f32 %v835_v50, %v6573_v42 }
 0x1de   :  { %1092 = vmatpush.msra.mxu1 %v4571_v48 }
 0x1e0   :  { %1093 = vmatpush.msra.mxu1 %v6484_v55 }
 0x1e2   :  { %1094 = vmatpush.msra.mxu1 %v6485_v0 }
 0x1f2   :  { %v667_v38 = vpop.f32.mrf.mxu1 }
 0x1f3   :  { %v840_v29 = vadd.f32 %v837_v40, %v667_v38  ;;  %v727_v35 = vpop.f32.mrf.mxu0  ;;  %v6575_v40 = vld [vmem:[#allocation34_spill] sm:$0xff] }
 0x1f4   :  { %v888_v50 = vadd.f32 %v727_v35, %v6575_v40 }
 0x1f5   :  { %v2622_v34 = vmul.f32 -1.442695, %v840_v29 }
 0x1f7   :  { %2695 = vpow2.f32 %v2622_v34 }
 0x1f8   :  { %v687_v28 = vpop.f32.mrf.mxu2 }
 0x1f9   :  { %v860_v48 = vadd.f32 %v838_v24, %v687_v28  ;;  %v707_v7 = vpop.f32.mrf.mxu3 }
 0x1fb   :  { %v2623_v22 = vmul.f32 -1.442695, %v860_v48  ;;  %v747_v0 = vpop.f32.mrf.mxu1 }
 0x1fc   :  { %v889_v44 = vadd.f32 %v747_v0, %v6574_v45  ;;  %v6577_v45 = vld [vmem:[#allocation37_spill] sm:$0xff] }
 0x1fd   :  { %v2696_v55 = vpop.eup %2695  ;;  %2697 = vpow2.f32 %v2623_v22 }
 0x1fe   :  { %v844_v20 = vadd.f32 1.0, %v2696_v55 }
 0x200   :  { %2699 = vrcp.f32 %v844_v20  ;;  %v856_v48 = vand.u32 2147483648, %v844_v20  ;;  %v854_v14 = vand.u32 2147483647, %v844_v20  ;;  %vm850_vm13 = vweird.f32 %v844_v20 }
 0x201   :  { %v807_v54 = vpop.f32.mrf.mxu0 }
 0x202   :  { %v911_v63 = vadd.f32 %v889_v44, %v807_v54  ;;  %v836_v54 = vmul.f32 %v833_v52, %v6494_v46  ;;  %vm855_vm15 = vcmp.eq.f32.partialorder %v854_v14, 8.507059e+37  ;;  %v4590_v52 = vld [vmem:[%s5983_s5] ss:$0 sm:$0xff] }
 0x203   :  { %v2698_v33 = vpop.eup %2697 }
 0x204   :  { %v864_v38 = vadd.f32 1.0, %v2698_v33  ;;  %v2625_v29 = vmul.f32 -1.442695, %v911_v63  ;;  %v6576_v33 = vld [vmem:[#allocation19_spill] sm:$0xff] }
 0x205   :  { %vm1119_vm12 = vcmp.eq.s32.totalorder %v6576_v33, 3 }
 0x206   :  { %v2700_v34 = vpop.eup %2699  ;;  %2701 = vrcp.f32 %v864_v38  ;;  %vm870_vm1 = vweird.f32 %v864_v38 }
 0x207   :  { %v846_v42 = vmul.f32 %v2700_v34, %v844_v20  ;;  %2703 = vpow2.f32 %v2625_v29  ;;  %v787_v24 = vpop.f32.mrf.mxu3  ;;  %vm851_vm11 = vweird.f32 %v2700_v34  ;;  %v1120_v29 = vsel %vm1119_vm12, %v6577_v45, 0.0 }
 0x208   :  { %v891_v28 = vadd.f32 %v888_v50, %v787_v24  ;;  %vm852_vm14 = vmor %vm850_vm13, %vm851_vm11  ;;  %v857_v50 = vor.u32 1.1754944e-38, %v856_v48  ;;  %1121 = vadd.xlane.f32.xlu1 %v1120_v29  ;;  %v876_v20 = vand.u32 2147483648, %v864_v38  ;;  %vm1408_vm12 = vcmp.eq.s32.totalorder %v6576_v33, 4 }
 0x209   :  { %v847_v22 = vsub.f32 1.0, %v846_v42 }
 0x20a   :  { %v2624_v55 = vmul.f32 -1.442695, %v891_v28  ;;  %v877_v29 = vor.u32 1.1754944e-38, %v876_v20 }
 0x20b   :  { %v848_v11 = vmul.f32 %v2700_v34, %v847_v22  ;;  %v880_v22 = vadd.f32 %v4590_v52, %v707_v7 }
 0x20c   :  { %v2702_v0 = vpop.eup %2701  ;;  %2705 = vpow2.f32 %v2624_v55 }
 0x20d   :  { %v2704_v63 = vpop.eup %2703  ;;  %v866_v44 = vmul.f32 %v2702_v0, %v864_v38  ;;  %v849_v35 = vadd.f32 %v2700_v34, %v848_v11  ;;  %v839_v11 = vadd.f32 %v836_v54, %v3946_v43  ;;  %vm871_vm0 = vweird.f32 %v2702_v0 }
 0x20e   :  { %v4585_v42 = vadd.f32 1.0, %v2704_v63  ;;  %vm872_vm2 = vmor %vm870_vm1, %vm871_vm0 }
 0x20f   :  { %v867_v24 = vsub.f32 1.0, %v866_v44  ;;  %v853_v28 = vsel %vm852_vm14, %v2700_v34, %v849_v35  ;;  %v874_v44 = vand.u32 2147483647, %v864_v38 }
 0x210   :  { %v858_v55 = vsel %vm855_vm15, %v857_v50, %v853_v28  ;;  %2707 = vrcp.f32 %v4585_v42  ;;  %vm921_vm9 = vweird.f32 %v4585_v42 }
 0x211   :  { %v868_v45 = vmul.f32 %v2702_v0, %v867_v24  ;;  %v881_v48 = vmul.f32 %v880_v22, %v858_v55  ;;  %vm875_vm3 = vcmp.eq.f32.partialorder %v874_v44, 8.507059e+37 }
 0x212   :  { %v2706_v63 = vpop.eup %2705 }
 0x213   :  { %v869_v34 = vadd.f32 %v2702_v0, %v868_v45  ;;  %v882_v14 = vadd.f32 %v881_v48, %v839_v11  ;;  %v895_v35 = vadd.f32 1.0, %v2706_v63 }
 0x215   :  { %v873_v46 = vsel %vm872_vm2, %v2702_v0, %v869_v34  ;;  %2709 = vtanh.f32 %v882_v14  ;;  %v907_v48 = vand.u32 2147483648, %v895_v35  ;;  %v905_v63 = vand.u32 2147483647, %v895_v35  ;;  %v4607_v34 = vld [vmem:[#allocation10 + $0x178] sm:$0xff] }
 0x216   :  { %2711 = vrcp.f32 %v895_v35  ;;  %v4595_v7 = vpop.eup %2707  ;;  %v878_v54 = vsel %vm875_vm3, %v877_v29, %v873_v46  ;;  %vm901_vm5 = vweird.f32 %v895_v35  ;;  %v767_v29 = vpop.f32.mrf.mxu2 }
 0x217   :  { %v884_v50 = vsub.f32 1.0, %v878_v54  ;;  %v917_v24 = vmul.f32 %v4595_v7, %v4585_v42  ;;  %v886_v38 = vmul.f32 %v878_v54, %v4190_v1  ;;  %v827_v1 = vpop.f32.mrf.mxu1  ;;  %v908_v54 = vor.u32 1.1754944e-38, %v907_v48  ;;  %v6592_v48 = vld [vmem:[#allocation43_spill] sm:$0xff] }
 0x218   :  { %vm906_vm7 = vcmp.eq.f32.partialorder %v905_v63, 8.507059e+37  ;;  %vm922_vm8 = vweird.f32 %v4595_v7  ;;  %v6594_v63 = vld [vmem:[#allocation59_spill] sm:$0xff] }
 0x219   :  { %v918_v20 = vsub.f32 1.0, %v917_v24  ;;  %vm923_vm10 = vmor %vm921_vm9, %vm922_vm8 }
 0x21b   :  { %v2710_v28 = vpop.eup %2709  ;;  %v919_v44 = vmul.f32 %v4595_v7, %v918_v20  ;;  %v6590_v20 = vld [vmem:[#allocation23_spill] sm:$0xff] }
 0x21c   :  { %v2712_v22 = vpop.eup %2711  ;;  %v885_v55 = vmul.f32 %v2710_v28, %v884_v50  ;;  %v4613_v50 = vld [vmem:[#allocation10 + $0x160] sm:$0xff]  ;;  %v931_v28 = vadd.f32 %v4182_v62, %v827_v1  ;;  %v927_v62 = vand.u32 2147483648, %v4585_v42  ;;  %v6596_v1 = vld [vmem:[#allocation47_spill] sm:$0xff] }
 0x21d   :  { %v897_v11 = vmul.f32 %v2712_v22, %v895_v35  ;;  %vm902_vm4 = vweird.f32 %v2712_v22 }
 0x21e   :  { %v4600_v45 = vadd.f32 %v886_v38, %v885_v55  ;;  %vm903_vm6 = vmor %vm901_vm5, %vm902_vm4  ;;  %v6586_v55 = vld [vmem:[#allocation22_spill] sm:$0xff]  ;;  %v6588_v38 = vld [vmem:[#allocation53_spill] sm:$0xff] }
 0x21f   :  { %v898_v0 = vsub.f32 1.0, %v897_v11  ;;  %v6589_v11 = vld [vmem:[#allocation52_spill] sm:$0xff] }
 0x220   :  { %955 = vmatmul.f32.vlgmr.msra.gmra.mxu2 %v4600_v45  ;;  %975 = vmatmul.f32.vlgmr.msra.gmra.mxu3 %v4600_v45 }
 0x221   :  { %v899_v46 = vmul.f32 %v2712_v22, %v898_v0  ;;  %995 = vmatmul.f32.vlgmr.msrb.gmra.mxu0 %v4600_v45  ;;  %1015 = vmatmul.f32.vlgmr.msrb.gmra.mxu1 %v4600_v45  ;;  %v6591_v0 = vld [vmem:[#allocation57_spill] sm:$0xff] }
 0x222   :  { %1099 = vmatpush.msra.mxu2 %v4607_v34  ;;  %1228 = vmatpush.msra.mxu3 %v4207_v36 }
 0x223   :  { %v900_v14 = vadd.f32 %v2712_v22, %v899_v46  ;;  %1248 = vmatpush.msrb.mxu0 %v4213_v49  ;;  %1268 = vmatpush.msrb.mxu1 %v4216_v3  ;;  %v4620_v49 = vld [vmem:[#allocation10 + $0x148] sm:$0xff]  ;;  %v920_v3 = vadd.f32 %v4595_v7, %v919_v44  ;;  %v6593_v46 = vld [vmem:[#allocation24_spill] sm:$0xff]  ;;  %v6595_v44 = vld [vmem:[#allocation61_spill] sm:$0xff] }
 0x224   :  { %1100 = vmatpush.msra.mxu2 %v4613_v50  ;;  %1229 = vmatpush.msra.mxu3 %v4220_v25  ;;  %v890_v25 = vadd.f32 %v767_v29, %v4185_v23  ;;  %v6598_v29 = vld [vmem:[#allocation58_spill] sm:$0xff] }
 0x225   :  { %v904_v24 = vsel %vm903_vm6, %v2712_v22, %v900_v14  ;;  %1249 = vmatpush.msrb.mxu0 %v4223_v19  ;;  %1269 = vmatpush.msrb.mxu1 %v4226_v57  ;;  %v4631_v19 = vld [vmem:[#allocation10 + $0x130] sm:$0xff]  ;;  %v925_v57 = vand.u32 2147483647, %v4585_v42  ;;  %v4638_v22 = vld [vmem:[#allocation10 + $0x118] sm:$0xff]  ;;  %v4645_v42 = vld [vmem:[#allocation10 + $0x100] sm:$0xff] }
 0x226   :  { %v909_v36 = vsel %vm906_vm7, %v908_v54, %v904_v24  ;;  %1101 = vmatpush.msra.mxu2 %v4620_v49  ;;  %1230 = vmatpush.msra.mxu3 %v4230_v15  ;;  %v6597_v14 = vld [vmem:[#allocation25_spill] sm:$0xff]  ;;  %v6600_v24 = vld [vmem:[#allocation63_spill] sm:$0xff] }
 0x227   :  { %v932_v35 = vmul.f32 %v931_v28, %v909_v36  ;;  %1250 = vmatpush.msrb.mxu0 %v4233_v31  ;;  %1270 = vmatpush.msrb.mxu1 %v4236_v39  ;;  %v924_v31 = vsel %vm923_vm10, %v4595_v7, %v920_v3  ;;  %v928_v39 = vor.u32 1.1754944e-38, %v927_v62  ;;  %vm926_vm11 = vcmp.eq.f32.partialorder %v925_v57, 8.507059e+37  ;;  %v4651_v7 = vld [vmem:[#allocation10 + $0xe8] sm:$0xff]  ;;  %v6599_v54 = vld [vmem:[#allocation65_spill] sm:$0xff]  ;;  %v6601_v28 = vld [vmem:[#allocation26_spill] sm:$0xff] }
 0x228   :  { %1102 = vmatpush.msra.mxu2 %v4631_v19  ;;  %1055 = vmatmul.f32.vlgmr.msrb.gmra.mxu3 %v4600_v45  ;;  %v6602_v36 = vld [vmem:[#allocation62_spill] sm:$0xff]  ;;  %v6603_v3 = vld [vmem:[#allocation69_spill] sm:$0xff] }
 0x229   :  { %v933_v15 = vadd.f32 %v932_v35, %v890_v25  ;;  %1035 = vmatmul.f32.vlgmr.msrb.gmra.mxu2 %v4600_v45  ;;  %1231 = vmatpush.msra.mxu3 %v4242_v27  ;;  %v929_v27 = vsel %vm926_vm11, %v928_v39, %v924_v31  ;;  %v6604_v25 = vld [vmem:[#allocation67_spill] sm:$0xff]  ;;  %v6606_v62 = vld [vmem:[#allocation66_spill] sm:$0xff]  ;;  %v6607_v57 = vld [vmem:[#allocation73_spill] sm:$0xff] }
 0x22a   :  { %1103 = vmatpush.msra.mxu2 %v4638_v22  ;;  %1251 = vmatpush.msrb.mxu0 %v4246_v21  ;;  %v4657_v21 = vld [vmem:[#allocation10 + $0xd0] sm:$0xff]  ;;  %v6605_v35 = vld [vmem:[#allocation27_spill] sm:$0xff]  ;;  %v6610_v39 = vld [vmem:[#allocation70_spill] sm:$0xff] }
 0x22b   :  { %2713 = vtanh.f32 %v933_v15  ;;  %1232 = vmatpush.msra.mxu3 %v4249_v61  ;;  %1271 = vmatpush.msrb.mxu1 %v4252_v5  ;;  %v935_v61 = vsub.f32 1.0, %v929_v27  ;;  %v6608_v15 = vld [vmem:[#allocation71_spill] sm:$0xff]  ;;  %v6609_v31 = vld [vmem:[#allocation28_spill] sm:$0xff] }
 0x22c   :  { %1104 = vmatpush.msra.mxu2 %v4645_v42  ;;  %1252 = vmatpush.msrb.mxu0 %v4256_v60  ;;  %v4663_v60 = vld [vmem:[#allocation10 + $0xb8] sm:$0xff] }
 0x22d   :  { %1233 = vmatpush.msra.mxu3 %v4261_v53  ;;  %1272 = vmatpush.msrb.mxu1 %v4264_v26  ;;  %v937_v26 = vmul.f32 %v929_v27, %v4259_v4  ;;  %v4680_v4 = vld [vmem:[#allocation10 + $0x88] sm:$0xff]  ;;  %v6611_v27 = vld [vmem:[#allocation77_spill] sm:$0xff] }
 0x22e   :  { %1105 = vmatpush.msra.mxu2 %v4651_v7  ;;  %1253 = vmatpush.msrb.mxu0 %v4268_v47  ;;  %v4670_v47 = vld [vmem:[#allocation10 + $0xa0] sm:$0xff] }
 0x22f   :  { %1234 = vmatpush.msra.mxu3 %v4274_v6  ;;  %1273 = vmatpush.msrb.mxu1 %v4280_v58  ;;  %v6579_v58 = vld [vmem:[#allocation38_spill] sm:$0xff] }
 0x230   :  { %1106 = vmatpush.msra.mxu2 %v4657_v21  ;;  %1254 = vmatpush.msrb.mxu0 %v4277_v32  ;;  %v6578_v32 = vld [vmem:[#allocation41_spill] sm:$0xff] }
 0x231   :  { %v2714_v5 = vpop.eup %2713  ;;  %1235 = vmatpush.msra.mxu3 %v4284_v8  ;;  %1274 = vmatpush.msrb.mxu1 %v4290_v9  ;;  %v4686_v8 = vld [vmem:[#allocation10 + $0x70] sm:$0xff]  ;;  %v6581_v9 = vld [vmem:[#allocation42_spill] sm:$0xff] }
 0x232   :  { %1107 = vmatpush.msra.mxu2 %v4663_v60  ;;  %v936_v53 = vmul.f32 %v2714_v5, %v935_v61  ;;  %1255 = vmatpush.msrb.mxu0 %v4287_v37  ;;  %v6580_v37 = vld [vmem:[#allocation20_spill] sm:$0xff]  ;;  %v6612_v61 = vld [vmem:[#allocation75_spill] sm:$0xff]  ;;  %v6613_v5 = vld [vmem:[#allocation29_spill] sm:$0xff] }
 0x233   :  { %1236 = vmatpush.msra.mxu3 %v4294_v41  ;;  %1275 = vmatpush.msrb.mxu1 %v4300_v10  ;;  %v4692_v41 = vld [vmem:[#allocation10 + $0x58] sm:$0xff]  ;;  %v4698_v10 = vld [vmem:[#allocation10 + $0x40] sm:$0xff] }
 0x234   :  { %1108 = vmatpush.msra.mxu2 %v4670_v47  ;;  %v4673_v6 = vadd.f32 %v937_v26, %v936_v53  ;;  %1256 = vmatpush.msrb.mxu0 %v4297_v59  ;;  %v6582_v59 = vld [vmem:[#allocation45_spill] sm:$0xff]  ;;  %v6614_v53 = vld [vmem:[#allocation74_spill] sm:$0xff] }
 0x235   :  { %1237 = vmatpush.msra.mxu3 %v4304_v51  ;;  %1276 = vmatpush.msrb.mxu1 %v4310_v12  ;;  %v6583_v51 = vld [vmem:[#allocation39_spill] sm:$0xff]  ;;  %v6584_v12 = vld [vmem:[#allocation21_spill] sm:$0xff] }
 0x236   :  { %1075 = vmatmul.f32.vlgmr.msra.gmra.mxu0 %v4673_v6  ;;  %1095 = vmatmul.f32.vlgmr.msra.gmra.mxu1 %v4673_v6  ;;  %v6615_v26 = vld [vmem:[#allocation81_spill] sm:$0xff] }
 0x237   :  { %1109 = vmatpush.msra.mxu2 %v4680_v4  ;;  %1238 = vmatpush.msra.mxu3 %v4314_v2  ;;  %v6585_v2 = vld [vmem:[#allocation46_spill] sm:$0xff] }
 0x238   :  { %1257 = vmatpush.msrb.mxu0 %v6578_v32  ;;  %1277 = vmatpush.msrb.mxu1 %v6579_v58  ;;  %v6616_v32 = vld [vmem:[#allocation79_spill] sm:$0xff]  ;;  %v6617_v58 = vld [vmem:[#allocation30_spill] sm:$0xff] }
 0x239   :  { %1110 = vmatpush.msra.mxu2 %v4686_v8  ;;  %1239 = vmatpush.msra.mxu3 %v4324_v30  ;;  %v4704_v30 = vld [vmem:[#allocation10 + $0x28] sm:$0xff] }
 0x23a   :  { %1258 = vmatpush.msrb.mxu0 %v6580_v37  ;;  %1278 = vmatpush.msrb.mxu1 %v6581_v9  ;;  %v6618_v37 = vld [vmem:[#allocation78_spill] sm:$0xff]  ;;  %v6619_v9 = vld [vmem:[#allocation85_spill] sm:$0xff] }
 0x23b   :  { %1111 = vmatpush.msra.mxu2 %v4692_v41  ;;  %1240 = vmatpush.msra.mxu3 %v4334_v56  ;;  %v6587_v56 = vld [vmem:[#allocation51_spill] sm:$0xff] }
 0x23c   :  { %1259 = vmatpush.msrb.mxu0 %v6582_v59  ;;  %1279 = vmatpush.msrb.mxu1 %v4340_v16  ;;  %v4710_v16 = vld [vmem:[#allocation10 + $0x10] sm:$0xff]  ;;  %v6620_v59 = vld [vmem:[#allocation31_spill] sm:$0xff] }
 0x23d   :  { %1112 = vmatpush.msra.mxu2 %v4698_v10  ;;  %1241 = vmatpush.msra.mxu3 %v6583_v51  ;;  %v6621_v51 = vld [vmem:[#allocation82_spill] sm:$0xff] }
 0x23e   :  { %1260 = vmatpush.msrb.mxu0 %v6584_v12  ;;  %1280 = vmatpush.msrb.mxu1 %v6585_v2  ;;  %v6622_v12 = vld [vmem:[#allocation89_spill] sm:$0xff]  ;;  %v4750_v2 = vld [vmem:[#allocation8 + $0x140] sm:$0xff] }
 0x23f   :  { %1113 = vmatpush.msra.mxu2 %v4704_v30  ;;  %1242 = vmatpush.msra.mxu3 %v6586_v55  ;;  %v6623_v55 = vld [vmem:[#allocation86_spill] sm:$0xff] }
 0x240   :  { %1261 = vmatpush.msrb.mxu0 %v6587_v56  ;;  %1281 = vmatpush.msrb.mxu1 %v6588_v38  ;;  %v6624_v56 = vld [vmem:[#allocation83_spill] sm:$0xff]  ;;  %v4756_v38 = vld [vmem:[#allocation8 + $0x110] sm:$0xff] }
 0x241   :  { %1114 = vmatpush.msra.mxu2 %v4710_v16  ;;  %1243 = vmatpush.msra.mxu3 %v6589_v11  ;;  %v6626_v11 = vld [vmem:[#allocation90_spill] sm:$0xff] }
 0x242   :  { %1115 = vmatmul.f32.vlgmr.msra.gmra.mxu2 %v4673_v6  ;;  %1262 = vmatpush.msrb.mxu0 %v6592_v48  ;;  %v6628_v48 = vld [vmem:[#allocation32_spill] sm:$0xff] }
 0x243   :  { %1308 = vmatpush.msrb.mxu3 %v6590_v20  ;;  %1288 = vmatpush.msrb.mxu2 %v6591_v0  ;;  %v6627_v20 = vld [vmem:[#allocation87_spill] sm:$0xff] }
 0x244   :  { %1282 = vmatpush.msrb.mxu1 %v6594_v63  ;;  %1263 = vmatpush.msrb.mxu0 %v6596_v1  ;;  %v4765_v0 = vld [vmem:[#allocation8 + $0x148] sm:$0xff]  ;;  %v4773_v63 = vld [vmem:[#allocation8 + $0x118] sm:$0xff] }
 0x245   :  { %1309 = vmatpush.msrb.mxu3 %v6593_v46  ;;  %1289 = vmatpush.msrb.mxu2 %v6595_v44  ;;  %v4770_v46 = vld [vmem:[#allocation8 + $0xb0] sm:$0xff]  ;;  %v6630_v44 = vld [vmem:[#allocation97_spill] sm:$0xff]  ;;  %v6631_v1 = vld [vmem:[#allocation91_spill] sm:$0xff] }
 0x246   :  { %1328 = vmatpush.msra.mxu0 %v6598_v29  ;;  %1283 = vmatpush.msrb.mxu1 %v6600_v24  ;;  %v4781_v29 = vld [vmem:[#allocation8 + $0xe8] sm:$0xff]  ;;  %v6633_v24 = vld [vmem:[#allocation98_spill] sm:$0xff] }
 0x247   :  { %1310 = vmatpush.msrb.mxu3 %v6597_v14  ;;  %1290 = vmatpush.msrb.mxu2 %v6599_v54  ;;  %v4778_v14 = vld [vmem:[#allocation8 + $0x80] sm:$0xff]  ;;  %v6632_v54 = vld [vmem:[#allocation33_spill] sm:$0xff] }
 0x248   :  { %1329 = vmatpush.msra.mxu0 %v6602_v36  ;;  %1348 = vmatpush.msra.mxu1 %v6604_v25  ;;  %v4789_v36 = vld [vmem:[#allocation8 + $0xb8] sm:$0xff] }
 0x249   :  { %1311 = vmatpush.msrb.mxu3 %v6601_v28  ;;  %1291 = vmatpush.msrb.mxu2 %v6603_v3  ;;  %v4786_v28 = vld [vmem:[#allocation8 + $0x50] sm:$0xff]  ;;  %v6634_v3 = vld [vmem:[#allocation101_spill] sm:$0xff] }
 0x24a   :  { %1330 = vmatpush.msra.mxu0 %v6606_v62  ;;  %1349 = vmatpush.msra.mxu1 %v6608_v15  ;;  %v6635_v25 = vld [vmem:[#allocation105_spill] sm:$0xff]  ;;  %v4797_v62 = vld [vmem:[#allocation8 + $0x88] sm:$0xff] }
 0x24b   :  { %1312 = vmatpush.msrb.mxu3 %v6605_v35  ;;  %1292 = vmatpush.msrb.mxu2 %v6607_v57  ;;  %v4794_v35 = vld [vmem:[#allocation8 + $0x20] sm:$0xff]  ;;  %v6636_v57 = vld [vmem:[#allocation36_spill] sm:$0xff]  ;;  %v4801_v15 = vld [vmem:[#allocation10 + $0x48] sm:$0xff] }
 0x24c   :  { %1331 = vmatpush.msra.mxu0 %v6610_v39  ;;  %1350 = vmatpush.msra.mxu1 %v6612_v61  ;;  %v4805_v39 = vld [vmem:[#allocation8 + $0x58] sm:$0xff]  ;;  %v6638_v61 = vld [vmem:[#allocation102_spill] sm:$0xff] }
 0x24d   :  { %1313 = vmatpush.msrb.mxu3 %v6609_v31  ;;  %1293 = vmatpush.msrb.mxu2 %v6611_v27  ;;  %v6637_v31 = vld [vmem:[#allocation95_spill] sm:$0xff]  ;;  %v4808_v27 = vld [vmem:[#allocation10 + $0x30] sm:$0xff] }
 0x24e   :  { %1332 = vmatpush.msra.mxu0 %v6614_v53  ;;  %1351 = vmatpush.msra.mxu1 %v6616_v32  ;;  %v4815_v53 = vld [vmem:[#allocation10 + $0x18] sm:$0xff]  ;;  %v4819_v32 = vld [vmem:[#allocation10] sm:$0xff] }
 0x24f   :  { %1314 = vmatpush.msrb.mxu3 %v6613_v5  ;;  %1294 = vmatpush.msrb.mxu2 %v6615_v26  ;;  %v4812_v5 = vld [vmem:[#allocation8 + $0x28] sm:$0xff]  ;;  %v6639_v26 = vld [vmem:[#allocation40_spill] sm:$0xff] }
 0x250   :  { %1333 = vmatpush.msra.mxu0 %v6618_v37  ;;  %1352 = vmatpush.msra.mxu1 %v4466_v18  ;;  %v6625_v18 = vld [vmem:[#allocation93_spill] sm:$0xff]  ;;  %v6641_v37 = vld [vmem:[#allocation44_spill] sm:$0xff] }
 0x251   :  { %1315 = vmatpush.msrb.mxu3 %v6617_v58  ;;  %1295 = vmatpush.msrb.mxu2 %v6619_v9  ;;  %v6640_v58 = vld [vmem:[#allocation99_spill] sm:$0xff]  ;;  %v6642_v9 = vld [vmem:[#allocation106_spill] sm:$0xff] }
 0x252   :  { %1334 = vmatpush.msra.mxu0 %v6621_v51  ;;  %1353 = vmatpush.msra.mxu1 %v4476_v17  ;;  %v4762_v17 = vld [vmem:[#allocation8 + $0xe0] sm:$0xff]  ;;  %v6644_v51 = vld [vmem:[#allocation48_spill] sm:$0xff] }
 0x253   :  { %1316 = vmatpush.msrb.mxu3 %v6620_v59  ;;  %1296 = vmatpush.msrb.mxu2 %v6622_v12  ;;  %v6643_v59 = vld [vmem:[#allocation103_spill] sm:$0xff] }
 0x254   :  { %1335 = vmatpush.msra.mxu0 %v6623_v55  ;;  %1354 = vmatpush.msra.mxu1 %v4484_v13  ;;  %v6629_v13 = vld [vmem:[#allocation94_spill] sm:$0xff]  ;;  %v6645_v12 = vld [vmem:[#allocation107_spill] sm:$0xff] }
 0x255   :  { %1317 = vmatpush.msrb.mxu3 %v4750_v2  ;;  %1297 = vmatpush.msrb.mxu2 %v6624_v56  ;;  %v6646_v55 = vld [vmem:[#allocation54_spill] sm:$0xff]  ;;  %v6647_v56 = vld [vmem:[#allocation60_spill] sm:$0xff] }
 0x256   :  { %1336 = vmatpush.msra.mxu0 %v6625_v18  ;;  %1355 = vmatpush.msra.mxu1 %v6627_v20  ;;  %v6648_v18 = vld [vmem:[#allocation64_spill] sm:$0xff] }
 0x257   :  { %1318 = vmatpush.msrb.mxu3 %v4756_v38  ;;  %1298 = vmatpush.msrb.mxu2 %v6626_v11  ;;  %v6649_v11 = vld [vmem:[#allocation68_spill] sm:$0xff] }
 0x258   :  { %1337 = vmatpush.msra.mxu0 %v4765_v0  ;;  %1356 = vmatpush.msra.mxu1 %v6629_v13  ;;  %v6650_v20 = vld [vmem:[#allocation72_spill] sm:$0xff]  ;;  %v4836_v13 = vld [vmem:[#allocation10 + $0x8] sm:$0xff] }
 0x259   :  { %1319 = vmatpush.msrb.mxu3 %v4762_v17  ;;  %1299 = vmatpush.msrb.mxu2 %v6628_v48  ;;  %v4833_v48 = vld [vmem:[#allocation10 + $0x20] sm:$0xff]  ;;  %6651 = vst [vmem:[#allocation76_spill] sm:$0xff] %v4836_v13 }
 0x25a   :  { %1338 = vmatpush.msra.mxu0 %v4773_v63  ;;  %1357 = vmatpush.msra.mxu1 %v6631_v1  ;;  %v6652_v1 = vld [vmem:[#allocation49_spill] sm:$0xff] }
 0x25b   :  { %1320 = vmatpush.msrb.mxu3 %v4770_v46  ;;  %1300 = vmatpush.msrb.mxu2 %v6630_v44 }
 0x25c   :  { %1339 = vmatpush.msra.mxu0 %v4781_v29  ;;  %1358 = vmatpush.msra.mxu1 %v6633_v24  ;;  %v6653_v24 = vld [vmem:[#allocation50_spill] sm:$0xff] }
 0x25d   :  { %1321 = vmatpush.msrb.mxu3 %v4778_v14  ;;  %1301 = vmatpush.msrb.mxu2 %v6632_v54 }
 0x25e   :  { %1340 = vmatpush.msra.mxu0 %v4789_v36  ;;  %1359 = vmatpush.msra.mxu1 %v6635_v25  ;;  %v6654_v25 = vld [vmem:[#allocation55_spill] sm:$0xff] }
 0x25f   :  { %1322 = vmatpush.msrb.mxu3 %v4786_v28  ;;  %1302 = vmatpush.msrb.mxu2 %v6634_v3 }
 0x260   :  { %1341 = vmatpush.msra.mxu0 %v4797_v62  ;;  %1360 = vmatpush.msra.mxu1 %v4801_v15 }
 0x261   :  { %1323 = vmatpush.msrb.mxu3 %v4794_v35  ;;  %1303 = vmatpush.msrb.mxu2 %v6636_v57 }
 0x262   :  { %1342 = vmatpush.msra.mxu0 %v4805_v39  ;;  %1361 = vmatpush.msra.mxu1 %v4808_v27 }
 0x263   :  { %1368 = vmatpush.msra.mxu2 %v6637_v31  ;;  %v6655_v31 = vld [vmem:[#allocation56_spill] sm:$0xff] }
 0x264   :  { %1343 = vmatpush.msra.mxu0 %v4812_v5  ;;  %1362 = vmatpush.msra.mxu1 %v4815_v53 }
 0x265   :  { %1369 = vmatpush.msra.mxu2 %v6638_v61 }
 0x266   :  { %1363 = vmatpush.msra.mxu1 %v4819_v32 }
 0x267   :  { %1370 = vmatpush.msra.mxu2 %v6639_v26 }
 0x269   :  { %1371 = vmatpush.msra.mxu2 %v6640_v58 }
 0x26b   :  { %1372 = vmatpush.msra.mxu2 %v6641_v37 }
 0x26d   :  { %1373 = vmatpush.msra.mxu2 %v6642_v9 }
 0x26f   :  { %1374 = vmatpush.msra.mxu2 %v6643_v59 }
 0x271   :  { %1375 = vmatpush.msra.mxu2 %v6644_v51 }
 0x273   :  { %1376 = vmatpush.msra.mxu2 %v6645_v12 }
 0x275   :  { %1377 = vmatpush.msra.mxu2 %v6646_v55 }
 0x277   :  { %1378 = vmatpush.msra.mxu2 %v6647_v56 }
 0x279   :  { %1379 = vmatpush.msra.mxu2 %v6648_v18 }
 0x27b   :  { %1380 = vmatpush.msra.mxu2 %v6649_v11  ;;  %v1122_v44 = vpop.xlane.xlu1 %1121 }
 0x27c   :  { %v1123_v54 = vmul.f32 %v1122_v44, %v6652_v1  ;;  %v1124_v3 = vmul.f32 %v1122_v44, %v6653_v24 }
 0x27d   :  { %1381 = vmatpush.msra.mxu2 %v6650_v20 }
 0x27e   :  { %v1126_v57 = vadd.f32 %v1123_v54, %v6654_v25  ;;  %v1127_v61 = vadd.f32 %v1124_v3, %v6655_v31  ;;  %v6656_v3 = vld [vmem:[#allocation35_spill] sm:$0xff] }
 0x27f   :  { %1382 = vmatpush.msra.mxu2 %v4833_v48 }
 0x281   :  { %1383 = vmatpush.msra.mxu2 %v4836_v13 }
 0x29e   :  { %v996_v12 = vpop.f32.mrf.mxu0  ;;  %v1016_v55 = vpop.f32.mrf.mxu1 }
 0x29f   :  { %v1177_v54 = vadd.f32 %v1016_v55, %v6575_v40 }
 0x2a3   :  { %v956_v26 = vpop.f32.mrf.mxu2  ;;  %v976_v58 = vpop.f32.mrf.mxu3 }
 0x2a4   :  { %v1129_v37 = vadd.f32 %v1126_v57, %v956_v26  ;;  %v1149_v9 = vadd.f32 %v1127_v61, %v976_v58 }
 0x2a6   :  { %v2626_v59 = vmul.f32 -1.442695, %v1129_v37  ;;  %v2627_v51 = vmul.f32 -1.442695, %v1149_v9 }
 0x2a8   :  { %2715 = vpow2.f32 %v2626_v59 }
 0x2a9   :  { %2717 = vpow2.f32 %v2627_v51 }
 0x2ac   :  { %v1036_v20 = vpop.f32.mrf.mxu2 }
 0x2ad   :  { %v1178_v25 = vadd.f32 %v1036_v20, %v6656_v3 }
 0x2ae   :  { %v2716_v56 = vpop.eup %2715 }
 0x2af   :  { %v2718_v18 = vpop.eup %2717  ;;  %v1133_v11 = vadd.f32 1.0, %v2716_v56  ;;  %v4846_v56 = vld [vmem:[#allocation2] sm:$0xff] }
 0x2b0   :  { %v1153_v1 = vadd.f32 1.0, %v2718_v18  ;;  %6657 = vst [vmem:[#allocation80_spill] sm:$0xff] %v4846_v56  ;;  %v1409_v18 = vsel %vm1408_vm12, %v4846_v56, 0.0  ;;  %v1169_v56 = vadd.f32 %v4590_v52, %v996_v12 }
 0x2b1   :  { %2719 = vrcp.f32 %v1133_v11  ;;  %1410 = vadd.xlane.f32.xlu2 %v1409_v18  ;;  %v1145_v3 = vand.u32 2147483648, %v1133_v11  ;;  %vm1139_vm14 = vweird.f32 %v1133_v11 }
 0x2b2   :  { %2721 = vrcp.f32 %v1153_v1  ;;  %vm1159_vm2 = vweird.f32 %v1153_v1 }
 0x2b3   :  { %v1076_v31 = vpop.f32.mrf.mxu0  ;;  %v1096_v57 = vpop.f32.mrf.mxu1  ;;  %v1146_v24 = vor.u32 1.1754944e-38, %v1145_v3 }
 0x2b4   :  { %v1180_v61 = vadd.f32 %v1177_v54, %v1076_v31  ;;  %v1200_v26 = vadd.f32 %v1178_v25, %v1096_v57  ;;  %v1143_v25 = vand.u32 2147483647, %v1133_v11 }
 0x2b6   :  { %v2628_v58 = vmul.f32 -1.442695, %v1180_v61  ;;  %v2629_v37 = vmul.f32 -1.442695, %v1200_v26  ;;  %v6658_v61 = vld [vmem:[#allocation109_spill] sm:$0xff]  ;;  %vm1144_vm0 = vcmp.eq.f32.partialorder %v1143_v25, 8.507059e+37 }
 0x2b7   :  { %v2720_v9 = vpop.eup %2719  ;;  %v1125_v26 = vmul.f32 %v1122_v44, %v6658_v61  ;;  %v1165_v44 = vand.u32 2147483648, %v1153_v1 }
 0x2b8   :  { %v2722_v59 = vpop.eup %2721  ;;  %v1135_v51 = vmul.f32 %v2720_v9, %v1133_v11  ;;  %2723 = vpow2.f32 %v2628_v58  ;;  %vm1140_vm13 = vweird.f32 %v2720_v9  ;;  %v1163_v11 = vand.u32 2147483647, %v1153_v1 }
 0x2b9   :  { %v1155_v55 = vmul.f32 %v2722_v59, %v1153_v1  ;;  %2725 = vpow2.f32 %v2629_v37  ;;  %vm1141_vm15 = vmor %vm1139_vm14, %vm1140_vm13  ;;  %vm1160_vm1 = vweird.f32 %v2722_v59 }
 0x2ba   :  { %v1136_v20 = vsub.f32 1.0, %v1135_v51  ;;  %vm1161_vm3 = vmor %vm1159_vm2, %vm1160_vm1  ;;  %vm1164_vm4 = vcmp.eq.f32.partialorder %v1163_v11, 8.507059e+37  ;;  %v1056_v11 = vpop.f32.mrf.mxu3 }
 0x2bb   :  { %v1156_v40 = vsub.f32 1.0, %v1155_v55 }
 0x2bc   :  { %v1137_v31 = vmul.f32 %v2720_v9, %v1136_v20 }
 0x2bd   :  { %v1157_v54 = vmul.f32 %v2722_v59, %v1156_v40  ;;  %v1128_v40 = vadd.f32 %v1125_v26, %v3946_v43 }
 0x2be   :  { %v2724_v57 = vpop.eup %2723  ;;  %v1138_v33 = vadd.f32 %v2720_v9, %v1137_v31 }
 0x2bf   :  { %v2726_v58 = vpop.eup %2725  ;;  %v1184_v13 = vadd.f32 1.0, %v2724_v57  ;;  %v1158_v55 = vadd.f32 %v2722_v59, %v1157_v54 }
 0x2c0   :  { %v1142_v37 = vsel %vm1141_vm15, %v2720_v9, %v1138_v33  ;;  %v4851_v51 = vadd.f32 1.0, %v2726_v58  ;;  %v1166_v33 = vor.u32 1.1754944e-38, %v1165_v44 }
 0x2c1   :  { %v1147_v18 = vsel %vm1144_vm0, %v1146_v24, %v1142_v37  ;;  %2727 = vrcp.f32 %v1184_v13  ;;  %v1162_v31 = vsel %vm1161_vm3, %v2722_v59, %v1158_v55  ;;  %v1196_v26 = vand.u32 2147483648, %v1184_v13 }
 0x2c2   :  { %v1170_v20 = vmul.f32 %v1169_v56, %v1147_v18  ;;  %2729 = vrcp.f32 %v4851_v51  ;;  %v1167_v24 = vsel %vm1164_vm4, %v1166_v33, %v1162_v31  ;;  %v1194_v37 = vand.u32 2147483647, %v1184_v13  ;;  %v4866_v33 = vld [vmem:[%s5985_s7] ss:$0 sm:$0xff] }
 0x2c3   :  { %v1173_v54 = vsub.f32 1.0, %v1167_v24  ;;  %v1175_v18 = vmul.f32 %v1167_v24, %v4600_v45  ;;  %vm1190_vm6 = vweird.f32 %v1184_v13  ;;  %v1179_v24 = vadd.f32 %v1056_v11, %v4185_v23  ;;  %v4923_v11 = vld [vmem:[#allocation8 + $0x248] sm:$0xff] }
 0x2c4   :  { %v1171_v3 = vadd.f32 %v1170_v20, %v1128_v40  ;;  %vm1195_vm8 = vcmp.eq.f32.partialorder %v1194_v37, 8.507059e+37  ;;  %vm1210_vm10 = vweird.f32 %v4851_v51 }
 0x2c5   :  { %v1116_v40 = vpop.f32.mrf.mxu2 }
 0x2c6   :  { %2731 = vtanh.f32 %v1171_v3  ;;  %v1197_v3 = vor.u32 1.1754944e-38, %v1196_v26  ;;  %v4968_v26 = vld [vmem:[#allocation8 + $0x150] sm:$0xff] }
 0x2c7   :  { %v2728_v52 = vpop.eup %2727 }
 0x2c8   :  { %v4855_v12 = vpop.eup %2729  ;;  %v1186_v9 = vmul.f32 %v2728_v52, %v1184_v13  ;;  %vm1191_vm5 = vweird.f32 %v2728_v52 }
 0x2c9   :  { %v1206_v25 = vmul.f32 %v4855_v12, %v4851_v51  ;;  %vm1192_vm7 = vmor %vm1190_vm6, %vm1191_vm5  ;;  %vm1211_vm9 = vweird.f32 %v4855_v12 }
 0x2ca   :  { %v1187_v56 = vsub.f32 1.0, %v1186_v9  ;;  %v1220_v9 = vadd.f32 %v4866_v33, %v1116_v40  ;;  %vm4883_vm11 = vmor %vm1210_vm10, %vm1211_vm9  ;;  %v4913_v40 = vld [vmem:[#allocation8 + $0x280] sm:$0xff] }
 0x2cb   :  { %v1207_v57 = vsub.f32 1.0, %v1206_v25  ;;  %v1216_v25 = vand.u32 2147483648, %v4851_v51 }
 0x2cc   :  { %v2732_v58 = vpop.eup %2731  ;;  %v1188_v1 = vmul.f32 %v2728_v52, %v1187_v56  ;;  %v1214_v56 = vand.u32 2147483647, %v4851_v51  ;;  %v4897_v51 = vld [vmem:[#allocation8 + $0x2a0] sm:$0xff] }
 0x2cd   :  { %v1174_v59 = vmul.f32 %v2732_v58, %v1173_v54  ;;  %v1208_v55 = vmul.f32 %v4855_v12, %v1207_v57  ;;  %v4880_v54 = vld [vmem:[#allocation8 + $0x2d0] sm:$0xff]  ;;  %v4887_v58 = vld [vmem:[#allocation8 + $0x2d8] sm:$0xff]  ;;  %v1217_v37 = vor.u32 1.1754944e-38, %v1216_v25 }
 0x2ce   :  { %v1189_v20 = vadd.f32 %v2728_v52, %v1188_v1  ;;  %v4890_v1 = vld [vmem:[#allocation8 + $0x2e0] sm:$0xff]  ;;  %vm1215_vm12 = vcmp.eq.f32.partialorder %v1214_v56, 8.507059e+37  ;;  %v4952_v25 = vld [vmem:[#allocation8 + $0x1f0] sm:$0xff]  ;;  %v4961_v56 = vld [vmem:[#allocation8 + $0x1b8] sm:$0xff] }
 0x2cf   :  { %v4861_v44 = vadd.f32 %v1175_v18, %v1174_v59  ;;  %v1209_v13 = vadd.f32 %v4855_v12, %v1208_v55  ;;  %v4900_v59 = vld [vmem:[#allocation8 + $0x2a8] sm:$0xff]  ;;  %v4903_v18 = vld [vmem:[#allocation8 + $0x2b0] sm:$0xff]  ;;  %v4910_v55 = vld [vmem:[#allocation8 + $0x278] sm:$0xff] }
 0x2d0   :  { %v1193_v31 = vsel %vm1192_vm7, %v2728_v52, %v1189_v20 }
 0x2d1   :  { %v1198_v45 = vsel %vm1195_vm8, %v1197_v3, %v1193_v31  ;;  %1244 = vmatmul.f32.vlgmr.msra.gmra.mxu3 %v4861_v44  ;;  %1264 = vmatmul.f32.vlgmr.msrb.gmra.mxu0 %v4861_v44  ;;  %v4926_v31 = vld [vmem:[#allocation8 + $0x210] sm:$0xff] }
 0x2d2   :  { %v1221_v52 = vmul.f32 %v1220_v9, %v1198_v45  ;;  %1284 = vmatmul.f32.vlgmr.msrb.gmra.mxu1 %v4861_v44  ;;  %1304 = vmatmul.f32.vlgmr.msrb.gmra.mxu2 %v4861_v44 }
 0x2d3   :  { %1388 = vmatpush.msra.mxu3 %v4607_v34  ;;  %1517 = vmatpush.msrb.mxu0 %v4880_v54  ;;  %v1213_v34 = vsel %vm4883_vm11, %v4855_v12, %v1209_v13  ;;  %v4937_v13 = vld [vmem:[#allocation8 + $0x1e0] sm:$0xff] }
 0x2d4   :  { %v1222_v57 = vadd.f32 %v1221_v52, %v1179_v24  ;;  %1537 = vmatpush.msrb.mxu1 %v4887_v58  ;;  %1557 = vmatpush.msrb.mxu2 %v4890_v1  ;;  %v1218_v12 = vsel %vm1215_vm12, %v1217_v37, %v1213_v34  ;;  %v4940_v24 = vld [vmem:[#allocation8 + $0x220] sm:$0xff]  ;;  %v4971_v34 = vld [vmem:[#allocation8 + $0x188] sm:$0xff] }
 0x2d5   :  { %1389 = vmatpush.msra.mxu3 %v4613_v50  ;;  %1518 = vmatpush.msrb.mxu0 %v4897_v51  ;;  %v4907_v50 = vld [vmem:[#allocation8 + $0x270] sm:$0xff]  ;;  %v1224_v20 = vsub.f32 1.0, %v1218_v12  ;;  %v1226_v45 = vmul.f32 %v1218_v12, %v4673_v6  ;;  %v4978_v37 = vld [vmem:[#allocation8 + $0x120] sm:$0xff]  ;;  %v4981_v12 = vld [vmem:[#allocation8 + $0x158] sm:$0xff] }
 0x2d6   :  { %2733 = vtanh.f32 %v1222_v57  ;;  %1538 = vmatpush.msrb.mxu1 %v4900_v59  ;;  %1558 = vmatpush.msrb.mxu2 %v4903_v18  ;;  %v4949_v6 = vld [vmem:[#allocation8 + $0x1b0] sm:$0xff]  ;;  %v4964_v57 = vld [vmem:[#allocation8 + $0x1c0] sm:$0xff] }
 0x2d7   :  { %1390 = vmatpush.msra.mxu3 %v4620_v49  ;;  %1519 = vmatpush.msrb.mxu0 %v4907_v50  ;;  %v4919_v49 = vld [vmem:[#allocation8 + $0x240] sm:$0xff] }
 0x2d8   :  { %1539 = vmatpush.msrb.mxu1 %v4910_v55  ;;  %1559 = vmatpush.msrb.mxu2 %v4913_v40 }
 0x2d9   :  { %1391 = vmatpush.msra.mxu3 %v4631_v19  ;;  %1344 = vmatmul.f32.vlgmr.msra.gmra.mxu0 %v4861_v44  ;;  %v4929_v19 = vld [vmem:[#allocation8 + $0x250] sm:$0xff] }
 0x2da   :  { %1324 = vmatmul.f32.vlgmr.msrb.gmra.mxu3 %v4861_v44  ;;  %1520 = vmatpush.msrb.mxu0 %v4919_v49 }
 0x2db   :  { %1392 = vmatpush.msra.mxu3 %v4638_v22  ;;  %1540 = vmatpush.msrb.mxu1 %v4923_v11  ;;  %v4934_v22 = vld [vmem:[#allocation8 + $0x218] sm:$0xff] }
 0x2dc   :  { %v2734_v3 = vpop.eup %2733  ;;  %1521 = vmatpush.msrb.mxu0 %v4926_v31  ;;  %1560 = vmatpush.msrb.mxu2 %v4929_v19 }
 0x2dd   :  { %1393 = vmatpush.msra.mxu3 %v4645_v42  ;;  %v1225_v9 = vmul.f32 %v2734_v3, %v1224_v20  ;;  %1541 = vmatpush.msrb.mxu1 %v4934_v22  ;;  %v4946_v42 = vld [vmem:[#allocation8 + $0x1e8] sm:$0xff]  ;;  %v4988_v20 = vld [vmem:[#allocation8 + $0xf0] sm:$0xff] }
 0x2de   :  { %1522 = vmatpush.msrb.mxu0 %v4937_v13  ;;  %1561 = vmatpush.msrb.mxu2 %v4940_v24  ;;  %v4991_v3 = vld [vmem:[#allocation8 + $0x128] sm:$0xff] }
 0x2df   :  { %1394 = vmatpush.msra.mxu3 %v4651_v7  ;;  %v4944_v52 = vadd.f32 %v1226_v45, %v1225_v9  ;;  %1542 = vmatpush.msrb.mxu1 %v4946_v42  ;;  %v4958_v7 = vld [vmem:[#allocation8 + $0x180] sm:$0xff]  ;;  %6661 = vst [vmem:[#allocation84_spill] sm:$0xff] %v4991_v3  ;;  %v5001_v45 = vld [vmem:[#allocation8 + $0xf8] sm:$0xff] }
 0x2e0   :  { %1523 = vmatpush.msrb.mxu0 %v4949_v6  ;;  %1562 = vmatpush.msrb.mxu2 %v4952_v25  ;;  %v4998_v9 = vld [vmem:[#allocation8 + $0xc0] sm:$0xff]  ;;  %6663 = vst [vmem:[#allocation92_spill] sm:$0xff] %v5001_v45 }
 0x2e1   :  { %1364 = vmatmul.f32.vlgmr.msra.gmra.mxu1 %v4944_v52  ;;  %1384 = vmatmul.f32.vlgmr.msra.gmra.mxu2 %v4944_v52 }
 0x2e2   :  { %1395 = vmatpush.msra.mxu3 %v4657_v21  ;;  %1524 = vmatpush.msrb.mxu0 %v4958_v7  ;;  %v4974_v21 = vld [vmem:[#allocation8 + $0x190] sm:$0xff] }
 0x2e3   :  { %1543 = vmatpush.msrb.mxu1 %v4961_v56  ;;  %1563 = vmatpush.msrb.mxu2 %v4964_v57 }
 0x2e4   :  { %1396 = vmatpush.msra.mxu3 %v4663_v60  ;;  %1525 = vmatpush.msrb.mxu0 %v4968_v26  ;;  %v4984_v60 = vld [vmem:[#allocation8 + $0x160] sm:$0xff] }
 0x2e5   :  { %1544 = vmatpush.msrb.mxu1 %v4971_v34  ;;  %1564 = vmatpush.msrb.mxu2 %v4974_v21 }
 0x2e6   :  { %1397 = vmatpush.msra.mxu3 %v4670_v47  ;;  %1526 = vmatpush.msrb.mxu0 %v4978_v37  ;;  %v4994_v47 = vld [vmem:[#allocation8 + $0x130] sm:$0xff] }
 0x2e7   :  { %1545 = vmatpush.msrb.mxu1 %v4981_v12  ;;  %1565 = vmatpush.msrb.mxu2 %v4984_v60  ;;  %6662 = vst [vmem:[#allocation88_spill] sm:$0xff] %v4994_v47 }
 0x2e8   :  { %1398 = vmatpush.msra.mxu3 %v4680_v4  ;;  %1527 = vmatpush.msrb.mxu0 %v4988_v20  ;;  %v5004_v4 = vld [vmem:[#allocation8 + $0x100] sm:$0xff] }
 0x2e9   :  { %1546 = vmatpush.msrb.mxu1 %v4991_v3  ;;  %1566 = vmatpush.msrb.mxu2 %v4994_v47  ;;  %6664 = vst [vmem:[#allocation96_spill] sm:$0xff] %v5004_v4  ;;  %v5008_v3 = vld [vmem:[#allocation8 + $0x90] sm:$0xff]  ;;  %v5011_v47 = vld [vmem:[#allocation8 + $0xc8] sm:$0xff] }
 0x2ea   :  { %1399 = vmatpush.msra.mxu3 %v4686_v8  ;;  %1528 = vmatpush.msrb.mxu0 %v4998_v9  ;;  %6665 = vst [vmem:[#allocation100_spill] sm:$0xff] %v5011_v47  ;;  %v5014_v8 = vld [vmem:[#allocation8 + $0xd0] sm:$0xff] }
 0x2eb   :  { %1547 = vmatpush.msrb.mxu1 %v5001_v45  ;;  %1567 = vmatpush.msrb.mxu2 %v5004_v4  ;;  %6666 = vst [vmem:[#allocation104_spill] sm:$0xff] %v5014_v8  ;;  %v5018_v45 = vld [vmem:[#allocation8 + $0x60] sm:$0xff]  ;;  %v5021_v4 = vld [vmem:[#allocation8 + $0x98] sm:$0xff] }
 0x2ec   :  { %1400 = vmatpush.msra.mxu3 %v4692_v41  ;;  %1529 = vmatpush.msrb.mxu0 %v5008_v3  ;;  %6667 = vst [vmem:[#allocation108_spill] sm:$0xff] %v5021_v4  ;;  %v5024_v41 = vld [vmem:[#allocation8 + $0xa0] sm:$0xff] }
 0x2ed   :  { %1548 = vmatpush.msrb.mxu1 %v5011_v47  ;;  %1568 = vmatpush.msrb.mxu2 %v5014_v8  ;;  %v5028_v47 = vld [vmem:[#allocation8 + $0x30] sm:$0xff]  ;;  %v5031_v8 = vld [vmem:[#allocation8 + $0x68] sm:$0xff] }
 0x2ee   :  { %1401 = vmatpush.msra.mxu3 %v4698_v10  ;;  %1530 = vmatpush.msrb.mxu0 %v5018_v45  ;;  %6668 = vst [vmem:[#allocation37_spill] sm:$0xff] %v5028_v47  ;;  %v5034_v10 = vld [vmem:[#allocation8 + $0x70] sm:$0xff] }
 0x2ef   :  { %1549 = vmatpush.msrb.mxu1 %v5021_v4  ;;  %1569 = vmatpush.msrb.mxu2 %v5024_v41  ;;  %6669 = vst [vmem:[#allocation41_spill] sm:$0xff] %v5031_v8  ;;  %v5038_v4 = vld [vmem:[#allocation8] sm:$0xff] }
 0x2f0   :  { %1402 = vmatpush.msra.mxu3 %v4704_v30  ;;  %1531 = vmatpush.msrb.mxu0 %v5028_v47  ;;  %6670 = vst [vmem:[#allocation38_spill] sm:$0xff] %v5034_v10  ;;  %v5042_v30 = vld [vmem:[#allocation8 + $0x2f0] sm:$0xff]  ;;  %v5045_v47 = vld [vmem:[#allocation8 + $0x2e8] sm:$0xff] }
 0x2f1   :  { %1550 = vmatpush.msrb.mxu1 %v5031_v8  ;;  %1570 = vmatpush.msrb.mxu2 %v5034_v10  ;;  %6671 = vst [vmem:[#allocation20_spill] sm:$0xff] %v5038_v4  ;;  %v5048_v8 = vld [vmem:[#allocation8 + $0x38] sm:$0xff]  ;;  %v5051_v10 = vld [vmem:[#allocation8 + $0x2c0] sm:$0xff] }
 0x2f2   :  { %1403 = vmatpush.msra.mxu3 %v4710_v16  ;;  %1532 = vmatpush.msrb.mxu0 %v5038_v4  ;;  %6672 = vst [vmem:[#allocation42_spill] sm:$0xff] %v5042_v30  ;;  %v5054_v16 = vld [vmem:[#allocation8 + $0x40] sm:$0xff]  ;;  %v5057_v4 = vld [vmem:[#allocation8 + $0x2b8] sm:$0xff] }
 0x2f3   :  { %1404 = vmatmul.f32.vlgmr.msra.gmra.mxu3 %v4944_v52  ;;  %6673 = vst [vmem:[#allocation45_spill] sm:$0xff] %v5045_v47  ;;  %1551 = vmatpush.msrb.mxu1 %v5048_v8 }
 0x2f4   :  { %1597 = vmatpush.msra.mxu0 %v5042_v30  ;;  %1577 = vmatpush.msrb.mxu3 %v5045_v47  ;;  %6674 = vst [vmem:[#allocation39_spill] sm:$0xff] %v5048_v8  ;;  %v5060_v30 = vld [vmem:[#allocation8 + $0x8] sm:$0xff]  ;;  %v5063_v47 = vld [vmem:[#allocation8 + $0x290] sm:$0xff] }
 0x2f5   :  { %6675 = vst [vmem:[#allocation21_spill] sm:$0xff] %v5051_v10  ;;  %1571 = vmatpush.msrb.mxu2 %v5054_v16  ;;  %1552 = vmatpush.msrb.mxu1 %v5060_v30  ;;  %v5066_v8 = vld [vmem:[#allocation8 + $0x10] sm:$0xff] }
 0x2f6   :  { %1598 = vmatpush.msra.mxu0 %v5051_v10  ;;  %6676 = vst [vmem:[#allocation46_spill] sm:$0xff] %v5054_v16  ;;  %1578 = vmatpush.msrb.mxu3 %v5057_v4  ;;  %v5069_v10 = vld [vmem:[#allocation8 + $0x288] sm:$0xff]  ;;  %v5072_v16 = vld [vmem:[#allocation8 + $0x2f8] sm:$0xff] }
 0x2f7   :  { %6677 = vst [vmem:[#allocation22_spill] sm:$0xff] %v5057_v4  ;;  %1572 = vmatpush.msrb.mxu2 %v5066_v8  ;;  %1617 = vmatpush.msra.mxu1 %v5072_v16  ;;  %v5075_v4 = vld [vmem:[#allocation8 + $0x260] sm:$0xff] }
 0x2f8   :  { %6678 = vst [vmem:[#allocation51_spill] sm:$0xff] %v5060_v30  ;;  %1599 = vmatpush.msra.mxu0 %v5063_v47  ;;  %1579 = vmatpush.msrb.mxu3 %v5069_v10  ;;  %v5078_v30 = vld [vmem:[#allocation10 + $0x168] sm:$0xff] }
 0x2f9   :  { %6679 = vst [vmem:[#allocation53_spill] sm:$0xff] %v5063_v47  ;;  %1637 = vmatpush.msra.mxu2 %v5078_v30  ;;  %v5081_v47 = vld [vmem:[#allocation8 + $0x258] sm:$0xff] }
 0x2fa   :  { %6680 = vst [vmem:[#allocation52_spill] sm:$0xff] %v5066_v8  ;;  %1600 = vmatpush.msra.mxu0 %v5075_v4  ;;  %1580 = vmatpush.msrb.mxu3 %v5081_v47  ;;  %v5084_v8 = vld [vmem:[#allocation8 + $0x2c8] sm:$0xff] }
 0x2fb   :  { %6681 = vst [vmem:[#allocation23_spill] sm:$0xff] %v5069_v10  ;;  %1618 = vmatpush.msra.mxu1 %v5084_v8  ;;  %v5087_v10 = vld [vmem:[#allocation8 + $0x230] sm:$0xff] }
 0x2fc   :  { %6682 = vst [vmem:[#allocation57_spill] sm:$0xff] %v5072_v16  ;;  %1601 = vmatpush.msra.mxu0 %v5087_v10  ;;  %v5090_v16 = vld [vmem:[#allocation10 + $0x150] sm:$0xff] }
 0x2fd   :  { %6683 = vst [vmem:[#allocation43_spill] sm:$0xff] %v5075_v4  ;;  %1638 = vmatpush.msra.mxu2 %v5090_v16  ;;  %v5093_v4 = vld [vmem:[#allocation8 + $0x228] sm:$0xff] }
 0x2fe   :  { %6684 = vst [vmem:[#allocation24_spill] sm:$0xff] %v5078_v30  ;;  %1581 = vmatpush.msrb.mxu3 %v5093_v4  ;;  %v5096_v30 = vld [vmem:[#allocation8 + $0x298] sm:$0xff] }
 0x2ff   :  { %6685 = vst [vmem:[#allocation59_spill] sm:$0xff] %v5081_v47  ;;  %1619 = vmatpush.msra.mxu1 %v5096_v30  ;;  %v5099_v47 = vld [vmem:[#allocation8 + $0x200] sm:$0xff] }
 0x300   :  { %6686 = vst [vmem:[#allocation61_spill] sm:$0xff] %v5084_v8  ;;  %1602 = vmatpush.msra.mxu0 %v5099_v47  ;;  %v5102_v8 = vld [vmem:[#allocation10 + $0x138] sm:$0xff] }
 0x301   :  { %6687 = vst [vmem:[#allocation47_spill] sm:$0xff] %v5087_v10  ;;  %1639 = vmatpush.msra.mxu2 %v5102_v8  ;;  %v5105_v10 = vld [vmem:[#allocation8 + $0x1f8] sm:$0xff] }
 0x302   :  { %6688 = vst [vmem:[#allocation25_spill] sm:$0xff] %v5090_v16  ;;  %1582 = vmatpush.msrb.mxu3 %v5105_v10  ;;  %v5108_v16 = vld [vmem:[#allocation8 + $0x268] sm:$0xff] }
 0x303   :  { %6689 = vst [vmem:[#allocation58_spill] sm:$0xff] %v5093_v4  ;;  %1620 = vmatpush.msra.mxu1 %v5108_v16  ;;  %v5111_v4 = vld [vmem:[#allocation8 + $0x1d0] sm:$0xff] }
 0x304   :  { %6690 = vst [vmem:[#allocation65_spill] sm:$0xff] %v5096_v30  ;;  %1603 = vmatpush.msra.mxu0 %v5111_v4  ;;  %v5114_v30 = vld [vmem:[#allocation10 + $0x120] sm:$0xff] }
 0x305   :  { %6691 = vst [vmem:[#allocation63_spill] sm:$0xff] %v5099_v47  ;;  %1640 = vmatpush.msra.mxu2 %v5114_v30  ;;  %v5117_v47 = vld [vmem:[#allocation8 + $0x1c8] sm:$0xff] }
 0x306   :  { %6692 = vst [vmem:[#allocation26_spill] sm:$0xff] %v5102_v8  ;;  %1583 = vmatpush.msrb.mxu3 %v5117_v47  ;;  %v5120_v8 = vld [vmem:[#allocation8 + $0x238] sm:$0xff] }
 0x307   :  { %6693 = vst [vmem:[#allocation62_spill] sm:$0xff] %v5105_v10  ;;  %1621 = vmatpush.msra.mxu1 %v5120_v8  ;;  %v5123_v10 = vld [vmem:[#allocation8 + $0x1a0] sm:$0xff] }
 0x308   :  { %6694 = vst [vmem:[#allocation69_spill] sm:$0xff] %v5108_v16  ;;  %1604 = vmatpush.msra.mxu0 %v5123_v10  ;;  %v5126_v16 = vld [vmem:[#allocation10 + $0x108] sm:$0xff] }
 0x309   :  { %6695 = vst [vmem:[#allocation67_spill] sm:$0xff] %v5111_v4  ;;  %1641 = vmatpush.msra.mxu2 %v5126_v16  ;;  %v5129_v4 = vld [vmem:[#allocation8 + $0x198] sm:$0xff] }
 0x30a   :  { %6696 = vst [vmem:[#allocation27_spill] sm:$0xff] %v5114_v30  ;;  %1584 = vmatpush.msrb.mxu3 %v5129_v4  ;;  %v5132_v30 = vld [vmem:[#allocation8 + $0x208] sm:$0xff] }
 0x30b   :  { %6697 = vst [vmem:[#allocation66_spill] sm:$0xff] %v5117_v47  ;;  %1622 = vmatpush.msra.mxu1 %v5132_v30  ;;  %v5135_v47 = vld [vmem:[#allocation8 + $0x170] sm:$0xff] }
 0x30c   :  { %6698 = vst [vmem:[#allocation73_spill] sm:$0xff] %v5120_v8  ;;  %1605 = vmatpush.msra.mxu0 %v5135_v47  ;;  %v5138_v8 = vld [vmem:[#allocation10 + $0xf0] sm:$0xff] }
 0x30d   :  { %6699 = vst [vmem:[#allocation71_spill] sm:$0xff] %v5123_v10  ;;  %1642 = vmatpush.msra.mxu2 %v5138_v8  ;;  %v5141_v10 = vld [vmem:[#allocation8 + $0x168] sm:$0xff] }
 0x30e   :  { %6700 = vst [vmem:[#allocation28_spill] sm:$0xff] %v5126_v16  ;;  %1585 = vmatpush.msrb.mxu3 %v5141_v10  ;;  %v5144_v16 = vld [vmem:[#allocation8 + $0x1d8] sm:$0xff]  ;;  %1606 = vmatpush.msra.mxu0 %v4750_v2 }
 0x30f   :  { %6701 = vst [vmem:[#allocation70_spill] sm:$0xff] %v5129_v4  ;;  %1623 = vmatpush.msra.mxu1 %v5144_v16  ;;  %v5148_v4 = vld [vmem:[#allocation10 + $0xd8] sm:$0xff] }
 0x310   :  { %6702 = vst [vmem:[#allocation77_spill] sm:$0xff] %v5132_v30  ;;  %1643 = vmatpush.msra.mxu2 %v5148_v4  ;;  %v5151_v30 = vld [vmem:[#allocation8 + $0x138] sm:$0xff]  ;;  %1607 = vmatpush.msra.mxu0 %v4756_v38  ;;  %v5176_v38 = vld [vmem:[#allocation10 + $0x90] sm:$0xff] }
 0x311   :  { %6703 = vst [vmem:[#allocation75_spill] sm:$0xff] %v5135_v47  ;;  %1586 = vmatpush.msrb.mxu3 %v5151_v30  ;;  %v5154_v47 = vld [vmem:[#allocation8 + $0x1a8] sm:$0xff]  ;;  %v5164_v2 = vld [vmem:[#allocation8 + $0x178] sm:$0xff] }
 0x312   :  { %6704 = vst [vmem:[#allocation29_spill] sm:$0xff] %v5138_v8  ;;  %1624 = vmatpush.msra.mxu1 %v5154_v47  ;;  %v5158_v8 = vld [vmem:[#allocation10 + $0xc0] sm:$0xff]  ;;  %1608 = vmatpush.msra.mxu0 %v4762_v17  ;;  %v5184_v17 = vld [vmem:[#allocation10 + $0x78] sm:$0xff] }
 0x313   :  { %6705 = vst [vmem:[#allocation74_spill] sm:$0xff] %v5141_v10  ;;  %1644 = vmatpush.msra.mxu2 %v5158_v8  ;;  %v5161_v10 = vld [vmem:[#allocation8 + $0x108] sm:$0xff] }
 0x314   :  { %6706 = vst [vmem:[#allocation81_spill] sm:$0xff] %v5148_v4  ;;  %1587 = vmatpush.msrb.mxu3 %v5161_v10  ;;  %1625 = vmatpush.msra.mxu1 %v5164_v2  ;;  %v5168_v4 = vld [vmem:[#allocation10 + $0xa8] sm:$0xff] }
 0x315   :  { %6707 = vst [vmem:[#allocation79_spill] sm:$0xff] %v5151_v30  ;;  %1645 = vmatpush.msra.mxu2 %v5168_v4  ;;  %v5171_v30 = vld [vmem:[#allocation8 + $0xd8] sm:$0xff]  ;;  %1609 = vmatpush.msra.mxu0 %v4770_v46  ;;  %v5195_v46 = vld [vmem:[#allocation8 + $0x48] sm:$0xff] }
 0x316   :  { %6708 = vst [vmem:[#allocation30_spill] sm:$0xff] %v5154_v47  ;;  %1588 = vmatpush.msrb.mxu3 %v5171_v30  ;;  %1626 = vmatpush.msra.mxu1 %v4765_v0  ;;  %v5192_v0 = vld [vmem:[#allocation10 + $0x60] sm:$0xff] }
 0x317   :  { %6709 = vst [vmem:[#allocation78_spill] sm:$0xff] %v5158_v8  ;;  %1646 = vmatpush.msra.mxu2 %v5176_v38  ;;  %v5179_v8 = vld [vmem:[#allocation8 + $0xa8] sm:$0xff]  ;;  %1610 = vmatpush.msra.mxu0 %v4778_v14  ;;  %v5205_v14 = vld [vmem:[#allocation10 + $0x170] sm:$0xff] }
 0x318   :  { %6710 = vst [vmem:[#allocation85_spill] sm:$0xff] %v5161_v10  ;;  %1589 = vmatpush.msrb.mxu3 %v5179_v8  ;;  %1627 = vmatpush.msra.mxu1 %v4773_v63  ;;  %v5201_v63 = vld [vmem:[#allocation8 + $0x18] sm:$0xff] }
 0x319   :  { %6711 = vst [vmem:[#allocation31_spill] sm:$0xff] %v5164_v2  ;;  %1647 = vmatpush.msra.mxu2 %v5184_v17  ;;  %1611 = vmatpush.msra.mxu0 %v4786_v28  ;;  %v5215_v28 = vld [vmem:[#allocation10 + $0x140] sm:$0xff] }
 0x31a   :  { %6712 = vst [vmem:[#allocation82_spill] sm:$0xff] %v5168_v4  ;;  %v5187_v4 = vld [vmem:[#allocation8 + $0x78] sm:$0xff]  ;;  %1628 = vmatpush.msra.mxu1 %v4781_v29 }
 0x31b   :  { %6713 = vst [vmem:[#allocation89_spill] sm:$0xff] %v5171_v30  ;;  %1590 = vmatpush.msrb.mxu3 %v5187_v4  ;;  %1648 = vmatpush.msra.mxu2 %v5192_v0  ;;  %v5210_v29 = vld [vmem:[#allocation10 + $0x158] sm:$0xff]  ;;  %v6742_v30 = vld [vmem:[#allocation19_spill] sm:$0xff] }
 0x31c   :  { %6714 = vst [vmem:[#allocation86_spill] sm:$0xff] %v5176_v38  ;;  %1629 = vmatpush.msra.mxu1 %v4789_v36  ;;  %1612 = vmatpush.msra.mxu0 %v4794_v35  ;;  %v5219_v36 = vld [vmem:[#allocation10 + $0x128] sm:$0xff]  ;;  %v5222_v35 = vld [vmem:[#allocation10 + $0x110] sm:$0xff]  ;;  %vm1697_vm13 = vcmp.eq.s32.totalorder %v6742_v30, 5 }
 0x31d   :  { %6715 = vst [vmem:[#allocation83_spill] sm:$0xff] %v5179_v8  ;;  %1591 = vmatpush.msrb.mxu3 %v5195_v46  ;;  %1649 = vmatpush.msra.mxu2 %v4801_v15  ;;  %v5228_v15 = vld [vmem:[#allocation10 + $0xe0] sm:$0xff] }
 0x31e   :  { %6716 = vst [vmem:[#allocation93_spill] sm:$0xff] %v5184_v17  ;;  %1630 = vmatpush.msra.mxu1 %v4797_v62  ;;  %v5225_v62 = vld [vmem:[#allocation10 + $0xf8] sm:$0xff] }
 0x31f   :  { %6717 = vst [vmem:[#allocation90_spill] sm:$0xff] %v5187_v4  ;;  %1592 = vmatpush.msrb.mxu3 %v5201_v63  ;;  %1650 = vmatpush.msra.mxu2 %v4808_v27  ;;  %v5234_v27 = vld [vmem:[#allocation10 + $0xb0] sm:$0xff] }
 0x320   :  { %6718 = vst [vmem:[#allocation87_spill] sm:$0xff] %v5192_v0  ;;  %1631 = vmatpush.msra.mxu1 %v4805_v39  ;;  %v5231_v39 = vld [vmem:[#allocation10 + $0xc8] sm:$0xff] }
 0x321   :  { %6719 = vst [vmem:[#allocation32_spill] sm:$0xff] %v5195_v46  ;;  %1657 = vmatpush.msra.mxu3 %v5205_v14  ;;  %1651 = vmatpush.msra.mxu2 %v4815_v53  ;;  %v5240_v53 = vld [vmem:[#allocation10 + $0x80] sm:$0xff]  ;;  %v6739_v0 = vld [vmem:[#allocation55_spill] sm:$0xff] }
 0x322   :  { %6720 = vst [vmem:[#allocation94_spill] sm:$0xff] %v5201_v63  ;;  %1632 = vmatpush.msra.mxu1 %v4812_v5  ;;  %v5237_v5 = vld [vmem:[#allocation10 + $0x98] sm:$0xff] }
 0x323   :  { %6721 = vst [vmem:[#allocation97_spill] sm:$0xff] %v5205_v14  ;;  %1658 = vmatpush.msra.mxu3 %v5210_v29  ;;  %1652 = vmatpush.msra.mxu2 %v4819_v32  ;;  %v5243_v32 = vld [vmem:[#allocation10 + $0x68] sm:$0xff] }
 0x324   :  { %6722 = vst [vmem:[#allocation91_spill] sm:$0xff] %v5210_v29 }
 0x325   :  { %6723 = vst [vmem:[#allocation33_spill] sm:$0xff] %v5215_v28  ;;  %1659 = vmatpush.msra.mxu3 %v5215_v28  ;;  %v6738_v28 = vld [vmem:[#allocation49_spill] sm:$0xff] }
 0x326   :  { %6724 = vst [vmem:[#allocation98_spill] sm:$0xff] %v5219_v36 }
 0x327   :  { %1660 = vmatpush.msra.mxu3 %v5219_v36  ;;  %6725 = vst [vmem:[#allocation101_spill] sm:$0xff] %v5222_v35 }
 0x328   :  { %6726 = vst [vmem:[#allocation105_spill] sm:$0xff] %v5225_v62 }
 0x329   :  { %1661 = vmatpush.msra.mxu3 %v5222_v35  ;;  %6727 = vst [vmem:[#allocation36_spill] sm:$0xff] %v5228_v15 }
 0x32a   :  { %6728 = vst [vmem:[#allocation95_spill] sm:$0xff] %v5231_v39 }
 0x32b   :  { %1662 = vmatpush.msra.mxu3 %v5225_v62  ;;  %6729 = vst [vmem:[#allocation102_spill] sm:$0xff] %v5234_v27  ;;  %v6736_v62 = vld [vmem:[#allocation50_spill] sm:$0xff] }
 0x32c   :  { %6730 = vst [vmem:[#allocation40_spill] sm:$0xff] %v5237_v5 }
 0x32d   :  { %1663 = vmatpush.msra.mxu3 %v5228_v15  ;;  %6731 = vst [vmem:[#allocation99_spill] sm:$0xff] %v5240_v53  ;;  %v5246_v15 = vld [vmem:[#allocation10 + $0x50] sm:$0xff] }
 0x32e   :  { %6732 = vst [vmem:[#allocation44_spill] sm:$0xff] %v5243_v32 }
 0x32f   :  { %1664 = vmatpush.msra.mxu3 %v5231_v39  ;;  %6733 = vst [vmem:[#allocation106_spill] sm:$0xff] %v5246_v15  ;;  %v5249_v39 = vld [vmem:[#allocation10 + $0x38] sm:$0xff] }
 0x330   :  { %6734 = vst [vmem:[#allocation103_spill] sm:$0xff] %v5249_v39 }
 0x331   :  { %1665 = vmatpush.msra.mxu3 %v5234_v27  ;;  %v6735_v27 = vld [vmem:[#allocation76_spill] sm:$0xff] }
 0x333   :  { %1666 = vmatpush.msra.mxu3 %v5237_v5  ;;  %v1411_v5 = vpop.xlane.xlu2 %1410 }
 0x334   :  { %v1413_v35 = vmul.f32 %v1411_v5, %v6736_v62  ;;  %v1412_v29 = vmul.f32 %v1411_v5, %v6738_v28 }
 0x335   :  { %1667 = vmatpush.msra.mxu3 %v5240_v53  ;;  %v6737_v53 = vld [vmem:[#allocation56_spill] sm:$0xff] }
 0x336   :  { %v1416_v36 = vadd.f32 %v1413_v35, %v6737_v53  ;;  %v6740_v35 = vld [vmem:[#allocation34_spill] sm:$0xff] }
 0x337   :  { %1668 = vmatpush.msra.mxu3 %v5243_v32 }
 0x339   :  { %1669 = vmatpush.msra.mxu3 %v5246_v15  ;;  %v1415_v15 = vadd.f32 %v1412_v29, %v6739_v0 }
 0x33b   :  { %1670 = vmatpush.msra.mxu3 %v5249_v39 }
 0x33d   :  { %1671 = vmatpush.msra.mxu3 %v4833_v48 }
 0x33f   :  { %1672 = vmatpush.msra.mxu3 %v6735_v27 }
 0x34e   :  { %v1265_v32 = vpop.f32.mrf.mxu0 }
 0x34f   :  { %v1438_v14 = vadd.f32 %v1416_v36, %v1265_v32  ;;  %v1285_v39 = vpop.f32.mrf.mxu1 }
 0x351   :  { %v2631_v63 = vmul.f32 -1.442695, %v1438_v14 }
 0x353   :  { %2735 = vpow2.f32 %v2631_v63 }
 0x354   :  { %v1245_v46 = vpop.f32.mrf.mxu3 }
 0x355   :  { %v1418_v17 = vadd.f32 %v1415_v15, %v1245_v46  ;;  %v1305_v38 = vpop.f32.mrf.mxu2  ;;  %v6741_v46 = vld [vmem:[#allocation35_spill] sm:$0xff] }
 0x356   :  { %v1466_v53 = vadd.f32 %v1305_v38, %v6740_v35 }
 0x357   :  { %v2630_v4 = vmul.f32 -1.442695, %v1418_v17 }
 0x359   :  { %v2736_v48 = vpop.eup %2735  ;;  %2737 = vpow2.f32 %v2630_v4 }
 0x35a   :  { %v5258_v27 = vadd.f32 1.0, %v2736_v48 }
 0x35c   :  { %2739 = vrcp.f32 %v5258_v27  ;;  %vm1448_vm3 = vweird.f32 %v5258_v27 }
 0x35d   :  { %v1325_v32 = vpop.f32.mrf.mxu3 }
 0x35e   :  { %v1365_v62 = vpop.f32.mrf.mxu1  ;;  %v1467_v15 = vadd.f32 %v1325_v32, %v6741_v46 }
 0x35f   :  { %v2738_v28 = vpop.eup %2737  ;;  %v1469_v36 = vadd.f32 %v1466_v53, %v1365_v62  ;;  %v6743_v53 = vld [vmem:[#allocation80_spill] sm:$0xff] }
 0x360   :  { %v1422_v14 = vadd.f32 1.0, %v2738_v28 }
 0x361   :  { %v2632_v29 = vmul.f32 -1.442695, %v1469_v36  ;;  %v1698_v36 = vsel %vm1697_vm13, %v6743_v53, 0.0 }
 0x362   :  { %2741 = vrcp.f32 %v1422_v14  ;;  %v2740_v63 = vpop.eup %2739  ;;  %1699 = vadd.xlane.f32.xlu2 %v1698_v36  ;;  %v1434_v2 = vand.u32 2147483648, %v1422_v14  ;;  %vm1428_vm15 = vweird.f32 %v1422_v14 }
 0x363   :  { %2743 = vpow2.f32 %v2632_v29  ;;  %v1444_v48 = vmul.f32 %v2740_v63, %v5258_v27  ;;  %v1432_v29 = vand.u32 2147483647, %v1422_v14  ;;  %vm1449_vm2 = vweird.f32 %v2740_v63 }
 0x364   :  { %v1385_v17 = vpop.f32.mrf.mxu2  ;;  %v1435_v30 = vor.u32 1.1754944e-38, %v1434_v2  ;;  %vm1450_vm4 = vmor %vm1448_vm3, %vm1449_vm2 }
 0x365   :  { %v1489_v4 = vadd.f32 %v1467_v15, %v1385_v17  ;;  %v1445_v62 = vsub.f32 1.0, %v1444_v48  ;;  %v1454_v48 = vand.u32 2147483648, %v5258_v27  ;;  %vm1433_vm1 = vcmp.eq.f32.partialorder %v1432_v29, 8.507059e+37 }
 0x367   :  { %v2633_v0 = vmul.f32 -1.442695, %v1489_v4  ;;  %v1446_v15 = vmul.f32 %v2740_v63, %v1445_v62  ;;  %v1414_v4 = vmul.f32 %v1411_v5, %v6658_v61 }
 0x368   :  { %v2742_v8 = vpop.eup %2741 }
 0x369   :  { %v2744_v38 = vpop.eup %2743  ;;  %v1424_v35 = vmul.f32 %v2742_v8, %v1422_v14  ;;  %2745 = vpow2.f32 %v2633_v0  ;;  %vm1429_vm14 = vweird.f32 %v2742_v8  ;;  %v1447_v53 = vadd.f32 %v2740_v63, %v1446_v15 }
 0x36a   :  { %v1473_v28 = vadd.f32 1.0, %v2744_v38  ;;  %vm1430_vm0 = vmor %vm1428_vm15, %vm1429_vm14  ;;  %v1417_v14 = vadd.f32 %v1414_v4, %v3946_v43 }
 0x36b   :  { %v1425_v10 = vsub.f32 1.0, %v1424_v35  ;;  %v5271_v35 = vld [vmem:[%s5983_s5] ss:$0 sm:$0xff]  ;;  %v1451_v47 = vsel %vm1450_vm4, %v2740_v63, %v1447_v53 }
 0x36c   :  { %2747 = vrcp.f32 %v1473_v28  ;;  %v1483_v29 = vand.u32 2147483647, %v1473_v28  ;;  %vm1479_vm7 = vweird.f32 %v1473_v28 }
 0x36d   :  { %v1426_v32 = vmul.f32 %v2742_v8, %v1425_v10  ;;  %v1458_v10 = vadd.f32 %v5271_v35, %v1285_v39  ;;  %v1455_v39 = vor.u32 1.1754944e-38, %v1454_v48 }
 0x36e   :  { %vm1484_vm9 = vcmp.eq.f32.partialorder %v1483_v29, 8.507059e+37 }
 0x36f   :  { %v2746_v17 = vpop.eup %2745  ;;  %v1427_v46 = vadd.f32 %v2742_v8, %v1426_v32  ;;  %v1452_v32 = vand.u32 2147483647, %v5258_v27 }
 0x370   :  { %v1493_v0 = vadd.f32 1.0, %v2746_v17 }
 0x371   :  { %v1431_v38 = vsel %vm1430_vm0, %v2742_v8, %v1427_v46  ;;  %v1485_v8 = vand.u32 2147483648, %v1473_v28  ;;  %vm1453_vm6 = vcmp.eq.f32.partialorder %v1452_v32, 8.507059e+37 }
 0x372   :  { %v2748_v62 = vpop.eup %2747  ;;  %v1436_v5 = vsel %vm1433_vm1, %v1435_v30, %v1431_v38  ;;  %2749 = vrcp.f32 %v1493_v0  ;;  %v1456_v4 = vsel %vm1453_vm6, %v1455_v39, %v1451_v47  ;;  %v1505_v47 = vand.u32 2147483648, %v1493_v0 }
 0x373   :  { %v1459_v2 = vmul.f32 %v1458_v10, %v1436_v5  ;;  %v1475_v36 = vmul.f32 %v2748_v62, %v1473_v28  ;;  %vm1480_vm5 = vweird.f32 %v2748_v62  ;;  %v1345_v10 = vpop.f32.mrf.mxu0  ;;  %v1486_v27 = vor.u32 1.1754944e-38, %v1485_v8 }
 0x374   :  { %vm1481_vm8 = vmor %vm1479_vm7, %vm1480_vm5  ;;  %v1462_v48 = vsub.f32 1.0, %v1456_v4  ;;  %v1503_v28 = vand.u32 2147483647, %v1493_v0  ;;  %vm1499_vm11 = vweird.f32 %v1493_v0  ;;  %v1506_v29 = vor.u32 1.1754944e-38, %v1505_v47  ;;  %v6774_v47 = vld [vmem:[#allocation63_spill] sm:$0xff] }
 0x375   :  { %v1460_v17 = vadd.f32 %v1459_v2, %v1417_v14  ;;  %v1476_v61 = vsub.f32 1.0, %v1475_v36 }
 0x376   :  { %v1405_v15 = vpop.f32.mrf.mxu3  ;;  %vm1504_vm13 = vcmp.eq.f32.partialorder %v1503_v28, 8.507059e+37  ;;  %v6777_v28 = vld [vmem:[#allocation26_spill] sm:$0xff] }
 0x377   :  { %2751 = vtanh.f32 %v1460_v17  ;;  %v1477_v46 = vmul.f32 %v2748_v62, %v1476_v61  ;;  %v1509_v63 = vadd.f32 %v4866_v33, %v1405_v15  ;;  %v1468_v61 = vadd.f32 %v1345_v10, %v4185_v23  ;;  %v6762_v10 = vld [vmem:[#allocation53_spill] sm:$0xff] }
 0x378   :  { %v2750_v30 = vpop.eup %2749  ;;  %v1464_v17 = vmul.f32 %v1456_v4, %v4861_v44  ;;  %v5286_v44 = vld [vmem:[#allocation10 + $0x178] sm:$0xff]  ;;  %v5298_v4 = vld [vmem:[#allocation10 + $0x148] sm:$0xff] }
 0x379   :  { %v1495_v38 = vmul.f32 %v2750_v30, %v1493_v0  ;;  %v1478_v5 = vadd.f32 %v2748_v62, %v1477_v46  ;;  %vm1500_vm10 = vweird.f32 %v2750_v30  ;;  %v5292_v0 = vld [vmem:[#allocation10 + $0x160] sm:$0xff] }
 0x37a   :  { %vm1501_vm12 = vmor %vm1499_vm11, %vm1500_vm10 }
 0x37b   :  { %v1496_v43 = vsub.f32 1.0, %v1495_v38  ;;  %v1482_v14 = vsel %vm1481_vm8, %v2748_v62, %v1478_v5  ;;  %v6763_v38 = vld [vmem:[#allocation57_spill] sm:$0xff]  ;;  %v6764_v5 = vld [vmem:[#allocation23_spill] sm:$0xff] }
 0x37c   :  { %v1487_v53 = vsel %vm1484_vm9, %v1486_v27, %v1482_v14  ;;  %v6765_v27 = vld [vmem:[#allocation52_spill] sm:$0xff]  ;;  %v6766_v14 = vld [vmem:[#allocation43_spill] sm:$0xff] }
 0x37d   :  { %v2752_v2 = vpop.eup %2751  ;;  %v1497_v36 = vmul.f32 %v2750_v30, %v1496_v43  ;;  %v1510_v32 = vmul.f32 %v1509_v63, %v1487_v53  ;;  %v6767_v63 = vld [vmem:[#allocation61_spill] sm:$0xff]  ;;  %v6770_v53 = vld [vmem:[#allocation47_spill] sm:$0xff] }
 0x37e   :  { %v1463_v39 = vmul.f32 %v2752_v2, %v1462_v48  ;;  %v6768_v48 = vld [vmem:[#allocation59_spill] sm:$0xff]  ;;  %v6771_v2 = vld [vmem:[#allocation65_spill] sm:$0xff] }
 0x37f   :  { %v1511_v8 = vadd.f32 %v1510_v32, %v1468_v61  ;;  %v1498_v46 = vadd.f32 %v2750_v30, %v1497_v36  ;;  %v6769_v61 = vld [vmem:[#allocation24_spill] sm:$0xff]  ;;  %v6772_v36 = vld [vmem:[#allocation58_spill] sm:$0xff]  ;;  %v6773_v32 = vld [vmem:[#allocation25_spill] sm:$0xff] }
 0x380   :  { %v5280_v62 = vadd.f32 %v1464_v17, %v1463_v39  ;;  %v6775_v17 = vld [vmem:[#allocation69_spill] sm:$0xff]  ;;  %v6776_v39 = vld [vmem:[#allocation62_spill] sm:$0xff] }
 0x381   :  { %2753 = vtanh.f32 %v1511_v8  ;;  %v1502_v33 = vsel %vm1501_vm12, %v2750_v30, %v1498_v46  ;;  %v6778_v8 = vld [vmem:[#allocation67_spill] sm:$0xff]  ;;  %v6779_v46 = vld [vmem:[#allocation73_spill] sm:$0xff] }
 0x382   :  { %1533 = vmatmul.f32.vlgmr.msrb.gmra.mxu0 %v5280_v62  ;;  %1553 = vmatmul.f32.vlgmr.msrb.gmra.mxu1 %v5280_v62  ;;  %v1507_v43 = vsel %vm1504_vm13, %v1506_v29, %v1502_v33  ;;  %v6780_v33 = vld [vmem:[#allocation66_spill] sm:$0xff]  ;;  %v6781_v29 = vld [vmem:[#allocation27_spill] sm:$0xff] }
 0x383   :  { %1573 = vmatmul.f32.vlgmr.msrb.gmra.mxu2 %v5280_v62  ;;  %1593 = vmatmul.f32.vlgmr.msrb.gmra.mxu3 %v5280_v62  ;;  %v1513_v30 = vsub.f32 1.0, %v1507_v43 }
 0x384   :  { %1677 = vmatpush.msrb.mxu0 %v5286_v44  ;;  %1806 = vmatpush.msrb.mxu1 %v4880_v54 }
 0x385   :  { %1826 = vmatpush.msrb.mxu2 %v4887_v58  ;;  %1846 = vmatpush.msrb.mxu3 %v4890_v1  ;;  %v1515_v58 = vmul.f32 %v1507_v43, %v4944_v52  ;;  %v5305_v1 = vld [vmem:[#allocation10 + $0x130] sm:$0xff]  ;;  %v5363_v52 = vld [vmem:[#allocation10 + $0x58] sm:$0xff]  ;;  %v6782_v43 = vld [vmem:[#allocation71_spill] sm:$0xff] }
 0x386   :  { %1678 = vmatpush.msrb.mxu0 %v5292_v0  ;;  %1807 = vmatpush.msrb.mxu1 %v4897_v51 }
 0x387   :  { %v2754_v15 = vpop.eup %2753  ;;  %1827 = vmatpush.msrb.mxu2 %v4900_v59  ;;  %1847 = vmatpush.msrb.mxu3 %v4903_v18  ;;  %v5315_v59 = vld [vmem:[#allocation10 + $0x118] sm:$0xff]  ;;  %v5321_v18 = vld [vmem:[#allocation10 + $0x100] sm:$0xff] }
 0x388   :  { %1679 = vmatpush.msrb.mxu0 %v5298_v4  ;;  %v1514_v54 = vmul.f32 %v2754_v15, %v1513_v30  ;;  %1808 = vmatpush.msrb.mxu1 %v4907_v50  ;;  %v5327_v50 = vld [vmem:[#allocation10 + $0xe8] sm:$0xff]  ;;  %v6783_v30 = vld [vmem:[#allocation77_spill] sm:$0xff]  ;;  %v6784_v15 = vld [vmem:[#allocation70_spill] sm:$0xff] }
 0x389   :  { %1828 = vmatpush.msrb.mxu2 %v4910_v55  ;;  %1848 = vmatpush.msrb.mxu3 %v4913_v40  ;;  %v5333_v55 = vld [vmem:[#allocation10 + $0xd0] sm:$0xff]  ;;  %v5339_v40 = vld [vmem:[#allocation10 + $0xb8] sm:$0xff] }
 0x38a   :  { %1680 = vmatpush.msrb.mxu0 %v5305_v1  ;;  %1633 = vmatmul.f32.vlgmr.msra.gmra.mxu1 %v5280_v62  ;;  %v5309_v51 = vadd.f32 %v1515_v58, %v1514_v54  ;;  %v6785_v54 = vld [vmem:[#allocation28_spill] sm:$0xff]  ;;  %v6786_v58 = vld [vmem:[#allocation75_spill] sm:$0xff] }
 0x38b   :  { %1613 = vmatmul.f32.vlgmr.msra.gmra.mxu0 %v5280_v62  ;;  %1809 = vmatpush.msrb.mxu1 %v4919_v49  ;;  %v5345_v49 = vld [vmem:[#allocation10 + $0xa0] sm:$0xff] }
 0x38c   :  { %1653 = vmatmul.f32.vlgmr.msra.gmra.mxu2 %v5309_v51  ;;  %1673 = vmatmul.f32.vlgmr.msra.gmra.mxu3 %v5309_v51 }
 0x38d   :  { %1681 = vmatpush.msrb.mxu0 %v5315_v59  ;;  %1810 = vmatpush.msrb.mxu1 %v4926_v31  ;;  %v6744_v31 = vld [vmem:[#allocation84_spill] sm:$0xff] }
 0x38e   :  { %1829 = vmatpush.msrb.mxu2 %v4923_v11  ;;  %1849 = vmatpush.msrb.mxu3 %v4929_v19  ;;  %v5351_v11 = vld [vmem:[#allocation10 + $0x88] sm:$0xff]  ;;  %v6745_v19 = vld [vmem:[#allocation88_spill] sm:$0xff] }
 0x38f   :  { %1682 = vmatpush.msrb.mxu0 %v5321_v18  ;;  %1811 = vmatpush.msrb.mxu1 %v4937_v13  ;;  %v6746_v13 = vld [vmem:[#allocation92_spill] sm:$0xff] }
 0x390   :  { %1830 = vmatpush.msrb.mxu2 %v4934_v22  ;;  %1850 = vmatpush.msrb.mxu3 %v4940_v24  ;;  %v5357_v22 = vld [vmem:[#allocation10 + $0x70] sm:$0xff] }
 0x391   :  { %1683 = vmatpush.msrb.mxu0 %v5327_v50  ;;  %1812 = vmatpush.msrb.mxu1 %v4949_v6  ;;  %v6747_v24 = vld [vmem:[#allocation96_spill] sm:$0xff] }
 0x392   :  { %1831 = vmatpush.msrb.mxu2 %v4946_v42  ;;  %1851 = vmatpush.msrb.mxu3 %v4952_v25  ;;  %v6748_v42 = vld [vmem:[#allocation100_spill] sm:$0xff]  ;;  %v5369_v25 = vld [vmem:[#allocation10 + $0x40] sm:$0xff] }
 0x393   :  { %1684 = vmatpush.msrb.mxu0 %v5333_v55  ;;  %1813 = vmatpush.msrb.mxu1 %v4958_v7  ;;  %v6749_v6 = vld [vmem:[#allocation104_spill] sm:$0xff] }
 0x394   :  { %1832 = vmatpush.msrb.mxu2 %v4961_v56  ;;  %1852 = vmatpush.msrb.mxu3 %v4964_v57  ;;  %v6750_v7 = vld [vmem:[#allocation108_spill] sm:$0xff]  ;;  %v5375_v56 = vld [vmem:[#allocation10 + $0x28] sm:$0xff]  ;;  %v6751_v57 = vld [vmem:[#allocation37_spill] sm:$0xff] }
 0x395   :  { %1685 = vmatpush.msrb.mxu0 %v5339_v40  ;;  %1814 = vmatpush.msrb.mxu1 %v4968_v26  ;;  %v6752_v26 = vld [vmem:[#allocation41_spill] sm:$0xff] }
 0x396   :  { %1833 = vmatpush.msrb.mxu2 %v4971_v34  ;;  %1853 = vmatpush.msrb.mxu3 %v4974_v21  ;;  %v6753_v34 = vld [vmem:[#allocation38_spill] sm:$0xff]  ;;  %v5381_v21 = vld [vmem:[#allocation10 + $0x10] sm:$0xff] }
 0x397   :  { %1686 = vmatpush.msrb.mxu0 %v5345_v49  ;;  %1815 = vmatpush.msrb.mxu1 %v4978_v37  ;;  %v6754_v37 = vld [vmem:[#allocation20_spill] sm:$0xff] }
 0x398   :  { %1834 = vmatpush.msrb.mxu2 %v4981_v12  ;;  %1854 = vmatpush.msrb.mxu3 %v4984_v60  ;;  %v6755_v12 = vld [vmem:[#allocation42_spill] sm:$0xff]  ;;  %v6756_v60 = vld [vmem:[#allocation45_spill] sm:$0xff] }
 0x399   :  { %1687 = vmatpush.msrb.mxu0 %v5351_v11  ;;  %1816 = vmatpush.msrb.mxu1 %v4988_v20  ;;  %v6757_v20 = vld [vmem:[#allocation39_spill] sm:$0xff] }
 0x39a   :  { %1835 = vmatpush.msrb.mxu2 %v6744_v31  ;;  %1855 = vmatpush.msrb.mxu3 %v6745_v19  ;;  %v6787_v31 = vld [vmem:[#allocation74_spill] sm:$0xff]  ;;  %v6788_v19 = vld [vmem:[#allocation29_spill] sm:$0xff] }
 0x39b   :  { %1688 = vmatpush.msrb.mxu0 %v5357_v22  ;;  %1817 = vmatpush.msrb.mxu1 %v4998_v9  ;;  %v6759_v9 = vld [vmem:[#allocation46_spill] sm:$0xff] }
 0x39c   :  { %1836 = vmatpush.msrb.mxu2 %v6746_v13  ;;  %1856 = vmatpush.msrb.mxu3 %v6747_v24  ;;  %v5421_v13 = vld [vmem:[#allocation8 + $0x140] sm:$0xff] }
 0x39d   :  { %1689 = vmatpush.msrb.mxu0 %v5363_v52  ;;  %1818 = vmatpush.msrb.mxu1 %v5008_v3  ;;  %v6758_v3 = vld [vmem:[#allocation21_spill] sm:$0xff]  ;;  %v6789_v24 = vld [vmem:[#allocation30_spill] sm:$0xff] }
 0x39e   :  { %1837 = vmatpush.msrb.mxu2 %v6748_v42  ;;  %1857 = vmatpush.msrb.mxu3 %v6749_v6  ;;  %v6790_v42 = vld [vmem:[#allocation79_spill] sm:$0xff]  ;;  %v6791_v6 = vld [vmem:[#allocation81_spill] sm:$0xff] }
 0x39f   :  { %1690 = vmatpush.msrb.mxu0 %v5369_v25  ;;  %1819 = vmatpush.msrb.mxu1 %v5018_v45  ;;  %v6760_v45 = vld [vmem:[#allocation22_spill] sm:$0xff] }
 0x3a0   :  { %1838 = vmatpush.msrb.mxu2 %v6750_v7  ;;  %1858 = vmatpush.msrb.mxu3 %v5024_v41  ;;  %v6761_v41 = vld [vmem:[#allocation51_spill] sm:$0xff]  ;;  %v5427_v7 = vld [vmem:[#allocation8 + $0x110] sm:$0xff] }
 0x3a1   :  { %1691 = vmatpush.msrb.mxu0 %v5375_v56  ;;  %1820 = vmatpush.msrb.mxu1 %v6751_v57  ;;  %v6792_v57 = vld [vmem:[#allocation31_spill] sm:$0xff] }
 0x3a2   :  { %1839 = vmatpush.msrb.mxu2 %v6752_v26  ;;  %1859 = vmatpush.msrb.mxu3 %v6753_v34  ;;  %v6794_v26 = vld [vmem:[#allocation78_spill] sm:$0xff] }
 0x3a3   :  { %1692 = vmatpush.msrb.mxu0 %v5381_v21  ;;  %1821 = vmatpush.msrb.mxu1 %v6754_v37  ;;  %v5433_v34 = vld [vmem:[#allocation8 + $0xe0] sm:$0xff]  ;;  %v5436_v37 = vld [vmem:[#allocation8 + $0x148] sm:$0xff] }
 0x3a4   :  { %1693 = vmatmul.f32.vlgmr.msrb.gmra.mxu0 %v5309_v51  ;;  %1840 = vmatpush.msrb.mxu2 %v6757_v20  ;;  %v5441_v20 = vld [vmem:[#allocation8 + $0xb0] sm:$0xff] }
 0x3a5   :  { %1886 = vmatpush.msra.mxu1 %v6755_v12  ;;  %1866 = vmatpush.msra.mxu0 %v6756_v60  ;;  %v6795_v12 = vld [vmem:[#allocation89_spill] sm:$0xff]  ;;  %v6796_v60 = vld [vmem:[#allocation82_spill] sm:$0xff]  ;;  %6797 = vst [vmem:[#allocation48_spill] sm:$0xff] %v5441_v20 }
 0x3a6   :  { %1860 = vmatpush.msrb.mxu3 %v6759_v9  ;;  %1841 = vmatpush.msrb.mxu2 %v6761_v41  ;;  %v6798_v9 = vld [vmem:[#allocation83_spill] sm:$0xff]  ;;  %v5449_v41 = vld [vmem:[#allocation8 + $0x80] sm:$0xff] }
 0x3a7   :  { %1887 = vmatpush.msra.mxu1 %v6758_v3  ;;  %1867 = vmatpush.msra.mxu0 %v6760_v45  ;;  %v5444_v3 = vld [vmem:[#allocation8 + $0x118] sm:$0xff]  ;;  %v6799_v45 = vld [vmem:[#allocation86_spill] sm:$0xff]  ;;  %6800 = vst [vmem:[#allocation107_spill] sm:$0xff] %v5449_v41 }
 0x3a8   :  { %1906 = vmatpush.msra.mxu2 %v6763_v38  ;;  %1861 = vmatpush.msrb.mxu3 %v6765_v27  ;;  %v6802_v38 = vld [vmem:[#allocation90_spill] sm:$0xff]  ;;  %v5457_v27 = vld [vmem:[#allocation8 + $0x50] sm:$0xff] }
 0x3a9   :  { %1888 = vmatpush.msra.mxu1 %v6762_v10  ;;  %1868 = vmatpush.msra.mxu0 %v6764_v5  ;;  %v5452_v10 = vld [vmem:[#allocation8 + $0xe8] sm:$0xff]  ;;  %v6803_v5 = vld [vmem:[#allocation93_spill] sm:$0xff]  ;;  %6804 = vst [vmem:[#allocation60_spill] sm:$0xff] %v5457_v27 }
 0x3aa   :  { %1907 = vmatpush.msra.mxu2 %v6767_v63  ;;  %1926 = vmatpush.msra.mxu3 %v6769_v61  ;;  %6801 = vst [vmem:[#allocation54_spill] sm:$0xff] %v5452_v10  ;;  %v6806_v63 = vld [vmem:[#allocation32_spill] sm:$0xff]  ;;  %v5465_v61 = vld [vmem:[#allocation8 + $0x20] sm:$0xff] }
 0x3ab   :  { %1889 = vmatpush.msra.mxu1 %v6766_v14  ;;  %1869 = vmatpush.msra.mxu0 %v6768_v48  ;;  %v5460_v14 = vld [vmem:[#allocation8 + $0xb8] sm:$0xff]  ;;  %v6807_v48 = vld [vmem:[#allocation87_spill] sm:$0xff]  ;;  %6808 = vst [vmem:[#allocation68_spill] sm:$0xff] %v5465_v61 }
 0x3ac   :  { %1908 = vmatpush.msra.mxu2 %v6771_v2  ;;  %1927 = vmatpush.msra.mxu3 %v6773_v32  ;;  %6805 = vst [vmem:[#allocation64_spill] sm:$0xff] %v5460_v14  ;;  %v6810_v2 = vld [vmem:[#allocation94_spill] sm:$0xff]  ;;  %v6811_v32 = vld [vmem:[#allocation97_spill] sm:$0xff] }
 0x3ad   :  { %1890 = vmatpush.msra.mxu1 %v6770_v53  ;;  %1870 = vmatpush.msra.mxu0 %v6772_v36  ;;  %v5468_v53 = vld [vmem:[#allocation8 + $0x88] sm:$0xff] }
 0x3ae   :  { %1909 = vmatpush.msra.mxu2 %v6775_v17  ;;  %1928 = vmatpush.msra.mxu3 %v6777_v28  ;;  %6809 = vst [vmem:[#allocation72_spill] sm:$0xff] %v5468_v53  ;;  %v5472_v36 = vld [vmem:[#allocation10 + $0x48] sm:$0xff]  ;;  %v5479_v17 = vld [vmem:[#allocation10 + $0x30] sm:$0xff] }
 0x3af   :  { %1891 = vmatpush.msra.mxu1 %v6774_v47  ;;  %1871 = vmatpush.msra.mxu0 %v6776_v39  ;;  %v5476_v47 = vld [vmem:[#allocation8 + $0x58] sm:$0xff]  ;;  %v6813_v39 = vld [vmem:[#allocation91_spill] sm:$0xff] }
 0x3b0   :  { %1910 = vmatpush.msra.mxu2 %v6779_v46  ;;  %1929 = vmatpush.msra.mxu3 %v6781_v29  ;;  %6812 = vst [vmem:[#allocation76_spill] sm:$0xff] %v5476_v47  ;;  %v5483_v28 = vld [vmem:[#allocation8 + $0x28] sm:$0xff]  ;;  %v6815_v46 = vld [vmem:[#allocation33_spill] sm:$0xff]  ;;  %v6816_v29 = vld [vmem:[#allocation98_spill] sm:$0xff] }
 0x3b1   :  { %1892 = vmatpush.msra.mxu1 %v6778_v8  ;;  %1872 = vmatpush.msra.mxu0 %v6780_v33  ;;  %6814 = vst [vmem:[#allocation80_spill] sm:$0xff] %v5483_v28  ;;  %v5486_v8 = vld [vmem:[#allocation10 + $0x18] sm:$0xff]  ;;  %v5490_v33 = vld [vmem:[#allocation10] sm:$0xff] }
 0x3b2   :  { %1911 = vmatpush.msra.mxu2 %v6783_v30  ;;  %1930 = vmatpush.msra.mxu3 %v6785_v54  ;;  %v6818_v30 = vld [vmem:[#allocation105_spill] sm:$0xff]  ;;  %v6820_v54 = vld [vmem:[#allocation95_spill] sm:$0xff] }
 0x3b3   :  { %1893 = vmatpush.msra.mxu1 %v6782_v43  ;;  %1873 = vmatpush.msra.mxu0 %v6784_v15  ;;  %v6817_v43 = vld [vmem:[#allocation101_spill] sm:$0xff]  ;;  %v6819_v15 = vld [vmem:[#allocation36_spill] sm:$0xff] }
 0x3b4   :  { %1912 = vmatpush.msra.mxu2 %v5144_v16  ;;  %1931 = vmatpush.msra.mxu3 %v6788_v19  ;;  %v6793_v16 = vld [vmem:[#allocation85_spill] sm:$0xff]  ;;  %v6823_v19 = vld [vmem:[#allocation99_spill] sm:$0xff] }
 0x3b5   :  { %1894 = vmatpush.msra.mxu1 %v6786_v58  ;;  %1874 = vmatpush.msra.mxu0 %v6787_v31  ;;  %v6821_v58 = vld [vmem:[#allocation102_spill] sm:$0xff]  ;;  %v6822_v31 = vld [vmem:[#allocation40_spill] sm:$0xff] }
 0x3b6   :  { %1913 = vmatpush.msra.mxu2 %v6789_v24  ;;  %1932 = vmatpush.msra.mxu3 %v6791_v6  ;;  %v6824_v24 = vld [vmem:[#allocation44_spill] sm:$0xff]  ;;  %v6826_v6 = vld [vmem:[#allocation103_spill] sm:$0xff] }
 0x3b7   :  { %1895 = vmatpush.msra.mxu1 %v5421_v13  ;;  %1875 = vmatpush.msra.mxu0 %v6790_v42  ;;  %v6825_v42 = vld [vmem:[#allocation106_spill] sm:$0xff] }
 0x3b8   :  { %1914 = vmatpush.msra.mxu2 %v6792_v57  ;;  %1933 = vmatpush.msra.mxu3 %v6794_v26  ;;  %v5504_v57 = vld [vmem:[#allocation10 + $0x20] sm:$0xff] }
 0x3b9   :  { %1896 = vmatpush.msra.mxu1 %v5427_v7  ;;  %1876 = vmatpush.msra.mxu0 %v6793_v16  ;;  %6827 = vst [vmem:[#allocation84_spill] sm:$0xff] %v5504_v57  ;;  %v5507_v16 = vld [vmem:[#allocation10 + $0x8] sm:$0xff] }
 0x3ba   :  { %1915 = vmatpush.msra.mxu2 %v5436_v37  ;;  %1934 = vmatpush.msra.mxu3 %v6796_v60  ;;  %6828 = vst [vmem:[#allocation88_spill] sm:$0xff] %v5507_v16 }
 0x3bb   :  { %1897 = vmatpush.msra.mxu1 %v5433_v34  ;;  %1877 = vmatpush.msra.mxu0 %v6795_v12  ;;  %v6829_v12 = vld [vmem:[#allocation49_spill] sm:$0xff] }
 0x3bc   :  { %1916 = vmatpush.msra.mxu2 %v5444_v3  ;;  %1935 = vmatpush.msra.mxu3 %v6799_v45 }
 0x3bd   :  { %1898 = vmatpush.msra.mxu1 %v5441_v20  ;;  %1878 = vmatpush.msra.mxu0 %v6798_v9  ;;  %v6830_v9 = vld [vmem:[#allocation50_spill] sm:$0xff] }
 0x3be   :  { %1917 = vmatpush.msra.mxu2 %v5452_v10  ;;  %1936 = vmatpush.msra.mxu3 %v6803_v5 }
 0x3bf   :  { %1899 = vmatpush.msra.mxu1 %v5449_v41  ;;  %1879 = vmatpush.msra.mxu0 %v6802_v38  ;;  %v6831_v38 = vld [vmem:[#allocation55_spill] sm:$0xff] }
 0x3c0   :  { %1918 = vmatpush.msra.mxu2 %v5460_v14  ;;  %1937 = vmatpush.msra.mxu3 %v6807_v48 }
 0x3c1   :  { %1900 = vmatpush.msra.mxu1 %v5457_v27  ;;  %1880 = vmatpush.msra.mxu0 %v6806_v63  ;;  %v6832_v63 = vld [vmem:[#allocation56_spill] sm:$0xff] }
 0x3c2   :  { %1919 = vmatpush.msra.mxu2 %v5468_v53  ;;  %1938 = vmatpush.msra.mxu3 %v5472_v36 }
 0x3c3   :  { %1901 = vmatpush.msra.mxu1 %v5465_v61  ;;  %1881 = vmatpush.msra.mxu0 %v6810_v2 }
 0x3c4   :  { %1920 = vmatpush.msra.mxu2 %v5476_v47  ;;  %1939 = vmatpush.msra.mxu3 %v5479_v17 }
 0x3c5   :  { %1946 = vmatpush.msrb.mxu0 %v6811_v32 }
 0x3c6   :  { %1921 = vmatpush.msra.mxu2 %v5483_v28  ;;  %1940 = vmatpush.msra.mxu3 %v5486_v8 }
 0x3c7   :  { %1947 = vmatpush.msrb.mxu0 %v6813_v39 }
 0x3c8   :  { %1941 = vmatpush.msra.mxu3 %v5490_v33 }
 0x3c9   :  { %1948 = vmatpush.msrb.mxu0 %v6815_v46 }
 0x3cb   :  { %1949 = vmatpush.msrb.mxu0 %v6816_v29 }
 0x3cd   :  { %1950 = vmatpush.msrb.mxu0 %v6817_v43 }
 0x3cf   :  { %1951 = vmatpush.msrb.mxu0 %v6818_v30 }
 0x3d1   :  { %1952 = vmatpush.msrb.mxu0 %v6819_v15 }
 0x3d3   :  { %1953 = vmatpush.msrb.mxu0 %v6820_v54 }
 0x3d5   :  { %1954 = vmatpush.msrb.mxu0 %v6821_v58  ;;  %v1700_v26 = vpop.xlane.xlu2 %1699 }
 0x3d6   :  { %v1701_v60 = vmul.f32 %v1700_v26, %v6829_v12  ;;  %v1702_v45 = vmul.f32 %v1700_v26, %v6830_v9 }
 0x3d7   :  { %1955 = vmatpush.msrb.mxu0 %v6822_v31 }
 0x3d8   :  { %v1704_v5 = vadd.f32 %v1701_v60, %v6831_v38  ;;  %v1705_v48 = vadd.f32 %v1702_v45, %v6832_v63  ;;  %v6834_v60 = vld [vmem:[#allocation35_spill] sm:$0xff] }
 0x3d9   :  { %1956 = vmatpush.msrb.mxu0 %v6823_v19 }
 0x3db   :  { %1957 = vmatpush.msrb.mxu0 %v6824_v24 }
 0x3dd   :  { %1958 = vmatpush.msrb.mxu0 %v6825_v42  ;;  %v6833_v42 = vld [vmem:[#allocation34_spill] sm:$0xff] }
 0x3df   :  { %1959 = vmatpush.msrb.mxu0 %v6826_v6 }
 0x3e1   :  { %1960 = vmatpush.msrb.mxu0 %v5504_v57 }
 0x3e3   :  { %1961 = vmatpush.msrb.mxu0 %v5507_v16 }
 0x3ff   :  { %v1534_v2 = vpop.f32.mrf.mxu0  ;;  %v1554_v32 = vpop.f32.mrf.mxu1 }
 0x400   :  { %v1707_v39 = vadd.f32 %v1704_v5, %v1534_v2  ;;  %v1727_v46 = vadd.f32 %v1705_v48, %v1554_v32 }
 0x402   :  { %v2634_v29 = vmul.f32 -1.442695, %v1707_v39  ;;  %v2635_v43 = vmul.f32 -1.442695, %v1727_v46 }
 0x404   :  { %2755 = vpow2.f32 %v2634_v29  ;;  %v6835_v29 = vld [vmem:[#allocation19_spill] sm:$0xff] }
 0x405   :  { %2757 = vpow2.f32 %v2635_v43  ;;  %vm1986_vm14 = vcmp.eq.s32.totalorder %v6835_v29, 6 }
 0x406   :  { %v1574_v30 = vpop.f32.mrf.mxu2  ;;  %v1594_v15 = vpop.f32.mrf.mxu3 }
 0x407   :  { %v1755_v6 = vadd.f32 %v1594_v15, %v6833_v42 }
 0x408   :  { %v1614_v19 = vpop.f32.mrf.mxu0 }
 0x409   :  { %v1756_v45 = vadd.f32 %v1614_v19, %v6834_v60 }
 0x40a   :  { %v2756_v54 = vpop.eup %2755 }
 0x40b   :  { %v2758_v58 = vpop.eup %2757  ;;  %v1711_v31 = vadd.f32 1.0, %v2756_v54  ;;  %v5517_v54 = vld [vmem:[#allocation2] sm:$0xff] }
 0x40c   :  { %v1731_v24 = vadd.f32 1.0, %v2758_v58  ;;  %6836 = vst [vmem:[#allocation92_spill] sm:$0xff] %v5517_v54  ;;  %v1987_v58 = vsel %vm1986_vm14, %v5517_v54, 0.0 }
 0x40d   :  { %2759 = vrcp.f32 %v1711_v31  ;;  %1988 = vadd.xlane.f32.xlu0 %v1987_v58  ;;  %v1723_v42 = vand.u32 2147483648, %v1711_v31  ;;  %vm1717_vm0 = vweird.f32 %v1711_v31 }
 0x40e   :  { %2761 = vrcp.f32 %v1731_v24  ;;  %v1743_v16 = vand.u32 2147483648, %v1731_v24  ;;  %vm1737_vm4 = vweird.f32 %v1731_v24 }
 0x40f   :  { %v1654_v63 = vpop.f32.mrf.mxu2  ;;  %v1674_v5 = vpop.f32.mrf.mxu3  ;;  %v1724_v60 = vor.u32 1.1754944e-38, %v1723_v42 }
 0x410   :  { %v1758_v48 = vadd.f32 %v1755_v6, %v1654_v63  ;;  %v1778_v2 = vadd.f32 %v1756_v45, %v1674_v5  ;;  %v1721_v6 = vand.u32 2147483647, %v1711_v31 }
 0x412   :  { %v2636_v32 = vmul.f32 -1.442695, %v1758_v48  ;;  %v2637_v39 = vmul.f32 -1.442695, %v1778_v2  ;;  %v6837_v48 = vld [vmem:[#allocation109_spill] sm:$0xff]  ;;  %vm1722_vm2 = vcmp.eq.f32.partialorder %v1721_v6, 8.507059e+37 }
 0x413   :  { %v2760_v46 = vpop.eup %2759  ;;  %v1703_v2 = vmul.f32 %v1700_v26, %v6837_v48 }
 0x414   :  { %v2762_v43 = vpop.eup %2761  ;;  %v1713_v9 = vmul.f32 %v2760_v46, %v1711_v31  ;;  %2763 = vpow2.f32 %v2636_v32  ;;  %vm1718_vm15 = vweird.f32 %v2760_v46  ;;  %v1741_v31 = vand.u32 2147483647, %v1731_v24 }
 0x415   :  { %v1733_v38 = vmul.f32 %v2762_v43, %v1731_v24  ;;  %2765 = vpow2.f32 %v2637_v39  ;;  %vm1719_vm1 = vmor %vm1717_vm0, %vm1718_vm15  ;;  %v1747_v39 = vadd.f32 %v5271_v35, %v1574_v30  ;;  %vm1738_vm3 = vweird.f32 %v2762_v43 }
 0x416   :  { %v1714_v15 = vsub.f32 1.0, %v1713_v9  ;;  %vm1739_vm5 = vmor %vm1737_vm4, %vm1738_vm3  ;;  %vm1742_vm6 = vcmp.eq.f32.partialorder %v1741_v31, 8.507059e+37  ;;  %v1634_v31 = vpop.f32.mrf.mxu1 }
 0x417   :  { %v1734_v19 = vsub.f32 1.0, %v1733_v38 }
 0x418   :  { %v1715_v63 = vmul.f32 %v2760_v46, %v1714_v15  ;;  %v6838_v15 = vld [vmem:[#allocation110_spill] sm:$0xff] }
 0x419   :  { %v1735_v45 = vmul.f32 %v2762_v43, %v1734_v19  ;;  %v1706_v19 = vadd.f32 %v1703_v2, %v6838_v15 }
 0x41a   :  { %v2764_v5 = vpop.eup %2763  ;;  %v1716_v29 = vadd.f32 %v2760_v46, %v1715_v63 }
 0x41b   :  { %v2766_v32 = vpop.eup %2765  ;;  %v1762_v12 = vadd.f32 1.0, %v2764_v5  ;;  %v1736_v38 = vadd.f32 %v2762_v43, %v1735_v45 }
 0x41c   :  { %v1720_v54 = vsel %vm1719_vm1, %v2760_v46, %v1716_v29  ;;  %v5522_v9 = vadd.f32 1.0, %v2766_v32  ;;  %v1744_v29 = vor.u32 1.1754944e-38, %v1743_v16 }
 0x41d   :  { %v1725_v58 = vsel %vm1722_vm2, %v1724_v60, %v1720_v54  ;;  %2767 = vrcp.f32 %v1762_v12  ;;  %v1740_v46 = vsel %vm1739_vm5, %v2762_v43, %v1736_v38  ;;  %v1774_v2 = vand.u32 2147483648, %v1762_v12 }
 0x41e   :  { %v1748_v26 = vmul.f32 %v1747_v39, %v1725_v58  ;;  %2769 = vrcp.f32 %v5522_v9  ;;  %v1745_v63 = vsel %vm1742_vm6, %v1744_v29, %v1740_v46  ;;  %v1772_v39 = vand.u32 2147483647, %v1762_v12  ;;  %v5537_v29 = vld [vmem:[%s5985_s7] ss:$0 sm:$0xff] }
 0x41f   :  { %v1751_v45 = vsub.f32 1.0, %v1745_v63  ;;  %v1753_v16 = vmul.f32 %v1745_v63, %v5280_v62  ;;  %vm1768_vm8 = vweird.f32 %v1762_v12  ;;  %v1757_v63 = vadd.f32 %v1634_v31, %v4185_v23 }
 0x420   :  { %v1749_v42 = vadd.f32 %v1748_v26, %v1706_v19  ;;  %vm1773_vm10 = vcmp.eq.f32.partialorder %v1772_v39, 8.507059e+37  ;;  %vm1788_vm12 = vweird.f32 %v5522_v9 }
 0x421   :  { %v1694_v58 = vpop.f32.mrf.mxu0 }
 0x422   :  { %2771 = vtanh.f32 %v1749_v42  ;;  %v1775_v42 = vor.u32 1.1754944e-38, %v1774_v2  ;;  %v3143_v2 = vld [vmem:[#allocation8 + $0x188] sm:$0xff] }
 0x423   :  { %v2768_v35 = vpop.eup %2767 }
 0x424   :  { %v5526_v30 = vpop.eup %2769  ;;  %v1764_v60 = vmul.f32 %v2768_v35, %v1762_v12  ;;  %vm1769_vm7 = vweird.f32 %v2768_v35 }
 0x425   :  { %v1784_v54 = vmul.f32 %v5526_v30, %v5522_v9  ;;  %vm1770_vm9 = vmor %vm1768_vm8, %vm1769_vm7  ;;  %vm1789_vm11 = vweird.f32 %v5526_v30 }
 0x426   :  { %v1765_v6 = vsub.f32 1.0, %v1764_v60  ;;  %v1798_v60 = vadd.f32 %v5537_v29, %v1694_v58  ;;  %vm5551_vm13 = vmor %vm1788_vm12, %vm1789_vm11 }
 0x427   :  { %v1785_v5 = vsub.f32 1.0, %v1784_v54  ;;  %v1794_v54 = vand.u32 2147483648, %v5522_v9 }
 0x428   :  { %v2772_v32 = vpop.eup %2771  ;;  %v1766_v24 = vmul.f32 %v2768_v35, %v1765_v6  ;;  %v1792_v6 = vand.u32 2147483647, %v5522_v9 }
 0x429   :  { %v1752_v43 = vmul.f32 %v2772_v32, %v1751_v45  ;;  %v1786_v38 = vmul.f32 %v5526_v30, %v1785_v5  ;;  %v3120_v45 = vld [vmem:[#allocation8 + $0x2d0] sm:$0xff]  ;;  %v3121_v32 = vld [vmem:[#allocation8 + $0x2d8] sm:$0xff]  ;;  %v1795_v9 = vor.u32 1.1754944e-38, %v1794_v54  ;;  %v3136_v54 = vld [vmem:[#allocation8 + $0x1e8] sm:$0xff] }
 0x42a   :  { %v1767_v19 = vadd.f32 %v2768_v35, %v1766_v24  ;;  %v3122_v24 = vld [vmem:[#allocation8 + $0x2e0] sm:$0xff]  ;;  %vm1793_vm14 = vcmp.eq.f32.partialorder %v1792_v6, 8.507059e+37  ;;  %v3137_v6 = vld [vmem:[#allocation8 + $0x1b0] sm:$0xff] }
 0x42b   :  { %v5532_v26 = vadd.f32 %v1753_v16, %v1752_v43  ;;  %v1787_v12 = vadd.f32 %v5526_v30, %v1786_v38  ;;  %v3124_v43 = vld [vmem:[#allocation8 + $0x2a8] sm:$0xff]  ;;  %v3125_v16 = vld [vmem:[#allocation8 + $0x2b0] sm:$0xff] }
 0x42c   :  { %v1771_v46 = vsel %vm1770_vm9, %v2768_v35, %v1767_v19  ;;  %v3126_v38 = vld [vmem:[#allocation8 + $0x270] sm:$0xff]  ;;  %v3127_v19 = vld [vmem:[#allocation8 + $0x278] sm:$0xff] }
 0x42d   :  { %v1776_v62 = vsel %vm1773_vm10, %v1775_v42, %v1771_v46  ;;  %1822 = vmatmul.f32.vlgmr.msrb.gmra.mxu1 %v5532_v26  ;;  %1842 = vmatmul.f32.vlgmr.msrb.gmra.mxu2 %v5532_v26  ;;  %v1791_v39 = vsel %vm5551_vm13, %v5526_v30, %v1787_v12  ;;  %v3129_v30 = vld [vmem:[#allocation8 + $0x240] sm:$0xff]  ;;  %v3131_v46 = vld [vmem:[#allocation8 + $0x210] sm:$0xff]  ;;  %v3133_v12 = vld [vmem:[#allocation8 + $0x218] sm:$0xff] }
 0x42e   :  { %v1799_v35 = vmul.f32 %v1798_v60, %v1776_v62  ;;  %1862 = vmatmul.f32.vlgmr.msrb.gmra.mxu3 %v5532_v26  ;;  %1882 = vmatmul.f32.vlgmr.msra.gmra.mxu0 %v5532_v26  ;;  %v1796_v58 = vsel %vm1793_vm14, %v1795_v9, %v1791_v39  ;;  %v3132_v60 = vld [vmem:[#allocation8 + $0x250] sm:$0xff]  ;;  %v3146_v39 = vld [vmem:[#allocation8 + $0x158] sm:$0xff]  ;;  %v3149_v9 = vld [vmem:[#allocation8 + $0x128] sm:$0xff] }
 0x42f   :  { %1966 = vmatpush.msrb.mxu1 %v5286_v44  ;;  %2095 = vmatpush.msrb.mxu2 %v3120_v45  ;;  %v3123_v44 = vld [vmem:[#allocation8 + $0x2a0] sm:$0xff]  ;;  %v1802_v31 = vsub.f32 1.0, %v1796_v58  ;;  %v3138_v45 = vld [vmem:[#allocation8 + $0x1f0] sm:$0xff] }
 0x430   :  { %v1800_v5 = vadd.f32 %v1799_v35, %v1757_v63  ;;  %2115 = vmatpush.msrb.mxu3 %v3121_v32  ;;  %2135 = vmatpush.msra.mxu0 %v3122_v24  ;;  %v3134_v63 = vld [vmem:[#allocation8 + $0x1e0] sm:$0xff]  ;;  %v3144_v32 = vld [vmem:[#allocation8 + $0x190] sm:$0xff] }
 0x431   :  { %1967 = vmatpush.msrb.mxu1 %v5292_v0  ;;  %2096 = vmatpush.msrb.mxu2 %v3123_v44  ;;  %v3128_v0 = vld [vmem:[#allocation8 + $0x280] sm:$0xff]  ;;  %v3148_v44 = vld [vmem:[#allocation8 + $0xf0] sm:$0xff] }
 0x432   :  { %2773 = vtanh.f32 %v1800_v5  ;;  %2116 = vmatpush.msrb.mxu3 %v3124_v43  ;;  %2136 = vmatpush.msra.mxu0 %v3125_v16  ;;  %v3135_v35 = vld [vmem:[#allocation8 + $0x220] sm:$0xff]  ;;  %v3152_v16 = vld [vmem:[#allocation8 + $0xf8] sm:$0xff] }
 0x433   :  { %1968 = vmatpush.msrb.mxu1 %v5298_v4  ;;  %2097 = vmatpush.msrb.mxu2 %v3126_v38  ;;  %v3130_v4 = vld [vmem:[#allocation8 + $0x248] sm:$0xff]  ;;  %v3141_v5 = vld [vmem:[#allocation8 + $0x1c0] sm:$0xff]  ;;  %v3154_v38 = vld [vmem:[#allocation8 + $0x90] sm:$0xff] }
 0x434   :  { %2117 = vmatpush.msrb.mxu3 %v3127_v19  ;;  %2137 = vmatpush.msra.mxu0 %v3128_v0  ;;  %v3145_v24 = vld [vmem:[#allocation8 + $0x120] sm:$0xff]  ;;  %v3158_v0 = vld [vmem:[#allocation8 + $0x98] sm:$0xff] }
 0x435   :  { %1969 = vmatpush.msrb.mxu1 %v5305_v1  ;;  %1922 = vmatmul.f32.vlgmr.msra.gmra.mxu2 %v5532_v26  ;;  %v1804_v1 = vmul.f32 %v1796_v58, %v5309_v51  ;;  %v3139_v51 = vld [vmem:[#allocation8 + $0x180] sm:$0xff]  ;;  %v3155_v58 = vld [vmem:[#allocation8 + $0xc8] sm:$0xff] }
 0x436   :  { %1902 = vmatmul.f32.vlgmr.msra.gmra.mxu1 %v5532_v26  ;;  %2098 = vmatpush.msrb.mxu2 %v3129_v30  ;;  %v3151_v43 = vld [vmem:[#allocation8 + $0xc0] sm:$0xff]  ;;  %v3160_v30 = vld [vmem:[#allocation8 + $0x30] sm:$0xff] }
 0x437   :  { %1970 = vmatpush.msrb.mxu1 %v5315_v59  ;;  %2118 = vmatpush.msrb.mxu3 %v3130_v4  ;;  %v3157_v19 = vld [vmem:[#allocation8 + $0x60] sm:$0xff] }
 0x438   :  { %v2774_v42 = vpop.eup %2773  ;;  %2099 = vmatpush.msrb.mxu2 %v3131_v46  ;;  %2138 = vmatpush.msra.mxu0 %v3132_v60  ;;  %v3163_v4 = vld [vmem:[#allocation8] sm:$0xff] }
 0x439   :  { %1971 = vmatpush.msrb.mxu1 %v5321_v18  ;;  %v1803_v62 = vmul.f32 %v2774_v42, %v1802_v31  ;;  %2119 = vmatpush.msrb.mxu3 %v3133_v12  ;;  %v3140_v18 = vld [vmem:[#allocation8 + $0x1b8] sm:$0xff]  ;;  %v3161_v31 = vld [vmem:[#allocation8 + $0x68] sm:$0xff]  ;;  %v5587_v46 = vld [vmem:[#allocation8 + $0x2c0] sm:$0xff] }
 0x43a   :  { %2100 = vmatpush.msrb.mxu2 %v3134_v63  ;;  %2139 = vmatpush.msra.mxu0 %v3135_v35  ;;  %v5584_v42 = vld [vmem:[#allocation8 + $0x2e8] sm:$0xff]  ;;  %v3168_v60 = vld [vmem:[#allocation8 + $0x40] sm:$0xff]  ;;  %v5596_v12 = vld [vmem:[#allocation8 + $0x2f8] sm:$0xff] }
 0x43b   :  { %1972 = vmatpush.msrb.mxu1 %v5327_v50  ;;  %v5567_v59 = vadd.f32 %v1804_v1, %v1803_v62  ;;  %2120 = vmatpush.msrb.mxu3 %v3136_v54  ;;  %v3142_v50 = vld [vmem:[#allocation8 + $0x150] sm:$0xff]  ;;  %v3170_v62 = vld [vmem:[#allocation8 + $0x8] sm:$0xff]  ;;  %v5602_v54 = vld [vmem:[#allocation8 + $0x260] sm:$0xff] }
 0x43c   :  { %2101 = vmatpush.msrb.mxu2 %v3137_v6  ;;  %2140 = vmatpush.msra.mxu0 %v3138_v45  ;;  %v5593_v1 = vld [vmem:[#allocation8 + $0x290] sm:$0xff]  ;;  %v5599_v63 = vld [vmem:[#allocation8 + $0x288] sm:$0xff]  ;;  %v5608_v45 = vld [vmem:[#allocation8 + $0x258] sm:$0xff] }
 0x43d   :  { %1942 = vmatmul.f32.vlgmr.msra.gmra.mxu3 %v5567_v59  ;;  %1962 = vmatmul.f32.vlgmr.msrb.gmra.mxu0 %v5567_v59  ;;  %v3174_v35 = vld [vmem:[#allocation8 + $0x10] sm:$0xff]  ;;  %v5605_v6 = vld [vmem:[#allocation8 + $0x2c8] sm:$0xff] }
 0x43e   :  { %1973 = vmatpush.msrb.mxu1 %v5333_v55  ;;  %2102 = vmatpush.msrb.mxu2 %v3139_v51  ;;  %v3147_v55 = vld [vmem:[#allocation8 + $0x160] sm:$0xff]  ;;  %v5611_v51 = vld [vmem:[#allocation10 + $0x168] sm:$0xff] }
 0x43f   :  { %2121 = vmatpush.msrb.mxu3 %v3140_v18  ;;  %2141 = vmatpush.msra.mxu0 %v3141_v5  ;;  %6841 = vst [vmem:[#allocation96_spill] sm:$0xff] %v5611_v51  ;;  %v5614_v18 = vld [vmem:[#allocation8 + $0x230] sm:$0xff]  ;;  %v5617_v5 = vld [vmem:[#allocation8 + $0x298] sm:$0xff] }
 0x440   :  { %1974 = vmatpush.msrb.mxu1 %v5339_v40  ;;  %2103 = vmatpush.msrb.mxu2 %v3142_v50  ;;  %v3150_v40 = vld [vmem:[#allocation8 + $0x130] sm:$0xff]  ;;  %v5620_v50 = vld [vmem:[#allocation8 + $0x228] sm:$0xff] }
 0x441   :  { %2122 = vmatpush.msrb.mxu3 %v3143_v2  ;;  %2142 = vmatpush.msra.mxu0 %v3144_v32  ;;  %v5623_v2 = vld [vmem:[#allocation10 + $0x150] sm:$0xff]  ;;  %v5626_v32 = vld [vmem:[#allocation8 + $0x200] sm:$0xff] }
 0x442   :  { %1975 = vmatpush.msrb.mxu1 %v5345_v49  ;;  %2104 = vmatpush.msrb.mxu2 %v3145_v24  ;;  %v3153_v49 = vld [vmem:[#allocation8 + $0x100] sm:$0xff]  ;;  %6842 = vst [vmem:[#allocation100_spill] sm:$0xff] %v5623_v2  ;;  %v5629_v24 = vld [vmem:[#allocation8 + $0x268] sm:$0xff] }
 0x443   :  { %2123 = vmatpush.msrb.mxu3 %v3146_v39  ;;  %2143 = vmatpush.msra.mxu0 %v3147_v55  ;;  %v5632_v39 = vld [vmem:[#allocation8 + $0x1f8] sm:$0xff] }
 0x444   :  { %1976 = vmatpush.msrb.mxu1 %v5351_v11  ;;  %2105 = vmatpush.msrb.mxu2 %v3148_v44  ;;  %v3156_v11 = vld [vmem:[#allocation8 + $0xd0] sm:$0xff]  ;;  %v5635_v55 = vld [vmem:[#allocation10 + $0x138] sm:$0xff] }
 0x445   :  { %2124 = vmatpush.msrb.mxu3 %v3149_v9  ;;  %2144 = vmatpush.msra.mxu0 %v3150_v40  ;;  %6843 = vst [vmem:[#allocation104_spill] sm:$0xff] %v5635_v55  ;;  %v5638_v44 = vld [vmem:[#allocation8 + $0x1d0] sm:$0xff]  ;;  %v5641_v9 = vld [vmem:[#allocation8 + $0x238] sm:$0xff]  ;;  %v5644_v40 = vld [vmem:[#allocation8 + $0x1c8] sm:$0xff] }
 0x446   :  { %1977 = vmatpush.msrb.mxu1 %v5357_v22  ;;  %2106 = vmatpush.msrb.mxu2 %v3151_v43  ;;  %v3159_v22 = vld [vmem:[#allocation8 + $0xa0] sm:$0xff] }
 0x447   :  { %2125 = vmatpush.msrb.mxu3 %v3152_v16  ;;  %2145 = vmatpush.msra.mxu0 %v3153_v49  ;;  %v5647_v43 = vld [vmem:[#allocation10 + $0x120] sm:$0xff]  ;;  %v5653_v49 = vld [vmem:[#allocation8 + $0x208] sm:$0xff] }
 0x448   :  { %1978 = vmatpush.msrb.mxu1 %v5363_v52  ;;  %2107 = vmatpush.msrb.mxu2 %v3154_v38  ;;  %v3162_v52 = vld [vmem:[#allocation8 + $0x70] sm:$0xff]  ;;  %6844 = vst [vmem:[#allocation108_spill] sm:$0xff] %v5647_v43  ;;  %v5650_v16 = vld [vmem:[#allocation8 + $0x1a0] sm:$0xff]  ;;  %v5656_v38 = vld [vmem:[#allocation8 + $0x198] sm:$0xff] }
 0x449   :  { %2126 = vmatpush.msrb.mxu3 %v3155_v58  ;;  %2146 = vmatpush.msra.mxu0 %v3156_v11  ;;  %v5659_v58 = vld [vmem:[#allocation10 + $0x108] sm:$0xff]  ;;  %v5662_v11 = vld [vmem:[#allocation8 + $0x170] sm:$0xff] }
 0x44a   :  { %1979 = vmatpush.msrb.mxu1 %v5369_v25  ;;  %2108 = vmatpush.msrb.mxu2 %v3157_v19  ;;  %v5581_v25 = vld [vmem:[#allocation8 + $0x2f0] sm:$0xff]  ;;  %6845 = vst [vmem:[#allocation37_spill] sm:$0xff] %v5659_v58  ;;  %v5665_v19 = vld [vmem:[#allocation8 + $0x1d8] sm:$0xff] }
 0x44b   :  { %2127 = vmatpush.msrb.mxu3 %v3158_v0  ;;  %2147 = vmatpush.msra.mxu0 %v3159_v22  ;;  %v5668_v0 = vld [vmem:[#allocation8 + $0x168] sm:$0xff]  ;;  %v5671_v22 = vld [vmem:[#allocation10 + $0xf0] sm:$0xff] }
 0x44c   :  { %1980 = vmatpush.msrb.mxu1 %v5375_v56  ;;  %2109 = vmatpush.msrb.mxu2 %v3160_v30  ;;  %v3166_v56 = vld [vmem:[#allocation8 + $0x38] sm:$0xff]  ;;  %6846 = vst [vmem:[#allocation41_spill] sm:$0xff] %v5671_v22  ;;  %v5675_v30 = vld [vmem:[#allocation8 + $0x1a8] sm:$0xff] }
 0x44d   :  { %2128 = vmatpush.msrb.mxu3 %v3161_v31  ;;  %2148 = vmatpush.msra.mxu0 %v3162_v52  ;;  %v5678_v31 = vld [vmem:[#allocation8 + $0x138] sm:$0xff] }
 0x44e   :  { %1981 = vmatpush.msrb.mxu1 %v5381_v21  ;;  %2110 = vmatpush.msrb.mxu2 %v3163_v4  ;;  %v5590_v21 = vld [vmem:[#allocation8 + $0x2b8] sm:$0xff] }
 0x44f   :  { %1982 = vmatmul.f32.vlgmr.msrb.gmra.mxu1 %v5567_v59  ;;  %2129 = vmatpush.msrb.mxu3 %v3166_v56  ;;  %v5681_v52 = vld [vmem:[#allocation10 + $0xd8] sm:$0xff]  ;;  %v5688_v56 = vld [vmem:[#allocation8 + $0x108] sm:$0xff] }
 0x450   :  { %2175 = vmatpush.msra.mxu2 %v5581_v25  ;;  %2155 = vmatpush.msra.mxu1 %v5584_v42  ;;  %6847 = vst [vmem:[#allocation38_spill] sm:$0xff] %v5681_v52  ;;  %v5685_v4 = vld [vmem:[#allocation8 + $0x178] sm:$0xff] }
 0x451   :  { %2149 = vmatpush.msra.mxu0 %v3168_v60  ;;  %2130 = vmatpush.msrb.mxu3 %v3170_v62  ;;  %v5691_v60 = vld [vmem:[#allocation10 + $0xc0] sm:$0xff]  ;;  %v5696_v62 = vld [vmem:[#allocation8 + $0xd8] sm:$0xff] }
 0x452   :  { %2176 = vmatpush.msra.mxu2 %v5587_v46  ;;  %2156 = vmatpush.msra.mxu1 %v5590_v21  ;;  %6848 = vst [vmem:[#allocation20_spill] sm:$0xff] %v5691_v60 }
 0x453   :  { %2195 = vmatpush.msra.mxu3 %v5596_v12  ;;  %2150 = vmatpush.msra.mxu0 %v3174_v35  ;;  %v5699_v35 = vld [vmem:[#allocation10 + $0xa8] sm:$0xff] }
 0x454   :  { %2177 = vmatpush.msra.mxu2 %v5593_v1  ;;  %2157 = vmatpush.msra.mxu1 %v5599_v63  ;;  %6849 = vst [vmem:[#allocation42_spill] sm:$0xff] %v5699_v35 }
 0x455   :  { %2196 = vmatpush.msra.mxu3 %v5605_v6  ;;  %2215 = vmatpush.msrb.mxu0 %v5611_v51 }
 0x456   :  { %2178 = vmatpush.msra.mxu2 %v5602_v54  ;;  %2158 = vmatpush.msra.mxu1 %v5608_v45 }
 0x457   :  { %2197 = vmatpush.msra.mxu3 %v5617_v5  ;;  %2216 = vmatpush.msrb.mxu0 %v5623_v2 }
 0x458   :  { %2179 = vmatpush.msra.mxu2 %v5614_v18  ;;  %2159 = vmatpush.msra.mxu1 %v5620_v50 }
 0x459   :  { %2198 = vmatpush.msra.mxu3 %v5629_v24  ;;  %2217 = vmatpush.msrb.mxu0 %v5635_v55  ;;  %v5737_v55 = vld [vmem:[#allocation10 + $0x158] sm:$0xff] }
 0x45a   :  { %2180 = vmatpush.msra.mxu2 %v5626_v32  ;;  %2160 = vmatpush.msra.mxu1 %v5632_v39  ;;  %6858 = vst [vmem:[#allocation23_spill] sm:$0xff] %v5737_v55 }
 0x45b   :  { %2199 = vmatpush.msra.mxu3 %v5641_v9  ;;  %2218 = vmatpush.msrb.mxu0 %v5647_v43  ;;  %v5728_v43 = vld [vmem:[#allocation8 + $0x18] sm:$0xff] }
 0x45c   :  { %2181 = vmatpush.msra.mxu2 %v5638_v44  ;;  %2161 = vmatpush.msra.mxu1 %v5644_v40  ;;  %6856 = vst [vmem:[#allocation53_spill] sm:$0xff] %v5728_v43 }
 0x45d   :  { %2200 = vmatpush.msra.mxu3 %v5653_v49  ;;  %2219 = vmatpush.msrb.mxu0 %v5659_v58  ;;  %v5720_v58 = vld [vmem:[#allocation8 + $0x48] sm:$0xff] }
 0x45e   :  { %2182 = vmatpush.msra.mxu2 %v5650_v16  ;;  %2162 = vmatpush.msra.mxu1 %v5656_v38  ;;  %6854 = vst [vmem:[#allocation22_spill] sm:$0xff] %v5720_v58 }
 0x45f   :  { %2201 = vmatpush.msra.mxu3 %v5665_v19  ;;  %2220 = vmatpush.msrb.mxu0 %v5671_v22  ;;  %v5712_v22 = vld [vmem:[#allocation8 + $0x78] sm:$0xff] }
 0x460   :  { %2183 = vmatpush.msra.mxu2 %v5662_v11  ;;  %2163 = vmatpush.msra.mxu1 %v5668_v0  ;;  %6852 = vst [vmem:[#allocation21_spill] sm:$0xff] %v5712_v22 }
 0x461   :  { %2202 = vmatpush.msra.mxu3 %v5675_v30  ;;  %2221 = vmatpush.msrb.mxu0 %v5681_v52  ;;  %v5704_v52 = vld [vmem:[#allocation8 + $0xa8] sm:$0xff] }
 0x462   :  { %2184 = vmatpush.msra.mxu2 %v5421_v13  ;;  %2164 = vmatpush.msra.mxu1 %v5678_v31  ;;  %6850 = vst [vmem:[#allocation45_spill] sm:$0xff] %v5704_v52 }
 0x463   :  { %2203 = vmatpush.msra.mxu3 %v5685_v4  ;;  %2222 = vmatpush.msrb.mxu0 %v5691_v60  ;;  %v5707_v60 = vld [vmem:[#allocation10 + $0x90] sm:$0xff] }
 0x464   :  { %2185 = vmatpush.msra.mxu2 %v5427_v7  ;;  %2165 = vmatpush.msra.mxu1 %v5688_v56  ;;  %6851 = vst [vmem:[#allocation39_spill] sm:$0xff] %v5707_v60 }
 0x465   :  { %2204 = vmatpush.msra.mxu3 %v5436_v37  ;;  %2223 = vmatpush.msrb.mxu0 %v5699_v35  ;;  %v5715_v35 = vld [vmem:[#allocation10 + $0x78] sm:$0xff] }
 0x466   :  { %2186 = vmatpush.msra.mxu2 %v5433_v34  ;;  %2166 = vmatpush.msra.mxu1 %v5696_v62  ;;  %6853 = vst [vmem:[#allocation46_spill] sm:$0xff] %v5715_v35 }
 0x467   :  { %2205 = vmatpush.msra.mxu3 %v5444_v3  ;;  %2224 = vmatpush.msrb.mxu0 %v5707_v60  ;;  %v5723_v60 = vld [vmem:[#allocation10 + $0x60] sm:$0xff] }
 0x468   :  { %2187 = vmatpush.msra.mxu2 %v5441_v20  ;;  %2167 = vmatpush.msra.mxu1 %v5704_v52  ;;  %6855 = vst [vmem:[#allocation51_spill] sm:$0xff] %v5723_v60 }
 0x469   :  { %2206 = vmatpush.msra.mxu3 %v5452_v10  ;;  %2225 = vmatpush.msrb.mxu0 %v5715_v35  ;;  %v5732_v35 = vld [vmem:[#allocation10 + $0x170] sm:$0xff] }
 0x46a   :  { %2188 = vmatpush.msra.mxu2 %v5449_v41  ;;  %2168 = vmatpush.msra.mxu1 %v5712_v22  ;;  %6857 = vst [vmem:[#allocation57_spill] sm:$0xff] %v5732_v35  ;;  %v6876_v22 = vld [vmem:[#allocation35_spill] sm:$0xff] }
 0x46b   :  { %2207 = vmatpush.msra.mxu3 %v5460_v14  ;;  %2226 = vmatpush.msrb.mxu0 %v5723_v60  ;;  %v5742_v60 = vld [vmem:[#allocation10 + $0x140] sm:$0xff] }
 0x46c   :  { %2189 = vmatpush.msra.mxu2 %v5457_v27  ;;  %2169 = vmatpush.msra.mxu1 %v5720_v58  ;;  %6859 = vst [vmem:[#allocation52_spill] sm:$0xff] %v5742_v60  ;;  %v6875_v27 = vld [vmem:[#allocation56_spill] sm:$0xff] }
 0x46d   :  { %2208 = vmatpush.msra.mxu3 %v5468_v53  ;;  %2227 = vmatpush.msrb.mxu0 %v5472_v36  ;;  %v5746_v36 = vld [vmem:[#allocation10 + $0x128] sm:$0xff] }
 0x46e   :  { %2190 = vmatpush.msra.mxu2 %v5465_v61  ;;  %2170 = vmatpush.msra.mxu1 %v5728_v43  ;;  %6860 = vst [vmem:[#allocation43_spill] sm:$0xff] %v5746_v36 }
 0x46f   :  { %2209 = vmatpush.msra.mxu3 %v5476_v47  ;;  %2228 = vmatpush.msrb.mxu0 %v5479_v17  ;;  %v5749_v47 = vld [vmem:[#allocation10 + $0x110] sm:$0xff]  ;;  %v5752_v17 = vld [vmem:[#allocation10 + $0xf8] sm:$0xff] }
 0x470   :  { %2235 = vmatpush.msrb.mxu1 %v5732_v35  ;;  %6861 = vst [vmem:[#allocation61_spill] sm:$0xff] %v5749_v47  ;;  %v6874_v35 = vld [vmem:[#allocation50_spill] sm:$0xff] }
 0x471   :  { %2210 = vmatpush.msra.mxu3 %v5483_v28  ;;  %2229 = vmatpush.msrb.mxu0 %v5486_v8  ;;  %6862 = vst [vmem:[#allocation59_spill] sm:$0xff] %v5752_v17  ;;  %v5755_v28 = vld [vmem:[#allocation10 + $0xe0] sm:$0xff]  ;;  %v5758_v8 = vld [vmem:[#allocation10 + $0xc8] sm:$0xff] }
 0x472   :  { %2236 = vmatpush.msrb.mxu1 %v5737_v55  ;;  %6863 = vst [vmem:[#allocation24_spill] sm:$0xff] %v5755_v28 }
 0x473   :  { %2230 = vmatpush.msrb.mxu0 %v5490_v33  ;;  %6864 = vst [vmem:[#allocation47_spill] sm:$0xff] %v5758_v8  ;;  %v5761_v33 = vld [vmem:[#allocation10 + $0xb0] sm:$0xff] }
 0x474   :  { %2237 = vmatpush.msrb.mxu1 %v5742_v60  ;;  %6865 = vst [vmem:[#allocation65_spill] sm:$0xff] %v5761_v33  ;;  %v6872_v60 = vld [vmem:[#allocation49_spill] sm:$0xff] }
 0x476   :  { %2238 = vmatpush.msrb.mxu1 %v5746_v36  ;;  %v5764_v36 = vld [vmem:[#allocation10 + $0x98] sm:$0xff] }
 0x477   :  { %6866 = vst [vmem:[#allocation58_spill] sm:$0xff] %v5764_v36 }
 0x478   :  { %2239 = vmatpush.msrb.mxu1 %v5749_v47  ;;  %v5767_v47 = vld [vmem:[#allocation10 + $0x80] sm:$0xff] }
 0x479   :  { %6867 = vst [vmem:[#allocation25_spill] sm:$0xff] %v5767_v47 }
 0x47a   :  { %2240 = vmatpush.msrb.mxu1 %v5752_v17  ;;  %v5770_v17 = vld [vmem:[#allocation10 + $0x68] sm:$0xff] }
 0x47b   :  { %6868 = vst [vmem:[#allocation63_spill] sm:$0xff] %v5770_v17 }
 0x47c   :  { %2241 = vmatpush.msrb.mxu1 %v5755_v28  ;;  %v5773_v28 = vld [vmem:[#allocation10 + $0x50] sm:$0xff] }
 0x47d   :  { %6869 = vst [vmem:[#allocation69_spill] sm:$0xff] %v5773_v28 }
 0x47e   :  { %2242 = vmatpush.msrb.mxu1 %v5758_v8  ;;  %v5776_v8 = vld [vmem:[#allocation10 + $0x38] sm:$0xff] }
 0x47f   :  { %6870 = vst [vmem:[#allocation62_spill] sm:$0xff] %v5776_v8 }
 0x480   :  { %2243 = vmatpush.msrb.mxu1 %v5761_v33  ;;  %v6871_v33 = vld [vmem:[#allocation88_spill] sm:$0xff] }
 0x482   :  { %2244 = vmatpush.msrb.mxu1 %v5764_v36  ;;  %v1989_v36 = vpop.xlane.xlu0 %1988 }
 0x483   :  { %v1990_v55 = vmul.f32 %v1989_v36, %v6872_v60  ;;  %v1991_v51 = vmul.f32 %v1989_v36, %v6874_v35 }
 0x484   :  { %2245 = vmatpush.msrb.mxu1 %v5767_v47  ;;  %v6873_v47 = vld [vmem:[#allocation55_spill] sm:$0xff] }
 0x485   :  { %v1993_v2 = vadd.f32 %v1990_v55, %v6873_v47 }
 0x486   :  { %2246 = vmatpush.msrb.mxu1 %v5770_v17 }
 0x488   :  { %2247 = vmatpush.msrb.mxu1 %v5773_v28  ;;  %v1994_v28 = vadd.f32 %v1991_v51, %v6875_v27  ;;  %v6877_v51 = vld [vmem:[#allocation34_spill] sm:$0xff] }
 0x48a   :  { %2248 = vmatpush.msrb.mxu1 %v5776_v8 }
 0x48c   :  { %2249 = vmatpush.msrb.mxu1 %v5504_v57 }
 0x48e   :  { %2250 = vmatpush.msrb.mxu1 %v6871_v33 }
 0x4aa   :  { %v1823_v17 = vpop.f32.mrf.mxu1 }
 0x4ab   :  { %v1996_v61 = vadd.f32 %v1993_v2, %v1823_v17  ;;  %v1883_v8 = vpop.f32.mrf.mxu0 }
 0x4ad   :  { %v2638_v43 = vmul.f32 -1.442695, %v1996_v61 }
 0x4af   :  { %2775 = vpow2.f32 %v2638_v43  ;;  %v2044_v43 = vadd.f32 %v1883_v8, %v6877_v51 }
 0x4b0   :  { %v1843_v53 = vpop.f32.mrf.mxu2 }
 0x4b1   :  { %v2016_v58 = vadd.f32 %v1994_v28, %v1843_v53  ;;  %v1863_v60 = vpop.f32.mrf.mxu3 }
 0x4b3   :  { %v2639_v41 = vmul.f32 -1.442695, %v2016_v58  ;;  %v1903_v14 = vpop.f32.mrf.mxu1 }
 0x4b4   :  { %v2045_v55 = vadd.f32 %v1903_v14, %v6876_v22  ;;  %v1992_v22 = vmul.f32 %v1989_v36, %v6837_v48  ;;  %v5795_v36 = vld [vmem:[%s5983_s5] ss:$0 sm:$0xff] }
 0x4b5   :  { %v2776_v57 = vpop.eup %2775  ;;  %2777 = vpow2.f32 %v2639_v41 }
 0x4b6   :  { %v2000_v33 = vadd.f32 1.0, %v2776_v57 }
 0x4b8   :  { %2779 = vrcp.f32 %v2000_v33  ;;  %v2012_v57 = vand.u32 2147483648, %v2000_v33  ;;  %v2010_v10 = vand.u32 2147483647, %v2000_v33  ;;  %vm2006_vm1 = vweird.f32 %v2000_v33 }
 0x4ba   :  { %v1963_v47 = vpop.f32.mrf.mxu0  ;;  %v2013_v8 = vor.u32 1.1754944e-38, %v2012_v57  ;;  %vm2011_vm3 = vcmp.eq.f32.partialorder %v2010_v10, 8.507059e+37 }
 0x4bb   :  { %v2778_v35 = vpop.eup %2777  ;;  %v2067_v20 = vadd.f32 %v2045_v55, %v1963_v47  ;;  %v6878_v47 = vld [vmem:[#allocation19_spill] sm:$0xff] }
 0x4bc   :  { %v2020_v2 = vadd.f32 1.0, %v2778_v35  ;;  %vm2275_vm0 = vcmp.eq.s32.totalorder %v6878_v47, 7 }
 0x4bd   :  { %v2641_v61 = vmul.f32 -1.442695, %v2067_v20 }
 0x4be   :  { %v2780_v17 = vpop.eup %2779  ;;  %2781 = vrcp.f32 %v2020_v2  ;;  %vm2026_vm5 = vweird.f32 %v2020_v2 }
 0x4bf   :  { %v2002_v53 = vmul.f32 %v2780_v17, %v2000_v33  ;;  %2783 = vpow2.f32 %v2641_v61  ;;  %vm2007_vm15 = vweird.f32 %v2780_v17 }
 0x4c0   :  { %v1943_v28 = vpop.f32.mrf.mxu3  ;;  %vm2008_vm2 = vmor %vm2006_vm1, %vm2007_vm15 }
 0x4c1   :  { %v2003_v58 = vsub.f32 1.0, %v2002_v53  ;;  %v2047_v41 = vadd.f32 %v2044_v43, %v1943_v28  ;;  %v6879_v43 = vld [vmem:[#allocation92_spill] sm:$0xff] }
 0x4c2   :  { %v2276_v53 = vsel %vm2275_vm0, %v6879_v43, 0.0 }
 0x4c3   :  { %v2004_v27 = vmul.f32 %v2780_v17, %v2003_v58  ;;  %v2640_v52 = vmul.f32 -1.442695, %v2047_v41  ;;  %v2036_v41 = vadd.f32 %v5795_v36, %v1863_v60  ;;  %2277 = vadd.xlane.f32.xlu1 %v2276_v53 }
 0x4c4   :  { %v2782_v14 = vpop.eup %2781 }
 0x4c5   :  { %v2784_v20 = vpop.eup %2783  ;;  %v2022_v35 = vmul.f32 %v2782_v14, %v2020_v2  ;;  %v2005_v55 = vadd.f32 %v2780_v17, %v2004_v27  ;;  %2785 = vpow2.f32 %v2640_v52  ;;  %v1995_v27 = vadd.f32 %v1992_v22, %v6838_v15 }
 0x4c6   :  { %v5789_v61 = vadd.f32 1.0, %v2784_v20  ;;  %v2032_v52 = vand.u32 2147483648, %v2020_v2  ;;  %vm2027_vm4 = vweird.f32 %v2782_v14  ;;  %v2030_v20 = vand.u32 2147483647, %v2020_v2 }
 0x4c7   :  { %v2023_v28 = vsub.f32 1.0, %v2022_v35  ;;  %v2009_v58 = vsel %vm2008_vm2, %v2780_v17, %v2005_v55  ;;  %vm2028_vm6 = vmor %vm2026_vm5, %vm2027_vm4 }
 0x4c8   :  { %v2014_v33 = vsel %vm2011_vm3, %v2013_v8, %v2009_v58  ;;  %2787 = vrcp.f32 %v5789_v61  ;;  %v2033_v43 = vor.u32 1.1754944e-38, %v2032_v52  ;;  %vm2031_vm7 = vcmp.eq.f32.partialorder %v2030_v20, 8.507059e+37 }
 0x4c9   :  { %v2024_v57 = vmul.f32 %v2782_v14, %v2023_v28  ;;  %v2037_v47 = vmul.f32 %v2036_v41, %v2014_v33  ;;  %vm2077_vm13 = vweird.f32 %v5789_v61 }
 0x4cb   :  { %v2786_v17 = vpop.eup %2785  ;;  %v2025_v10 = vadd.f32 %v2782_v14, %v2024_v57  ;;  %v2038_v35 = vadd.f32 %v2037_v47, %v1995_v27 }
 0x4cc   :  { %v2051_v55 = vadd.f32 1.0, %v2786_v17  ;;  %v5812_v17 = vld [vmem:[#allocation10 + $0x178] sm:$0xff] }
 0x4cd   :  { %v2029_v48 = vsel %vm2028_vm6, %v2782_v14, %v2025_v10  ;;  %2789 = vtanh.f32 %v2038_v35  ;;  %v1923_v35 = vpop.f32.mrf.mxu2 }
 0x4ce   :  { %2791 = vrcp.f32 %v2051_v55  ;;  %v5800_v22 = vpop.eup %2787  ;;  %v2034_v60 = vsel %vm2031_vm7, %v2033_v43, %v2029_v48  ;;  %v2063_v57 = vand.u32 2147483648, %v2051_v55  ;;  %v2061_v47 = vand.u32 2147483647, %v2051_v55 }
 0x4cf   :  { %v2040_v8 = vsub.f32 1.0, %v2034_v60  ;;  %v2073_v53 = vmul.f32 %v5800_v22, %v5789_v61  ;;  %v2042_v2 = vmul.f32 %v2034_v60, %v5532_v26  ;;  %v1983_v26 = vpop.f32.mrf.mxu1  ;;  %vm2057_vm9 = vweird.f32 %v2051_v55  ;;  %v5818_v60 = vld [vmem:[#allocation10 + $0x160] sm:$0xff] }
 0x4d0   :  { %v2064_v43 = vor.u32 1.1754944e-38, %v2063_v57  ;;  %vm2062_vm11 = vcmp.eq.f32.partialorder %v2061_v47, 8.507059e+37  ;;  %vm2078_vm12 = vweird.f32 %v5800_v22  ;;  %v6897_v57 = vld [vmem:[#allocation80_spill] sm:$0xff] }
 0x4d1   :  { %v2074_v52 = vsub.f32 1.0, %v2073_v53  ;;  %v2087_v53 = vadd.f32 %v5537_v29, %v1983_v26  ;;  %vm2079_vm14 = vmor %vm2077_vm13, %vm2078_vm12  ;;  %v6899_v47 = vld [vmem:[#allocation108_spill] sm:$0xff]  ;;  %v6901_v26 = vld [vmem:[#allocation37_spill] sm:$0xff] }
 0x4d3   :  { %v2790_v28 = vpop.eup %2789  ;;  %v2075_v20 = vmul.f32 %v5800_v22, %v2074_v52  ;;  %v6895_v52 = vld [vmem:[#allocation23_spill] sm:$0xff] }
 0x4d4   :  { %v2792_v58 = vpop.eup %2791  ;;  %v2041_v41 = vmul.f32 %v2790_v28, %v2040_v8  ;;  %v2083_v28 = vand.u32 2147483648, %v5789_v61 }
 0x4d5   :  { %v2053_v27 = vmul.f32 %v2792_v58, %v2051_v55  ;;  %vm2058_vm8 = vweird.f32 %v2792_v58 }
 0x4d6   :  { %v5805_v33 = vadd.f32 %v2042_v2, %v2041_v41  ;;  %vm2059_vm10 = vmor %vm2057_vm9, %vm2058_vm8  ;;  %v6892_v41 = vld [vmem:[#allocation57_spill] sm:$0xff]  ;;  %v6893_v2 = vld [vmem:[#allocation100_spill] sm:$0xff] }
 0x4d7   :  { %v2054_v14 = vsub.f32 1.0, %v2053_v27  ;;  %v6894_v27 = vld [vmem:[#allocation76_spill] sm:$0xff] }
 0x4d8   :  { %2111 = vmatmul.f32.vlgmr.msrb.gmra.mxu2 %v5805_v33  ;;  %2131 = vmatmul.f32.vlgmr.msrb.gmra.mxu3 %v5805_v33 }
 0x4d9   :  { %v2055_v48 = vmul.f32 %v2792_v58, %v2054_v14  ;;  %2151 = vmatmul.f32.vlgmr.msra.gmra.mxu0 %v5805_v33  ;;  %2171 = vmatmul.f32.vlgmr.msra.gmra.mxu1 %v5805_v33  ;;  %v6896_v14 = vld [vmem:[#allocation104_spill] sm:$0xff] }
 0x4da   :  { %2255 = vmatpush.msrb.mxu2 %v5812_v17  ;;  %2384 = vmatpush.msrb.mxu3 %v5584_v42  ;;  %v5825_v42 = vld [vmem:[#allocation10 + $0x148] sm:$0xff] }
 0x4db   :  { %v2056_v10 = vadd.f32 %v2792_v58, %v2055_v48  ;;  %2404 = vmatpush.msra.mxu0 %v5581_v25  ;;  %2424 = vmatpush.msra.mxu1 %v5596_v12  ;;  %v2076_v12 = vadd.f32 %v5800_v22, %v2075_v20  ;;  %v6898_v48 = vld [vmem:[#allocation52_spill] sm:$0xff]  ;;  %v6900_v20 = vld [vmem:[#allocation43_spill] sm:$0xff] }
 0x4dc   :  { %2256 = vmatpush.msrb.mxu2 %v5818_v60  ;;  %2385 = vmatpush.msrb.mxu3 %v5590_v21  ;;  %v2046_v21 = vadd.f32 %v1923_v35, %v4185_v23  ;;  %v6904_v35 = vld [vmem:[#allocation59_spill] sm:$0xff] }
 0x4dd   :  { %v2060_v8 = vsel %vm2059_vm10, %v2792_v58, %v2056_v10  ;;  %2405 = vmatpush.msra.mxu0 %v5587_v46  ;;  %2425 = vmatpush.msra.mxu1 %v5605_v6  ;;  %v5836_v46 = vld [vmem:[#allocation10 + $0x130] sm:$0xff]  ;;  %v2081_v6 = vand.u32 2147483647, %v5789_v61  ;;  %v5843_v58 = vld [vmem:[#allocation10 + $0x118] sm:$0xff]  ;;  %v5850_v61 = vld [vmem:[#allocation10 + $0x100] sm:$0xff] }
 0x4de   :  { %v2065_v25 = vsel %vm2062_vm11, %v2064_v43, %v2060_v8  ;;  %2257 = vmatpush.msrb.mxu2 %v5825_v42  ;;  %2386 = vmatpush.msrb.mxu3 %v5599_v63  ;;  %v6903_v10 = vld [vmem:[#allocation41_spill] sm:$0xff]  ;;  %v6905_v43 = vld [vmem:[#allocation38_spill] sm:$0xff]  ;;  %v6907_v8 = vld [vmem:[#allocation20_spill] sm:$0xff] }
 0x4df   :  { %v2088_v55 = vmul.f32 %v2087_v53, %v2065_v25  ;;  %2406 = vmatpush.msra.mxu0 %v5593_v1  ;;  %2426 = vmatpush.msra.mxu1 %v5617_v5  ;;  %v2080_v1 = vsel %vm2079_vm14, %v5800_v22, %v2076_v12  ;;  %v2084_v5 = vor.u32 1.1754944e-38, %v2083_v28  ;;  %vm2082_vm15 = vcmp.eq.f32.partialorder %v2081_v6, 8.507059e+37  ;;  %v5856_v22 = vld [vmem:[#allocation10 + $0xe8] sm:$0xff]  ;;  %v6909_v25 = vld [vmem:[#allocation42_spill] sm:$0xff]  ;;  %v6914_v28 = vld [vmem:[#allocation25_spill] sm:$0xff] }
 0x4e0   :  { %2258 = vmatpush.msrb.mxu2 %v5836_v46  ;;  %2211 = vmatmul.f32.vlgmr.msra.gmra.mxu3 %v5805_v33  ;;  %v6908_v53 = vld [vmem:[#allocation47_spill] sm:$0xff] }
 0x4e1   :  { %v2089_v63 = vadd.f32 %v2088_v55, %v2046_v21  ;;  %2191 = vmatmul.f32.vlgmr.msra.gmra.mxu2 %v5805_v33  ;;  %2387 = vmatpush.msrb.mxu3 %v5608_v45  ;;  %v2085_v45 = vsel %vm2082_vm15, %v2084_v5, %v2080_v1  ;;  %v6911_v12 = vld [vmem:[#allocation39_spill] sm:$0xff]  ;;  %v6912_v21 = vld [vmem:[#allocation58_spill] sm:$0xff]  ;;  %v3246_v1 = vld [vmem:[#allocation10 + $0x30] sm:$0xff] }
 0x4e2   :  { %2259 = vmatpush.msrb.mxu2 %v5843_v58  ;;  %2407 = vmatpush.msra.mxu0 %v5602_v54  ;;  %v5862_v54 = vld [vmem:[#allocation10 + $0xd0] sm:$0xff]  ;;  %v6913_v55 = vld [vmem:[#allocation46_spill] sm:$0xff]  ;;  %v6916_v6 = vld [vmem:[#allocation63_spill] sm:$0xff] }
 0x4e3   :  { %2793 = vtanh.f32 %v2089_v63  ;;  %2388 = vmatpush.msrb.mxu3 %v5620_v50  ;;  %2427 = vmatpush.msra.mxu1 %v5629_v24  ;;  %v5868_v24 = vld [vmem:[#allocation10 + $0xb8] sm:$0xff]  ;;  %v3245_v63 = vld [vmem:[#allocation10 + $0x48] sm:$0xff]  ;;  %v6918_v5 = vld [vmem:[#allocation62_spill] sm:$0xff] }
 0x4e4   :  { %2260 = vmatpush.msrb.mxu2 %v5850_v61  ;;  %2408 = vmatpush.msra.mxu0 %v5614_v18  ;;  %v2091_v18 = vsub.f32 1.0, %v2085_v45 }
 0x4e5   :  { %2389 = vmatpush.msrb.mxu3 %v5632_v39  ;;  %2428 = vmatpush.msra.mxu1 %v5641_v9  ;;  %v2093_v39 = vmul.f32 %v2085_v45, %v5567_v59  ;;  %v5875_v9 = vld [vmem:[#allocation10 + $0xa0] sm:$0xff]  ;;  %v5885_v59 = vld [vmem:[#allocation10 + $0x88] sm:$0xff]  ;;  %v6919_v45 = vld [vmem:[#allocation84_spill] sm:$0xff] }
 0x4e6   :  { %2261 = vmatpush.msrb.mxu2 %v5856_v22  ;;  %2409 = vmatpush.msra.mxu0 %v5626_v32 }
 0x4e7   :  { %2390 = vmatpush.msrb.mxu3 %v5644_v40  ;;  %2429 = vmatpush.msra.mxu1 %v5653_v49  ;;  %v3240_v40 = vld [vmem:[#allocation10 + $0x70] sm:$0xff]  ;;  %v6880_v49 = vld [vmem:[#allocation45_spill] sm:$0xff] }
 0x4e8   :  { %2262 = vmatpush.msrb.mxu2 %v5862_v54  ;;  %2410 = vmatpush.msra.mxu0 %v5638_v44 }
 0x4e9   :  { %v2794_v50 = vpop.eup %2793  ;;  %2391 = vmatpush.msrb.mxu3 %v5656_v38  ;;  %2430 = vmatpush.msra.mxu1 %v5665_v19  ;;  %v6881_v38 = vld [vmem:[#allocation54_spill] sm:$0xff]  ;;  %v6884_v19 = vld [vmem:[#allocation64_spill] sm:$0xff] }
 0x4ea   :  { %2263 = vmatpush.msrb.mxu2 %v5868_v24  ;;  %v2092_v32 = vmul.f32 %v2794_v50, %v2091_v18  ;;  %2411 = vmatpush.msra.mxu0 %v5650_v16  ;;  %v3241_v16 = vld [vmem:[#allocation10 + $0x58] sm:$0xff] }
 0x4eb   :  { %2392 = vmatpush.msrb.mxu3 %v5668_v0  ;;  %2431 = vmatpush.msra.mxu1 %v5675_v30  ;;  %v6885_v0 = vld [vmem:[#allocation107_spill] sm:$0xff]  ;;  %v6887_v30 = vld [vmem:[#allocation72_spill] sm:$0xff]  ;;  %v6920_v50 = vld [vmem:[#allocation49_spill] sm:$0xff] }
 0x4ec   :  { %2264 = vmatpush.msrb.mxu2 %v5875_v9  ;;  %v5878_v44 = vadd.f32 %v2093_v39, %v2092_v32  ;;  %2412 = vmatpush.msra.mxu0 %v5662_v11  ;;  %v6882_v11 = vld [vmem:[#allocation48_spill] sm:$0xff]  ;;  %v6921_v32 = vld [vmem:[#allocation50_spill] sm:$0xff] }
 0x4ed   :  { %2393 = vmatpush.msrb.mxu3 %v5678_v31  ;;  %2432 = vmatpush.msra.mxu1 %v5685_v4  ;;  %v6888_v31 = vld [vmem:[#allocation60_spill] sm:$0xff]  ;;  %v6889_v4 = vld [vmem:[#allocation53_spill] sm:$0xff] }
 0x4ee   :  { %2231 = vmatmul.f32.vlgmr.msrb.gmra.mxu0 %v5878_v44  ;;  %2251 = vmatmul.f32.vlgmr.msrb.gmra.mxu1 %v5878_v44 }
 0x4ef   :  { %2265 = vmatpush.msrb.mxu2 %v5885_v59  ;;  %2413 = vmatpush.msra.mxu0 %v5421_v13  ;;  %v3242_v13 = vld [vmem:[#allocation10 + $0x40] sm:$0xff] }
 0x4f0   :  { %2394 = vmatpush.msrb.mxu3 %v5688_v56  ;;  %2433 = vmatpush.msra.mxu1 %v5436_v37  ;;  %v6883_v37 = vld [vmem:[#allocation21_spill] sm:$0xff]  ;;  %v6890_v56 = vld [vmem:[#allocation68_spill] sm:$0xff] }
 0x4f1   :  { %2266 = vmatpush.msrb.mxu2 %v3240_v40  ;;  %2414 = vmatpush.msra.mxu0 %v5427_v7  ;;  %v3243_v7 = vld [vmem:[#allocation10 + $0x28] sm:$0xff] }
 0x4f2   :  { %2395 = vmatpush.msrb.mxu3 %v5696_v62  ;;  %2434 = vmatpush.msra.mxu1 %v5444_v3  ;;  %v6886_v3 = vld [vmem:[#allocation22_spill] sm:$0xff]  ;;  %v6891_v62 = vld [vmem:[#allocation96_spill] sm:$0xff] }
 0x4f3   :  { %2267 = vmatpush.msrb.mxu2 %v3241_v16  ;;  %2415 = vmatpush.msra.mxu0 %v5433_v34  ;;  %v3244_v34 = vld [vmem:[#allocation10 + $0x10] sm:$0xff] }
 0x4f4   :  { %2396 = vmatpush.msrb.mxu3 %v6880_v49  ;;  %2435 = vmatpush.msra.mxu1 %v6881_v38 }
 0x4f5   :  { %2268 = vmatpush.msrb.mxu2 %v3242_v13  ;;  %2416 = vmatpush.msra.mxu0 %v6882_v11 }
 0x4f6   :  { %2397 = vmatpush.msrb.mxu3 %v6883_v37  ;;  %2436 = vmatpush.msra.mxu1 %v6884_v19 }
 0x4f7   :  { %2269 = vmatpush.msrb.mxu2 %v3243_v7  ;;  %2417 = vmatpush.msra.mxu0 %v6885_v0 }
 0x4f8   :  { %2398 = vmatpush.msrb.mxu3 %v6886_v3  ;;  %2437 = vmatpush.msra.mxu1 %v6887_v30 }
 0x4f9   :  { %2270 = vmatpush.msrb.mxu2 %v3244_v34  ;;  %2418 = vmatpush.msra.mxu0 %v6888_v31 }
 0x4fa   :  { %2271 = vmatmul.f32.vlgmr.msrb.gmra.mxu2 %v5878_v44  ;;  %2399 = vmatpush.msrb.mxu3 %v6889_v4 }
 0x4fb   :  { %2419 = vmatpush.msra.mxu0 %v6890_v56  ;;  %2444 = vmatpush.msra.mxu2 %v6891_v62  ;;  %v6924_v62 = vld [vmem:[#allocation35_spill] sm:$0xff] }
 0x4fc   :  { %2464 = vmatpush.msra.mxu3 %v6892_v41  ;;  %2438 = vmatpush.msra.mxu1 %v6894_v27 }
 0x4fd   :  { %2484 = vmatpush.msrb.mxu0 %v5812_v17  ;;  %2445 = vmatpush.msra.mxu2 %v6893_v2  ;;  %v6902_v17 = vld [vmem:[#allocation61_spill] sm:$0xff] }
 0x4fe   :  { %2465 = vmatpush.msra.mxu3 %v6895_v52  ;;  %2439 = vmatpush.msra.mxu1 %v6897_v57 }
 0x4ff   :  { %2485 = vmatpush.msrb.mxu0 %v5818_v60  ;;  %2446 = vmatpush.msra.mxu2 %v6896_v14  ;;  %v6906_v60 = vld [vmem:[#allocation24_spill] sm:$0xff] }
 0x500   :  { %2466 = vmatpush.msra.mxu3 %v6898_v48 }
 0x501   :  { %2486 = vmatpush.msrb.mxu0 %v5825_v42  ;;  %2447 = vmatpush.msra.mxu2 %v6899_v47  ;;  %v6910_v42 = vld [vmem:[#allocation65_spill] sm:$0xff] }
 0x502   :  { %2467 = vmatpush.msra.mxu3 %v6900_v20 }
 0x503   :  { %2487 = vmatpush.msrb.mxu0 %v5836_v46  ;;  %2448 = vmatpush.msra.mxu2 %v6901_v26  ;;  %v6915_v46 = vld [vmem:[#allocation51_spill] sm:$0xff] }
 0x504   :  { %2468 = vmatpush.msra.mxu3 %v6902_v17 }
 0x505   :  { %2488 = vmatpush.msrb.mxu0 %v5843_v58  ;;  %2449 = vmatpush.msra.mxu2 %v6903_v10  ;;  %v6917_v58 = vld [vmem:[#allocation69_spill] sm:$0xff] }
 0x506   :  { %2469 = vmatpush.msra.mxu3 %v6904_v35 }
 0x507   :  { %2489 = vmatpush.msrb.mxu0 %v5850_v61  ;;  %2450 = vmatpush.msra.mxu2 %v6905_v43  ;;  %v3247_v61 = vld [vmem:[#allocation10 + $0x18] sm:$0xff] }
 0x508   :  { %2470 = vmatpush.msra.mxu3 %v6906_v60 }
 0x509   :  { %2490 = vmatpush.msrb.mxu0 %v5856_v22  ;;  %2451 = vmatpush.msra.mxu2 %v6907_v8  ;;  %v3248_v22 = vld [vmem:[#allocation10] sm:$0xff] }
 0x50a   :  { %2471 = vmatpush.msra.mxu3 %v6908_v53 }
 0x50b   :  { %2491 = vmatpush.msrb.mxu0 %v5862_v54  ;;  %2452 = vmatpush.msra.mxu2 %v6909_v25  ;;  %v3249_v54 = vld [vmem:[#allocation10 + $0x8] sm:$0xff] }
 0x50c   :  { %2472 = vmatpush.msra.mxu3 %v6910_v42 }
 0x50d   :  { %2492 = vmatpush.msrb.mxu0 %v5868_v24  ;;  %2453 = vmatpush.msra.mxu2 %v6911_v12 }
 0x50e   :  { %2473 = vmatpush.msra.mxu3 %v6912_v21  ;;  %v6925_v21 = vld [vmem:[#allocation109_spill] sm:$0xff] }
 0x50f   :  { %2493 = vmatpush.msrb.mxu0 %v5875_v9  ;;  %2454 = vmatpush.msra.mxu2 %v6913_v55  ;;  %v6922_v9 = vld [vmem:[#allocation55_spill] sm:$0xff] }
 0x510   :  { %2474 = vmatpush.msra.mxu3 %v6914_v28 }
 0x511   :  { %2494 = vmatpush.msrb.mxu0 %v5885_v59  ;;  %2455 = vmatpush.msra.mxu2 %v6915_v46 }
 0x512   :  { %2475 = vmatpush.msra.mxu3 %v6916_v6 }
 0x513   :  { %2495 = vmatpush.msrb.mxu0 %v3240_v40  ;;  %2456 = vmatpush.msra.mxu2 %v3245_v63  ;;  %v6923_v40 = vld [vmem:[#allocation56_spill] sm:$0xff] }
 0x514   :  { %2476 = vmatpush.msra.mxu3 %v6917_v58 }
 0x515   :  { %2496 = vmatpush.msrb.mxu0 %v3241_v16  ;;  %2457 = vmatpush.msra.mxu2 %v3246_v1 }
 0x516   :  { %2477 = vmatpush.msra.mxu3 %v6918_v5 }
 0x517   :  { %2497 = vmatpush.msrb.mxu0 %v3242_v13  ;;  %2458 = vmatpush.msra.mxu2 %v3247_v61 }
 0x518   :  { %2478 = vmatpush.msra.mxu3 %v6919_v45 }
 0x519   :  { %2498 = vmatpush.msrb.mxu0 %v3243_v7  ;;  %2459 = vmatpush.msra.mxu2 %v3248_v22 }
 0x51a   :  { %2479 = vmatpush.msra.mxu3 %v3249_v54 }
 0x51b   :  { %2499 = vmatpush.msrb.mxu0 %v3244_v34 }
 0x536   :  { %v2278_v18 = vpop.xlane.xlu1 %2277 }
 0x537   :  { %v2279_v24 = vmul.f32 %v2278_v18, %v6920_v50  ;;  %v2280_v39 = vmul.f32 %v2278_v18, %v6921_v32  ;;  %v2281_v55 = vmul.f32 %v2278_v18, %v6925_v21  ;;  %v2564_v21 = vld [vmem:[#allocation11 + $0x48] sm:$0xff] }
 0x539   :  { %v2282_v59 = vadd.f32 %v2279_v24, %v6922_v9  ;;  %v2283_v16 = vadd.f32 %v2280_v39, %v6923_v40  ;;  %v2284_v61 = vadd.f32 %v2281_v55, %v6838_v15  ;;  %v2563_v55 = vld [vmem:[#allocation11 + $0x40] sm:$0xff] }
 0x556   :  { %v2152_v7 = vpop.f32.mrf.mxu0  ;;  %v2172_v0 = vpop.f32.mrf.mxu1 }
 0x557   :  { %v2333_v56 = vadd.f32 %v2172_v0, %v6877_v51  ;;  %v2325_v58 = vadd.f32 %v5795_v36, %v2152_v7 }
 0x55b   :  { %v2112_v49 = vpop.f32.mrf.mxu2  ;;  %v2132_v38 = vpop.f32.mrf.mxu3 }
 0x55c   :  { %v2285_v13 = vadd.f32 %v2282_v59, %v2112_v49  ;;  %v2305_v11 = vadd.f32 %v2283_v16, %v2132_v38 }
 0x55e   :  { %v2642_v37 = vmul.f32 -1.442695, %v2285_v13  ;;  %v2643_v19 = vmul.f32 -1.442695, %v2305_v11 }
 0x560   :  { %2795 = vpow2.f32 %v2642_v37 }
 0x561   :  { %2797 = vpow2.f32 %v2643_v19 }
 0x564   :  { %v2192_v31 = vpop.f32.mrf.mxu2 }
 0x565   :  { %v2334_v41 = vadd.f32 %v2192_v31, %v6924_v62 }
 0x566   :  { %v2796_v3 = vpop.eup %2795 }
 0x567   :  { %v2798_v30 = vpop.eup %2797  ;;  %v2289_v34 = vadd.f32 1.0, %v2796_v3 }
 0x568   :  { %v2309_v4 = vadd.f32 1.0, %v2798_v30  ;;  %v2212_v30 = vpop.f32.mrf.mxu3 }
 0x569   :  { %2799 = vrcp.f32 %v2289_v34  ;;  %v2301_v35 = vand.u32 2147483648, %v2289_v34  ;;  %v2299_v8 = vand.u32 2147483647, %v2289_v34  ;;  %vm2295_vm1 = vweird.f32 %v2289_v34 }
 0x56a   :  { %2801 = vrcp.f32 %v2309_v4  ;;  %v2321_v45 = vand.u32 2147483648, %v2309_v4  ;;  %vm2315_vm5 = vweird.f32 %v2309_v4  ;;  %v2319_v54 = vand.u32 2147483647, %v2309_v4 }
 0x56b   :  { %v2232_v2 = vpop.f32.mrf.mxu0  ;;  %v2252_v27 = vpop.f32.mrf.mxu1  ;;  %v2302_v28 = vor.u32 1.1754944e-38, %v2301_v35  ;;  %vm2300_vm3 = vcmp.eq.f32.partialorder %v2299_v8, 8.507059e+37  ;;  %v2568_v8 = vld [vmem:[#allocation11 + $0x68] sm:$0xff] }
 0x56c   :  { %v2336_v52 = vadd.f32 %v2333_v56, %v2232_v2  ;;  %v2356_v14 = vadd.f32 %v2334_v41, %v2252_v27  ;;  %v2322_v32 = vor.u32 1.1754944e-38, %v2321_v45  ;;  %vm2320_vm7 = vcmp.eq.f32.partialorder %v2319_v54, 8.507059e+37  ;;  %v2560_v54 = vld [vmem:[#allocation11 + $0x28] sm:$0xff] }
 0x56d   :  { %v2335_v27 = vadd.f32 %v2212_v30, %v4185_v23 }
 0x56e   :  { %v2644_v57 = vmul.f32 -1.442695, %v2336_v52  ;;  %v2645_v48 = vmul.f32 -1.442695, %v2356_v14 }
 0x56f   :  { %v2800_v47 = vpop.eup %2799 }
 0x570   :  { %v2802_v20 = vpop.eup %2801  ;;  %v2291_v26 = vmul.f32 %v2800_v47, %v2289_v34  ;;  %2803 = vpow2.f32 %v2644_v57  ;;  %vm2296_vm0 = vweird.f32 %v2800_v47 }
 0x571   :  { %v2311_v17 = vmul.f32 %v2802_v20, %v2309_v4  ;;  %2805 = vpow2.f32 %v2645_v48  ;;  %vm2297_vm2 = vmor %vm2295_vm1, %vm2296_vm0  ;;  %vm2316_vm4 = vweird.f32 %v2802_v20 }
 0x572   :  { %v2292_v10 = vsub.f32 1.0, %v2291_v26  ;;  %vm2317_vm6 = vmor %vm2315_vm5, %vm2316_vm4 }
 0x573   :  { %v2312_v43 = vsub.f32 1.0, %v2311_v17 }
 0x574   :  { %v2293_v60 = vmul.f32 %v2800_v47, %v2292_v10 }
 0x575   :  { %v2313_v42 = vmul.f32 %v2802_v20, %v2312_v43  ;;  %v2570_v43 = vld [vmem:[#allocation11 + $0x78] sm:$0xff] }
 0x576   :  { %v2804_v53 = vpop.eup %2803  ;;  %v2294_v25 = vadd.f32 %v2800_v47, %v2293_v60  ;;  %2575 = vmatpush.msrb.mxu1 %v2570_v43  ;;  %v2569_v60 = vld [vmem:[#allocation11 + $0x70] sm:$0xff] }
 0x577   :  { %v2806_v12 = vpop.eup %2805  ;;  %v2340_v46 = vadd.f32 1.0, %v2804_v53  ;;  %v2314_v5 = vadd.f32 %v2802_v20, %v2313_v42  ;;  %v2567_v53 = vld [vmem:[#allocation11 + $0x60] sm:$0xff]  ;;  %v2566_v42 = vld [vmem:[#allocation11 + $0x58] sm:$0xff] }
 0x578   :  { %v2298_v6 = vsel %vm2297_vm2, %v2800_v47, %v2294_v25  ;;  %v2360_v63 = vadd.f32 1.0, %v2806_v12  ;;  %2576 = vmatpush.msrb.mxu1 %v2569_v60 }
 0x579   :  { %v2303_v1 = vsel %vm2300_vm3, %v2302_v28, %v2298_v6  ;;  %2807 = vrcp.f32 %v2340_v46  ;;  %v2318_v50 = vsel %vm2317_vm6, %v2802_v20, %v2314_v5  ;;  %v2352_v49 = vand.u32 2147483648, %v2340_v46  ;;  %v2562_v6 = vld [vmem:[#allocation11 + $0x38] sm:$0xff] }
 0x57a   :  { %2809 = vrcp.f32 %v2360_v63  ;;  %v2326_v22 = vmul.f32 %v2325_v58, %v2303_v1  ;;  %v2323_v59 = vsel %vm2320_vm7, %v2322_v32, %v2318_v50  ;;  %v2350_v15 = vand.u32 2147483647, %v2340_v46  ;;  %2577 = vmatpush.msrb.mxu1 %v2568_v8  ;;  %v2558_v50 = vld [vmem:[#allocation11 + $0x18] sm:$0xff] }
 0x57b   :  { %v2329_v13 = vsub.f32 1.0, %v2323_v59  ;;  %vm2346_vm9 = vweird.f32 %v2340_v46  ;;  %v2331_v3 = vmul.f32 %v2323_v59, %v5805_v33  ;;  %v2353_v34 = vor.u32 1.1754944e-38, %v2352_v49 }
 0x57c   :  { %v2327_v18 = vadd.f32 %v2326_v22, %v2284_v61  ;;  %vm2351_vm11 = vcmp.eq.f32.partialorder %v2350_v15, 8.507059e+37  ;;  %v2372_v14 = vand.u32 2147483648, %v2360_v63  ;;  %vm2366_vm13 = vweird.f32 %v2360_v63  ;;  %2578 = vmatpush.msrb.mxu1 %v2567_v53  ;;  %v2561_v61 = vld [vmem:[#allocation11 + $0x30] sm:$0xff] }
 0x57d   :  { %v2272_v19 = vpop.f32.mrf.mxu2  ;;  %v2370_v33 = vand.u32 2147483647, %v2360_v63 }
 0x57e   :  { %2811 = vtanh.f32 %v2327_v18  ;;  %v2376_v4 = vadd.f32 %v5537_v29, %v2272_v19  ;;  %v2373_v47 = vor.u32 1.1754944e-38, %v2372_v14  ;;  %2579 = vmatpush.msrb.mxu1 %v2566_v42  ;;  %v2559_v18 = vld [vmem:[#allocation11 + $0x20] sm:$0xff] }
 0x57f   :  { %v2808_v24 = vpop.eup %2807  ;;  %vm2371_vm15 = vcmp.eq.f32.partialorder %v2370_v33, 8.507059e+37 }
 0x580   :  { %v2810_v39 = vpop.eup %2809  ;;  %v2342_v9 = vmul.f32 %v2808_v24, %v2340_v46  ;;  %vm2347_vm8 = vweird.f32 %v2808_v24 }
 0x581   :  { %v2362_v36 = vmul.f32 %v2810_v39, %v2360_v63  ;;  %vm2348_vm10 = vmor %vm2346_vm9, %vm2347_vm8  ;;  %vm2367_vm12 = vweird.f32 %v2810_v39 }
 0x582   :  { %v2343_v40 = vsub.f32 1.0, %v2342_v9  ;;  %vm2368_vm14 = vmor %vm2366_vm13, %vm2367_vm12 }
 0x583   :  { %v2363_v16 = vsub.f32 1.0, %v2362_v36  ;;  %v2555_v36 = vld [vmem:[#allocation11] sm:$0xff] }
 0x584   :  { %v2344_v38 = vmul.f32 %v2808_v24, %v2343_v40  ;;  %v2812_v11 = vpop.eup %2811 }
 0x585   :  { %v2364_v37 = vmul.f32 %v2810_v39, %v2363_v16  ;;  %v2330_v0 = vmul.f32 %v2812_v11, %v2329_v13 }
 0x586   :  { %v2345_v7 = vadd.f32 %v2808_v24, %v2344_v38 }
 0x587   :  { %v2332_v56 = vadd.f32 %v2331_v3, %v2330_v0  ;;  %v2365_v2 = vadd.f32 %v2810_v39, %v2364_v37 }
 0x588   :  { %v2349_v31 = vsel %vm2348_vm10, %v2808_v24, %v2345_v7  ;;  %v2556_v24 = vld [vmem:[#allocation11 + $0x8] sm:$0xff] }
 0x589   :  { %v2354_v41 = vsel %vm2351_vm11, %v2353_v34, %v2349_v31  ;;  %2400 = vmatmul.f32.vlgmr.msrb.gmra.mxu3 %v2332_v56  ;;  %2420 = vmatmul.f32.vlgmr.msra.gmra.mxu0 %v2332_v56  ;;  %v2369_v48 = vsel %vm2368_vm14, %v2810_v39, %v2365_v2  ;;  %v3250_v34 = vld [vmem:[%s5985_s7] ss:$0 sm:$0xff] }
 0x58a   :  { %v2377_v52 = vmul.f32 %v2376_v4, %v2354_v41  ;;  %2440 = vmatmul.f32.vlgmr.msra.gmra.mxu1 %v2332_v56  ;;  %v2374_v29 = vsel %vm2371_vm15, %v2373_v47, %v2369_v48 }
 0x58b   :  { %v2380_v20 = vsub.f32 1.0, %v2374_v29  ;;  %v2382_v10 = vmul.f32 %v2374_v29, %v5878_v44  ;;  %v2565_v44 = vld [vmem:[#allocation11 + $0x50] sm:$0xff] }
 0x58c   :  { %v2378_v57 = vadd.f32 %v2377_v52, %v2335_v27  ;;  %2580 = vmatpush.msrb.mxu1 %v2565_v44 }
 0x58e   :  { %2813 = vtanh.f32 %v2378_v57  ;;  %2581 = vmatpush.msrb.mxu1 %v2564_v21 }
 0x590   :  { %2582 = vmatpush.msrb.mxu1 %v2563_v55 }
 0x592   :  { %2583 = vmatpush.msrb.mxu1 %v2562_v6 }
 0x594   :  { %v2814_v26 = vpop.eup %2813  ;;  %2584 = vmatpush.msrb.mxu1 %v2561_v61 }
 0x595   :  { %v2381_v17 = vmul.f32 %v2814_v26, %v2380_v20 }
 0x596   :  { %2585 = vmatpush.msrb.mxu1 %v2560_v54 }
 0x597   :  { %v5960_v35 = vadd.f32 %v2382_v10, %v2381_v17 }
 0x598   :  { %2586 = vmatpush.msrb.mxu1 %v2559_v18 }
 0x599   :  { %2460 = vmatmul.f32.vlgmr.msra.gmra.mxu2 %v5960_v35  ;;  %2480 = vmatmul.f32.vlgmr.msra.gmra.mxu3 %v5960_v35 }
 0x59a   :  { %2500 = vmatmul.f32.vlgmr.msrb.gmra.mxu0 %v5960_v35  ;;  %2587 = vmatpush.msrb.mxu1 %v2558_v50 }
 0x606   :  { %v2421_v12 = vpop.f32.mrf.mxu0 }
 0x607   :  { %v2505_v28 = vadd.f32 %v2421_v12, %v6924_v62  ;;  %v2557_v62 = vld [vmem:[#allocation11 + $0x10] sm:$0xff]  ;;  %v2441_v3 = vpop.f32.mrf.mxu1 }
 0x608   :  { %2588 = vmatpush.msrb.mxu1 %v2557_v62  ;;  %v2506_v2 = vadd.f32 %v2441_v3, %v4185_v23  ;;  %v2664_v23 = vld [vmem:[%s5987_s9] ss:$0 sm:$0xff] }
 0x60a   :  { %2589 = vmatpush.msrb.mxu1 %v2556_v24 }
 0x60c   :  { %v2401_v25 = vpop.f32.mrf.mxu3  ;;  %2590 = vmatpush.msrb.mxu1 %v2555_v36 }
 0x60d   :  { %v2504_v46 = vadd.f32 %v2401_v25, %v6877_v51 }
 0x617   :  { %v2501_v19 = vpop.f32.mrf.mxu0 }
 0x618   :  { %v2547_v31 = vadd.f32 %v3250_v34, %v2501_v19 }
 0x61c   :  { %v2461_v63 = vpop.f32.mrf.mxu2  ;;  %v2481_v58 = vpop.f32.mrf.mxu3 }
 0x61d   :  { %v2507_v1 = vadd.f32 %v2504_v46, %v2461_v63  ;;  %v2527_v5 = vadd.f32 %v2505_v28, %v2481_v58 }
 0x61f   :  { %v2646_v45 = vmul.f32 -1.442695, %v2507_v1  ;;  %v2647_v22 = vmul.f32 -1.442695, %v2527_v5 }
 0x621   :  { %2815 = vpow2.f32 %v2646_v45 }
 0x622   :  { %2817 = vpow2.f32 %v2647_v22 }
 0x627   :  { %v2816_v51 = vpop.eup %2815 }
 0x628   :  { %v2818_v32 = vpop.eup %2817  ;;  %v2511_v39 = vadd.f32 1.0, %v2816_v51 }
 0x629   :  { %v2531_v9 = vadd.f32 1.0, %v2818_v32 }
 0x62a   :  { %2819 = vrcp.f32 %v2511_v39  ;;  %v2523_v15 = vand.u32 2147483648, %v2511_v39  ;;  %v2521_v37 = vand.u32 2147483647, %v2511_v39  ;;  %vm2517_vm1 = vweird.f32 %v2511_v39 }
 0x62b   :  { %2821 = vrcp.f32 %v2531_v9  ;;  %v2543_v27 = vand.u32 2147483648, %v2531_v9  ;;  %vm2537_vm5 = vweird.f32 %v2531_v9  ;;  %v2541_v14 = vand.u32 2147483647, %v2531_v9 }
 0x62c   :  { %v2524_v30 = vor.u32 1.1754944e-38, %v2523_v15  ;;  %vm2522_vm3 = vcmp.eq.f32.partialorder %v2521_v37, 8.507059e+37 }
 0x62d   :  { %v2544_v48 = vor.u32 1.1754944e-38, %v2543_v27  ;;  %vm2542_vm7 = vcmp.eq.f32.partialorder %v2541_v14, 8.507059e+37 }
 0x630   :  { %v2820_v59 = vpop.eup %2819 }
 0x631   :  { %v2822_v40 = vpop.eup %2821  ;;  %v2513_v16 = vmul.f32 %v2820_v59, %v2511_v39  ;;  %vm2518_vm0 = vweird.f32 %v2820_v59 }
 0x632   :  { %v2533_v49 = vmul.f32 %v2822_v40, %v2531_v9  ;;  %vm2519_vm2 = vmor %vm2517_vm1, %vm2518_vm0  ;;  %vm2538_vm4 = vweird.f32 %v2822_v40 }
 0x633   :  { %v2514_v38 = vsub.f32 1.0, %v2513_v16  ;;  %vm2539_vm6 = vmor %vm2537_vm5, %vm2538_vm4 }
 0x634   :  { %v2534_v13 = vsub.f32 1.0, %v2533_v49 }
 0x635   :  { %v2515_v11 = vmul.f32 %v2820_v59, %v2514_v38 }
 0x636   :  { %v2535_v7 = vmul.f32 %v2822_v40, %v2534_v13 }
 0x637   :  { %v2516_v0 = vadd.f32 %v2820_v59, %v2515_v11 }
 0x638   :  { %v2536_v41 = vadd.f32 %v2822_v40, %v2535_v7 }
 0x639   :  { %v2520_v4 = vsel %vm2519_vm2, %v2820_v59, %v2516_v0 }
 0x63a   :  { %v2525_v56 = vsel %vm2522_vm3, %v2524_v30, %v2520_v4  ;;  %v2540_v57 = vsel %vm2539_vm6, %v2822_v40, %v2536_v41 }
 0x63b   :  { %v2548_v52 = vmul.f32 %v2547_v31, %v2525_v56  ;;  %v2545_v47 = vsel %vm2542_vm7, %v2544_v48, %v2540_v57 }
 0x63c   :  { %v2551_v29 = vsub.f32 1.0, %v2545_v47  ;;  %v2553_v17 = vmul.f32 %v2545_v47, %v5960_v35 }
 0x63d   :  { %v2549_v33 = vadd.f32 %v2548_v52, %v2506_v2 }
 0x63f   :  { %2823 = vtanh.f32 %v2549_v33 }
 0x645   :  { %v2824_v20 = vpop.eup %2823 }
 0x646   :  { %v2552_v26 = vmul.f32 %v2824_v20, %v2551_v29 }
 0x648   :  { %v2554_v10 = vadd.f32 %v2553_v17, %v2552_v26 }
 0x64a   :  { %2591 = vmatmul.f32.vlgmr.msrb.gmra.mxu1 %v2554_v10 }
 0x6c7   :  { %v2592_v43 = vpop.f32.mrf.mxu1 }
 0x6c8   :  { %v2593_v60 = vadd.f32 %v2664_v23, %v2592_v43 }
 0x6ca   :  { %2595 = vst [vmem:[#allocation13] sm:$0xff] %v2593_v60 }
 0x6cb   :  { %2606 = dma.vmem_to_hbm [thread:$0]  %s2602_s18, 128, %s2604_s2, [#allocation4]  }
 0x6cc   :  { %3427 = dma.done.wait [#allocation4], 128  }
 0x6cd   :  { %3428 = vsyncadd [#allocation4], 4294967168 }
 0x6ce   :  { %2611 = vsyncpa [#allocation3], 1 }
 0x6cf   :  { %2612 = vsyncpa [#allocation6], 1 }
 0x6d0   :  { %2613 = vsyncpa [#allocation9], 1 }
 0x6d1   :  { %2614 = vsyncpa [#allocation12], 1 }
 0x6d2   :  { %2615 = vsyncpa [#allocation4], 1 }

</bundles_post_ra>
